<compile_context>
chip_gen: v7x
topology: tpu7x:2x2x1
jax: 0.10.0
libtpu: 0.0.40
codegen_flags: <defaults>
</compile_context>

<pallas_src>
import math
from functools import partial

import jax
import jax.numpy as jnp
from jax.experimental import pallas as pl
from jax.experimental.pallas import tpu as pltpu

NUM_CLASSES = 1
VMEM_LIMIT = 48 * 1024 * 1024   # explicit budget, safe on v5e/v6e (128MiB) and v7x (64MiB)


def _round_up(x, m):
    return ((x + m - 1) // m) * m


# ----------------------------------------------------------------------------
# Pallas kernel: tiled linear  y = relu?(x @ w + b)
#   bf16 MXU operands, f32 accumulation, M-tiled + pipelined, lane-dense N.
# ----------------------------------------------------------------------------
def _linear_kernel(x_ref, w_ref, b_ref, o_ref, *, relu):
    acc = jnp.dot(x_ref[...], w_ref[...], preferred_element_type=jnp.float32)
    acc = acc + b_ref[...]
    if relu:
        acc = jnp.maximum(acc, 0.0)
    o_ref[...] = acc


def pallas_linear(x, w, b, relu=False, tile_m=512):
    """x: (M, K) -> (M, N) float32.  MXU operands cast to bf16."""
    M, K = x.shape
    N = w.shape[1]
    TM = min(tile_m, _round_up(M, 16))        # multiple of 16 (bf16 sublane pack)
    Mp = _round_up(M, TM)
    xp = x if Mp == M else jnp.pad(x, ((0, Mp - M), (0, 0)))
    out = pl.pallas_call(
        partial(_linear_kernel, relu=relu),
        out_shape=jax.ShapeDtypeStruct((Mp, N), jnp.float32),
        grid=(Mp // TM,),
        in_specs=[
            pl.BlockSpec((TM, K), lambda i: (i, 0)),
            pl.BlockSpec((K, N), lambda i: (0, 0)),
            pl.BlockSpec((1, N), lambda i: (0, 0)),
        ],
        out_specs=pl.BlockSpec((TM, N), lambda i: (i, 0)),
        compiler_params=pltpu.CompilerParams(
            dimension_semantics=("parallel",),
            vmem_limit_bytes=VMEM_LIMIT,
        ),
    )(xp.astype(jnp.bfloat16), w.astype(jnp.bfloat16),
      b.reshape(1, N).astype(jnp.float32))
    return out[:M] if Mp != M else out


# ----------------------------------------------------------------------------
# Pallas kernel: per-(branch, sample) conv2 with in-VMEM im2col shifts.
#   x tile: (L+2p, Cin) f32; weights: (k, Cin, Cout) bf16; relu + mask fused.
# ----------------------------------------------------------------------------
def _conv2_kernel(x_ref, w_ref, b_ref, m_ref, o_ref, *, k):
    L = o_ref.shape[2]
    Cout = o_ref.shape[3]
    acc = jnp.zeros((L, Cout), jnp.float32)
    for j in range(k):                                   # static unroll, k=7
        xs = x_ref[0, 0, j:j + L, :].astype(jnp.bfloat16)   # shifted view in VMEM
        acc = acc + jnp.dot(xs, w_ref[0, j], preferred_element_type=jnp.float32)
    acc = acc + b_ref[0]
    acc = jnp.maximum(acc, 0.0)
    acc = acc * m_ref[0, 0]                              # validity mask (L, 1)
    o_ref[0, 0] = acc


def pallas_conv2_branches(x2, W2, B2, m2):
    """x2: (3, BN, L, Cin) f32, W2: (3, k, Cin, Cout), B2: (3,1,Cout), m2: (3,BN,L,1)."""
    G, BN, L, Cin = x2.shape
    k = W2.shape[1]
    Cout = W2.shape[-1]
    p = (k - 1) // 2
    x2p = jnp.pad(x2, ((0, 0), (0, 0), (p, p), (0, 0)))
    return pl.pallas_call(
        partial(_conv2_kernel, k=k),
        out_shape=jax.ShapeDtypeStruct((G, BN, L, Cout), jnp.float32),
        grid=(G, BN),
        in_specs=[
            pl.BlockSpec((1, 1, L + 2 * p, Cin), lambda g, n: (g, n, 0, 0)),
            pl.BlockSpec((1, k, Cin, Cout), lambda g, n: (g, 0, 0, 0)),
            pl.BlockSpec((1, 1, Cout), lambda g, n: (g, 0, 0)),
            pl.BlockSpec((1, 1, L, 1), lambda g, n: (g, n, 0, 0)),
        ],
        out_specs=pl.BlockSpec((1, 1, L, Cout), lambda g, n: (g, n, 0, 0)),
        compiler_params=pltpu.CompilerParams(
            dimension_semantics=("parallel", "parallel"),
            vmem_limit_bytes=VMEM_LIMIT,
        ),
    )(x2p, W2.astype(jnp.bfloat16), B2.astype(jnp.float32), m2.astype(jnp.float32))


# ----------------------------------------------------------------------------
# Pallas kernel: fused tail
#   (per batch) qkv proj -> 4-head masked attention -> out proj ->
#   masked mean pool -> fc1 (relu) -> fc2.  Everything stays in VMEM.
# ----------------------------------------------------------------------------
def _tail_kernel(x_ref, m_ref, w_in_ref, b_in_ref, w_out_ref, b_out_ref,
                 w1_ref, b1_ref, w2_ref, b2_ref, o_ref, *, n_heads, scale):
    x = x_ref[0]                      # (S, E) f32
    mask = m_ref[0]                   # (1, S) f32, 1 = valid key/query
    S, E = x.shape
    hd = E // n_heads

    qkv = jnp.dot(x.astype(jnp.bfloat16), w_in_ref[...],
                  preferred_element_type=jnp.float32) + b_in_ref[...]   # (S, 3E)

    heads = []
    for h in range(n_heads):          # static unroll (n_heads = 4)
        qh = qkv[:, h * hd:(h + 1) * hd].astype(jnp.bfloat16)
        kh = qkv[:, E + h * hd:E + (h + 1) * hd].astype(jnp.bfloat16)
        vh = qkv[:, 2 * E + h * hd:2 * E + (h + 1) * hd].astype(jnp.bfloat16)
        s = jax.lax.dot_general(qh, kh, (((1,), (1,)), ((), ())),
                                preferred_element_type=jnp.float32) * scale  # (S, S)
        s = jnp.where(mask > 0.5, s, jnp.float32(-1e30))   # keep f32 fill, not -inf
        mmax = jnp.max(s, axis=-1, keepdims=True)
        p = jnp.exp(s - mmax)
        denom = jnp.sum(p, axis=-1, keepdims=True)
        p = p * pl.reciprocal(denom, approx=True)          # EUP slot, ~free
        heads.append(jnp.dot(p.astype(jnp.bfloat16), vh,
                             preferred_element_type=jnp.float32))
    attn = jnp.concatenate(heads, axis=-1)                  # (S, E) f32

    out = jnp.dot(attn.astype(jnp.bfloat16), w_out_ref[...],
                  preferred_element_type=jnp.float32) + b_out_ref[...]   # (S, E)

    # masked sum over tokens == (attn_out * mask).sum(dim=seq)
    sum_feat = jnp.dot(mask, out, preferred_element_type=jnp.float32)   # (1, E)
    count = jnp.sum(mask) + 1e-8
    pooled = sum_feat / count

    h1 = jnp.dot(pooled.astype(jnp.bfloat16), w1_ref[...],
                 preferred_element_type=jnp.float32) + b1_ref[...]
    h1 = jnp.maximum(h1, 0.0)
    y = jnp.dot(h1.astype(jnp.bfloat16), w2_ref[...],
                preferred_element_type=jnp.float32) + b2_ref[...]       # (1, NC)
    o_ref[0] = y


def pallas_attention_tail(x, mask, params, n_heads=4):
    """x: (B, S, 64) f32, mask: (B, S) float (1 = valid) -> (B, NUM_CLASSES)."""
    B, S, E = x.shape
    hd = E // n_heads
    maskf = mask.astype(jnp.float32).reshape(B, 1, S)

    def bf16(name):
        return params[name].astype(jnp.bfloat16)

    def bias(name, n):
        return params[name].reshape(1, n).astype(jnp.float32)

    out = pl.pallas_call(
        partial(_tail_kernel, n_heads=n_heads, scale=1.0 / math.sqrt(hd)),
        out_shape=jax.ShapeDtypeStruct((B, 1, NUM_CLASSES), jnp.float32),
        grid=(B,),
        in_specs=[
            pl.BlockSpec((1, S, E), lambda b: (b, 0, 0)),
            pl.BlockSpec((1, 1, S), lambda b: (b, 0, 0)),
            pl.BlockSpec((E, 3 * E), lambda b: (0, 0)),
            pl.BlockSpec((1, 3 * E), lambda b: (0, 0)),
            pl.BlockSpec((E, E), lambda b: (0, 0)),
            pl.BlockSpec((1, E), lambda b: (0, 0)),
            pl.BlockSpec((E, E), lambda b: (0, 0)),
            pl.BlockSpec((1, E), lambda b: (0, 0)),
            pl.BlockSpec((E, NUM_CLASSES), lambda b: (0, 0)),
            pl.BlockSpec((1, NUM_CLASSES), lambda b: (0, 0)),
        ],
        out_specs=pl.BlockSpec((1, 1, NUM_CLASSES), lambda b: (b, 0, 0)),
        compiler_params=pltpu.CompilerParams(
            dimension_semantics=("parallel",),
            vmem_limit_bytes=VMEM_LIMIT,
        ),
    )(x.astype(jnp.float32), maskf,
      bf16("attn_w_in"), bias("attn_b_in", 3 * E),
      bf16("attn_w_out"), bias("attn_b_out", E),
      bf16("reg_w1"), bias("reg_b1", E),
      bf16("reg_w2"), bias("reg_b2", NUM_CLASSES))
    return out[:, 0, :]


# ----------------------------------------------------------------------------
# Mask "conv" helper (all-ones window sum, same padding) — plain JAX glue
# ----------------------------------------------------------------------------
def _sliding_sum(m, k):
    p = (k - 1) // 2
    L = m.shape[1]
    mp = jnp.pad(m, ((0, 0), (p, p)))
    out = jnp.zeros_like(m)
    for j in range(k):
        out = out + mp[:, j:j + L]
    return out


# ----------------------------------------------------------------------------
# Multi-scale XANES extractor (branches fused, channels-last)
# ----------------------------------------------------------------------------
def xanes_extractor(x, x_mask, params):
    # x: (B, N, L), x_mask: (B, N, L) bool -> (B, N, 32)
    B, N, L = x.shape
    assert L % 10 == 0  # AdaptiveAvgPool1d(10) == exact reshape-mean
    BN = B * N
    KMAX, PAD = 7, 3
    xr = x.reshape(BN, L).astype(jnp.float32)
    m0 = x_mask.reshape(BN, L).astype(jnp.float32)

    # ---- build fused (k padded to 7) conv weights -------------------------
    w1_list, b1_list, w2_list, b2_list = [], [], [], []
    for bi, kk in zip((1, 2, 3), (3, 5, 7)):
        p = (KMAX - kk) // 2
        w1 = jnp.pad(params[f"b{bi}_conv1_w"], ((0, 0), (0, 0), (p, p)))  # (64,1,7)
        w1_list.append(w1.reshape(64, KMAX).T)                            # (7,64)
        b1_list.append(params[f"b{bi}_conv1_b"])
        w2 = jnp.pad(params[f"b{bi}_conv2_w"], ((0, 0), (0, 0), (p, p)))  # (128,64,7)
        w2_list.append(jnp.transpose(w2, (2, 1, 0)))                      # (7,64,128)
        b2_list.append(params[f"b{bi}_conv2_b"])
    W1 = jnp.concatenate(w1_list, axis=1)                                 # (7, 192)
    B1 = jnp.concatenate(b1_list, axis=0)                                 # (192,)
    W2 = jnp.stack(w2_list, axis=0)                                       # (3,7,64,128)
    B2 = jnp.stack(b2_list, axis=0).reshape(3, 1, 128)

    # ---- conv1 stage: one im2col(k=7, Cin=1) + one N=192 matmul -----------
    xpad = jnp.pad(xr, ((0, 0), (PAD, PAD)))                              # (BN, L+6)
    cols1 = jnp.stack([xpad[:, j:j + L] for j in range(KMAX)], axis=-1)   # (BN, L, 7)
    out1 = pallas_linear(cols1.reshape(BN * L, KMAX), W1, B1, relu=True)  # (BN*L,192)
    out1 = out1.reshape(BN, L, 192)

    # per-branch validity masks after conv1 (kernel sizes 3/5/7)
    m1_list = [(_sliding_sum(m0, kk) >= 1.0).astype(jnp.float32) for kk in (3, 5, 7)]
    mask192 = jnp.repeat(jnp.stack(m1_list, axis=-1), 64, axis=-1)        # (BN,L,192)
    out1 = out1 * mask192

    # ---- conv2 stage: per-branch weights, im2col shift done in VMEM -------
    x2 = jnp.transpose(out1.reshape(BN, L, 3, 64), (2, 0, 1, 3))          # (3,BN,L,64)
    m2_list = [(_sliding_sum(m1, kk) >= 1.0).astype(jnp.float32)
               for m1, kk in zip(m1_list, (3, 5, 7))]
    m2 = jnp.stack(m2_list, axis=0)[..., None]                            # (3,BN,L,1)
    out2 = pallas_conv2_branches(x2, W2, B2, m2)                          # (3,BN,L,128)

    # ---- AdaptiveAvgPool1d(10) + flatten (matches (BN,384,10).view order) -
    pooled = out2.reshape(3, BN, 10, L // 10, 128).mean(axis=3)           # (3,BN,10,128)
    pooled = jnp.transpose(pooled, (1, 0, 3, 2)).reshape(BN, 3 * 128 * 10)

    feat = pallas_linear(pooled, params["xanes_fc_w"], params["xanes_fc_b"])
    feat = feat.reshape(B, N, 32)
    valid = (m0.sum(axis=1) > 0).astype(jnp.float32).reshape(B, N, 1)
    return feat * valid


# ----------------------------------------------------------------------------
# Element processor / fusion (tiny matmuls left to XLA per perf review)
# ----------------------------------------------------------------------------
def elem_processor(info, mask, params, is_tm):
    B, N, _ = info.shape
    maskf = mask.astype(jnp.float32)
    masked = info * maskf[..., None]
    floats = masked[:, :, :5]
    z = masked[:, :, 5].astype(jnp.int32)
    etype = masked[:, :, 6].astype(jnp.int32)
    # 5->16 linear: M = B*N <= 10, left to XLA (launch cost > compute)
    ff = jax.nn.relu(floats @ params["float_lin_w"] + params["float_lin_b"])
    if is_tm:
        mz = jnp.where((z >= 21) & (z <= 30), z - 20,
             jnp.where((z >= 39) & (z <= 48), z - 28, 0))
        emb = jnp.take(params["tm_emb1"], mz, axis=0)
        out = jnp.concatenate([ff, emb], axis=-1)             # (B, N, 24)
    else:
        mz = jnp.where((z >= 1) & (z <= 20), z,
             jnp.where((z >= 31) & (z <= 38), z - 10,
             jnp.where((z >= 49) & (z <= 94), z - 20, 0)))
        emb1 = jnp.take(params["nottm_emb1"], mz, axis=0)
        emb2 = jnp.take(params["nottm_emb2"], etype, axis=0)
        out = jnp.concatenate([ff, emb1, emb2], axis=-1)      # (B, N, 28)
    return out * maskf[..., None]


def fuse_tm_xanes(xanes_feat, tm_feat, tm_mask, params):
    # 56->64 linear with M = B*Ntm <= 6: left to XLA (per perf review)
    fused = jnp.concatenate([xanes_feat, tm_feat], axis=-1)
    out = fused @ params["fuse_w"] + params["fuse_b"]
    return out * tm_mask[..., None].astype(jnp.float32)


# ----------------------------------------------------------------------------
# Full forward
# ----------------------------------------------------------------------------
def mynet_forward(params, TM_spec, TM_spec_mask, TM_info, TM_mask,
                  NotTM_info, NotTM_mask):
    tm_xanes = xanes_extractor(TM_spec, TM_spec_mask, params)             # (B,Ntm,32)
    tm_elem = elem_processor(TM_info, TM_mask, params, is_tm=True)        # (B,Ntm,24)
    tm_fused = fuse_tm_xanes(tm_xanes, tm_elem, TM_mask, params)          # (B,Ntm,64)
    nottm_elem = elem_processor(NotTM_info, NotTM_mask, params, is_tm=False)
    nottm_elem = jnp.pad(nottm_elem,
                         ((0, 0), (0, 0), (0, 64 - nottm_elem.shape[-1])))
    all_feat = jnp.concatenate([tm_fused, nottm_elem], axis=1)            # (B,S,64)
    all_mask = jnp.concatenate([TM_mask, NotTM_mask], axis=1).astype(jnp.float32)
    # fused: qkv proj -> masked MHA -> out proj -> masked mean pool -> fc1 -> fc2
    return pallas_attention_tail(all_feat, all_mask, params)              # (B, NC)


# ----------------------------------------------------------------------------
# Deterministic parameter init (synthetic; shapes follow the PyTorch module)
# ----------------------------------------------------------------------------
def init_params(key):
    keys = iter(jax.random.split(key, 32))

    def w(shape, scale=0.05):
        return jax.random.normal(next(keys), shape, dtype=jnp.float32) * scale

    params = {}
    for bi, k in zip((1, 2, 3), (3, 5, 7)):
        params[f"b{bi}_conv1_w"] = w((64, 1, k))
        params[f"b{bi}_conv1_b"] = w((64,))
        params[f"b{bi}_conv2_w"] = w((128, 64, k))
        params[f"b{bi}_conv2_b"] = w((128,))
    params["xanes_fc_w"] = w((128 * 3 * 10, 32))
    params["xanes_fc_b"] = w((32,))
    params["float_lin_w"] = w((5, 16))
    params["float_lin_b"] = w((16,))
    params["tm_emb1"] = w((21, 8))
    params["nottm_emb1"] = w((75, 8))
    params["nottm_emb2"] = w((6, 4))
    params["fuse_w"] = w((56, 64))
    params["fuse_b"] = w((64,))
    params["attn_w_in"] = w((64, 192))
    params["attn_b_in"] = w((192,))
    params["attn_w_out"] = w((64, 64))
    params["attn_b_out"] = w((64,))
    params["reg_w1"] = w((64, 64))
    params["reg_b1"] = w((64,))
    params["reg_w2"] = w((64, NUM_CLASSES))
    params["reg_b2"] = w((NUM_CLASSES,))
    return params


# ----------------------------------------------------------------------------
if __name__ == "__main__":
    key = jax.random.PRNGKey(0)
    kp, k1, k2, k3 = jax.random.split(key, 4)
    params = init_params(kp)

    B, N_TM, N_NOT, L = 2, 3, 5, 40   # small shapes (module default spectrum L=200)

    TM_spec = jax.random.normal(k1, (B, N_TM, L), dtype=jnp.float32)
    spec_valid_len = jnp.array([[40, 30, 40], [40, 40, 0]], dtype=jnp.int32)
    TM_spec_mask = jnp.arange(L)[None, None, :] < spec_valid_len[..., None]  # bool

    TM_mask = jnp.array([[1., 1., 1.], [1., 1., 0.]], dtype=jnp.float32)
    tm_floats = jax.random.normal(k2, (B, N_TM, 5), dtype=jnp.float32)
    tm_z = jnp.array([[26., 29., 40.], [22., 47., 0.]], dtype=jnp.float32)
    tm_t = jnp.array([[1., 2., 3.], [0., 1., 0.]], dtype=jnp.float32)
    TM_info = jnp.concatenate([tm_floats, tm_z[..., None], tm_t[..., None]], axis=-1)

    NotTM_mask = jnp.array([[1., 1., 1., 1., 0.], [1., 1., 1., 0., 0.]],
                           dtype=jnp.float32)
    nt_floats = jax.random.normal(k3, (B, N_NOT, 5), dtype=jnp.float32)
    nt_z = jnp.array([[8., 16., 33., 50., 0.], [1., 7., 55., 0., 0.]],
                     dtype=jnp.float32)
    nt_t = jnp.array([[0., 1., 2., 3., 0.], [4., 5., 1., 0., 0.]],
                     dtype=jnp.float32)
    NotTM_info = jnp.concatenate([nt_floats, nt_z[..., None], nt_t[..., None]],
                                 axis=-1)

    fwd = jax.jit(mynet_forward)
    out = fwd(params, TM_spec, TM_spec_mask, TM_info, TM_mask,
              NotTM_info, NotTM_mask)
    jax.block_until_ready(out)
    assert out.shape == (B, NUM_CLASSES)
    assert bool(jnp.all(jnp.isfinite(out)))
    print("KERNEL_OK")
</pallas_src>

<mosaic_0001>
module attributes {stable_mosaic.version = 11 : i64} {
  func.func @_linear_kernel(%arg0: i32, %arg1: memref<240x7xbf16, #tpu.memory_space<vmem>>, %arg2: memref<7x192xbf16, #tpu.memory_space<vmem>>, %arg3: memref<1x192xf32, #tpu.memory_space<vmem>>, %arg4: memref<240x192xf32, #tpu.memory_space<vmem>>) attributes {dimension_semantics = [#tpu.dimension_semantics<parallel>], iteration_bounds = array<i64: 1>, scalar_prefetch = 0 : i64, scratch_operands = 0 : i64, tpu.core_type = #tpu.core_type<tc>, window_params = [{transform_indices = @transform_0, window_bounds = array<i64: 240, 7>}, {pipeline_mode = #tpu.pipeline_mode<synchronous>, transform_indices = @transform_1, window_bounds = array<i64: 7, 192>}, {pipeline_mode = #tpu.pipeline_mode<synchronous>, transform_indices = @transform_2, window_bounds = array<i64: 1, 192>}, {transform_indices = @transform_3, window_bounds = array<i64: 240, 192>}]} {
    %c0 = arith.constant 0 : index
    %c0_0 = arith.constant 0 : index
    %0 = vector.load %arg1[%c0, %c0_0] : memref<240x7xbf16, #tpu.memory_space<vmem>>, vector<240x7xbf16>
    %c0_1 = arith.constant 0 : index
    %c0_2 = arith.constant 0 : index
    %1 = vector.load %arg2[%c0_1, %c0_2] : memref<7x192xbf16, #tpu.memory_space<vmem>>, vector<7x192xbf16>
    %cst = arith.constant dense<0.000000e+00> : vector<240x192xf32>
    %2 = tpu.matmul %0, %1, %cst {dimension_numbers = #tpu.dot_dimension_numbers<[1], [0], [0], [1], [0, 0, 1, 1], [], []>} : vector<240x7xbf16>, vector<7x192xbf16>, vector<240x192xf32> -> vector<240x192xf32>
    %c0_3 = arith.constant 0 : index
    %c0_4 = arith.constant 0 : index
    %3 = vector.load %arg3[%c0_3, %c0_4] : memref<1x192xf32, #tpu.memory_space<vmem>>, vector<1x192xf32>
    %4 = vector.broadcast %3 : vector<1x192xf32> to vector<240x192xf32>
    %5 = arith.addf %2, %4 : vector<240x192xf32>
    %cst_5 = arith.constant 0.000000e+00 : f32
    %6 = vector.broadcast %cst_5 : f32 to vector<240x192xf32>
    %7 = arith.maximumf %5, %6 : vector<240x192xf32>
    %c0_6 = arith.constant 0 : index
    %c0_7 = arith.constant 0 : index
    %8 = vector.load %arg4[%c0_6, %c0_7] : memref<240x192xf32, #tpu.memory_space<vmem>>, vector<240x192xf32>
    tpu.vector_store %arg4[%c0_6, %c0_7], %7 {strides = array<i32>} : memref<240x192xf32, #tpu.memory_space<vmem>>, vector<240x192xf32>,
    return
  }
  func.func @transform_0(%arg0: i32) -> (i32, i32) {
    %c0_i32 = arith.constant 0 : i32
    %c0_i32_0 = arith.constant 0 : i32
    return %arg0, %c0_i32 : i32, i32
  }
  func.func @transform_1(%arg0: i32) -> (i32, i32) {
    %c0_i32 = arith.constant 0 : i32
    %c0_i32_0 = arith.constant 0 : i32
    %c0_i32_1 = arith.constant 0 : i32
    return %c0_i32, %c0_i32_0 : i32, i32
  }
  func.func @transform_2(%arg0: i32) -> (i32, i32) {
    %c0_i32 = arith.constant 0 : i32
    %c0_i32_0 = arith.constant 0 : i32
    %c0_i32_1 = arith.constant 0 : i32
    return %c0_i32, %c0_i32_0 : i32, i32
  }
  func.func @transform_3(%arg0: i32) -> (i32, i32) {
    %c0_i32 = arith.constant 0 : i32
    %c0_i32_0 = arith.constant 0 : i32
    return %arg0, %c0_i32 : i32, i32
  }
}

module attributes {stable_mosaic.version = 11 : i64} {
  func.func @_conv2_kernel(%arg0: i32, %arg1: i32, %arg2: memref<1x1x46x64xf32, #tpu.memory_space<vmem>>, %arg3: memref<1x7x64x128xbf16, #tpu.memory_space<vmem>>, %arg4: memref<1x1x128xf32, #tpu.memory_space<vmem>>, %arg5: memref<1x1x40x1xf32, #tpu.memory_space<vmem>>, %arg6: memref<1x1x40x128xf32, #tpu.memory_space<vmem>>) attributes {dimension_semantics = [#tpu.dimension_semantics<parallel>, #tpu.dimension_semantics<parallel>], iteration_bounds = array<i64: 3, 6>, scalar_prefetch = 0 : i64, scratch_operands = 0 : i64, tpu.core_type = #tpu.core_type<tc>, window_params = [{transform_indices = @transform_0, window_bounds = array<i64: 1, 1, 46, 64>}, {transform_indices = @transform_1, window_bounds = array<i64: 1, 7, 64, 128>}, {transform_indices = @transform_2, window_bounds = array<i64: 1, 1, 128>}, {transform_indices = @transform_3, window_bounds = array<i64: 1, 1, 40, 1>}, {transform_indices = @transform_4, window_bounds = array<i64: 1, 1, 40, 128>}]} {
    %cst = arith.constant 0.000000e+00 : f32
    %0 = vector.broadcast %cst : f32 to vector<40x128xf32>
    %c0 = arith.constant 0 : index
    %c0_0 = arith.constant 0 : index
    %c0_1 = arith.constant 0 : index
    %c0_2 = arith.constant 0 : index
    %1 = vector.load %arg2[%c0, %c0_0, %c0_1, %c0_2] : memref<1x1x46x64xf32, #tpu.memory_space<vmem>>, vector<1x1x40x64xf32>
    %2 = vector.shape_cast %1 : vector<1x1x40x64xf32> to vector<40x64xf32>
    %3 = arith.truncf %2 : vector<40x64xf32> to vector<40x64xbf16>
    %c0_3 = arith.constant 0 : index
    %c0_4 = arith.constant 0 : index
    %c0_5 = arith.constant 0 : index
    %c0_6 = arith.constant 0 : index
    %4 = vector.load %arg3[%c0_3, %c0_4, %c0_5, %c0_6] : memref<1x7x64x128xbf16, #tpu.memory_space<vmem>>, vector<1x1x64x128xbf16>
    %5 = vector.shape_cast %4 : vector<1x1x64x128xbf16> to vector<64x128xbf16>
    %cst_7 = arith.constant dense<0.000000e+00> : vector<40x128xf32>
    %6 = tpu.matmul %3, %5, %cst_7 {dimension_numbers = #tpu.dot_dimension_numbers<[1], [0], [0], [1], [0, 0, 1, 1], [], []>} : vector<40x64xbf16>, vector<64x128xbf16>, vector<40x128xf32> -> vector<40x128xf32>
    %7 = arith.addf %0, %6 : vector<40x128xf32>
    %c0_8 = arith.constant 0 : index
    %c0_9 = arith.constant 0 : index
    %c1 = arith.constant 1 : index
    %c0_10 = arith.constant 0 : index
    %8 = vector.load %arg2[%c0_8, %c0_9, %c1, %c0_10] : memref<1x1x46x64xf32, #tpu.memory_space<vmem>>, vector<1x1x40x64xf32>
    %9 = vector.shape_cast %8 : vector<1x1x40x64xf32> to vector<40x64xf32>
    %10 = arith.truncf %9 : vector<40x64xf32> to vector<40x64xbf16>
    %c0_11 = arith.constant 0 : index
    %c1_12 = arith.constant 1 : index
    %c0_13 = arith.constant 0 : index
    %c0_14 = arith.constant 0 : index
    %11 = vector.load %arg3[%c0_11, %c1_12, %c0_13, %c0_14] : memref<1x7x64x128xbf16, #tpu.memory_space<vmem>>, vector<1x1x64x128xbf16>
    %12 = vector.shape_cast %11 : vector<1x1x64x128xbf16> to vector<64x128xbf16>
    %cst_15 = arith.constant dense<0.000000e+00> : vector<40x128xf32>
    %13 = tpu.matmul %10, %12, %cst_15 {dimension_numbers = #tpu.dot_dimension_numbers<[1], [0], [0], [1], [0, 0, 1, 1], [], []>} : vector<40x64xbf16>, vector<64x128xbf16>, vector<40x128xf32> -> vector<40x128xf32>
    %14 = arith.addf %7, %13 : vector<40x128xf32>
    %c0_16 = arith.constant 0 : index
    %c0_17 = arith.constant 0 : index
    %c2 = arith.constant 2 : index
    %c0_18 = arith.constant 0 : index
    %15 = vector.load %arg2[%c0_16, %c0_17, %c2, %c0_18] : memref<1x1x46x64xf32, #tpu.memory_space<vmem>>, vector<1x1x40x64xf32>
    %16 = vector.shape_cast %15 : vector<1x1x40x64xf32> to vector<40x64xf32>
    %17 = arith.truncf %16 : vector<40x64xf32> to vector<40x64xbf16>
    %c0_19 = arith.constant 0 : index
    %c2_20 = arith.constant 2 : index
    %c0_21 = arith.constant 0 : index
    %c0_22 = arith.constant 0 : index
    %18 = vector.load %arg3[%c0_19, %c2_20, %c0_21, %c0_22] : memref<1x7x64x128xbf16, #tpu.memory_space<vmem>>, vector<1x1x64x128xbf16>
    %19 = vector.shape_cast %18 : vector<1x1x64x128xbf16> to vector<64x128xbf16>
    %cst_23 = arith.constant dense<0.000000e+00> : vector<40x128xf32>
    %20 = tpu.matmul %17, %19, %cst_23 {dimension_numbers = #tpu.dot_dimension_numbers<[1], [0], [0], [1], [0, 0, 1, 1], [], []>} : vector<40x64xbf16>, vector<64x128xbf16>, vector<40x128xf32> -> vector<40x128xf32>
    %21 = arith.addf %14, %20 : vector<40x128xf32>
    %c0_24 = arith.constant 0 : index
    %c0_25 = arith.constant 0 : index
    %c3 = arith.constant 3 : index
    %c0_26 = arith.constant 0 : index
    %22 = vector.load %arg2[%c0_24, %c0_25, %c3, %c0_26] : memref<1x1x46x64xf32, #tpu.memory_space<vmem>>, vector<1x1x40x64xf32>
    %23 = vector.shape_cast %22 : vector<1x1x40x64xf32> to vector<40x64xf32>
    %24 = arith.truncf %23 : vector<40x64xf32> to vector<40x64xbf16>
    %c0_27 = arith.constant 0 : index
    %c3_28 = arith.constant 3 : index
    %c0_29 = arith.constant 0 : index
    %c0_30 = arith.constant 0 : index
    %25 = vector.load %arg3[%c0_27, %c3_28, %c0_29, %c0_30] : memref<1x7x64x128xbf16, #tpu.memory_space<vmem>>, vector<1x1x64x128xbf16>
    %26 = vector.shape_cast %25 : vector<1x1x64x128xbf16> to vector<64x128xbf16>
    %cst_31 = arith.constant dense<0.000000e+00> : vector<40x128xf32>
    %27 = tpu.matmul %24, %26, %cst_31 {dimension_numbers = #tpu.dot_dimension_numbers<[1], [0], [0], [1], [0, 0, 1, 1], [], []>} : vector<40x64xbf16>, vector<64x128xbf16>, vector<40x128xf32> -> vector<40x128xf32>
    %28 = arith.addf %21, %27 : vector<40x128xf32>
    %c0_32 = arith.constant 0 : index
    %c0_33 = arith.constant 0 : index
    %c4 = arith.constant 4 : index
    %c0_34 = arith.constant 0 : index
    %29 = vector.load %arg2[%c0_32, %c0_33, %c4, %c0_34] : memref<1x1x46x64xf32, #tpu.memory_space<vmem>>, vector<1x1x40x64xf32>
    %30 = vector.shape_cast %29 : vector<1x1x40x64xf32> to vector<40x64xf32>
    %31 = arith.truncf %30 : vector<40x64xf32> to vector<40x64xbf16>
    %c0_35 = arith.constant 0 : index
    %c4_36 = arith.constant 4 : index
    %c0_37 = arith.constant 0 : index
    %c0_38 = arith.constant 0 : index
    %32 = vector.load %arg3[%c0_35, %c4_36, %c0_37, %c0_38] : memref<1x7x64x128xbf16, #tpu.memory_space<vmem>>, vector<1x1x64x128xbf16>
    %33 = vector.shape_cast %32 : vector<1x1x64x128xbf16> to vector<64x128xbf16>
    %cst_39 = arith.constant dense<0.000000e+00> : vector<40x128xf32>
    %34 = tpu.matmul %31, %33, %cst_39 {dimension_numbers = #tpu.dot_dimension_numbers<[1], [0], [0], [1], [0, 0, 1, 1], [], []>} : vector<40x64xbf16>, vector<64x128xbf16>, vector<40x128xf32> -> vector<40x128xf32>
    %35 = arith.addf %28, %34 : vector<40x128xf32>
    %c0_40 = arith.constant 0 : index
    %c0_41 = arith.constant 0 : index
    %c5 = arith.constant 5 : index
    %c0_42 = arith.constant 0 : index
    %36 = vector.load %arg2[%c0_40, %c0_41, %c5, %c0_42] : memref<1x1x46x64xf32, #tpu.memory_space<vmem>>, vector<1x1x40x64xf32>
    %37 = vector.shape_cast %36 : vector<1x1x40x64xf32> to vector<40x64xf32>
    %38 = arith.truncf %37 : vector<40x64xf32> to vector<40x64xbf16>
    %c0_43 = arith.constant 0 : index
    %c5_44 = arith.constant 5 : index
    %c0_45 = arith.constant 0 : index
    %c0_46 = arith.constant 0 : index
    %39 = vector.load %arg3[%c0_43, %c5_44, %c0_45, %c0_46] : memref<1x7x64x128xbf16, #tpu.memory_space<vmem>>, vector<1x1x64x128xbf16>
    %40 = vector.shape_cast %39 : vector<1x1x64x128xbf16> to vector<64x128xbf16>
    %cst_47 = arith.constant dense<0.000000e+00> : vector<40x128xf32>
    %41 = tpu.matmul %38, %40, %cst_47 {dimension_numbers = #tpu.dot_dimension_numbers<[1], [0], [0], [1], [0, 0, 1, 1], [], []>} : vector<40x64xbf16>, vector<64x128xbf16>, vector<40x128xf32> -> vector<40x128xf32>
    %42 = arith.addf %35, %41 : vector<40x128xf32>
    %c0_48 = arith.constant 0 : index
    %c0_49 = arith.constant 0 : index
    %c6 = arith.constant 6 : index
    %c0_50 = arith.constant 0 : index
    %43 = vector.load %arg2[%c0_48, %c0_49, %c6, %c0_50] : memref<1x1x46x64xf32, #tpu.memory_space<vmem>>, vector<1x1x40x64xf32>
    %44 = vector.shape_cast %43 : vector<1x1x40x64xf32> to vector<40x64xf32>
    %45 = arith.truncf %44 : vector<40x64xf32> to vector<40x64xbf16>
    %c0_51 = arith.constant 0 : index
    %c6_52 = arith.constant 6 : index
    %c0_53 = arith.constant 0 : index
    %c0_54 = arith.constant 0 : index
    %46 = vector.load %arg3[%c0_51, %c6_52, %c0_53, %c0_54] : memref<1x7x64x128xbf16, #tpu.memory_space<vmem>>, vector<1x1x64x128xbf16>
    %47 = vector.shape_cast %46 : vector<1x1x64x128xbf16> to vector<64x128xbf16>
    %cst_55 = arith.constant dense<0.000000e+00> : vector<40x128xf32>
    %48 = tpu.matmul %45, %47, %cst_55 {dimension_numbers = #tpu.dot_dimension_numbers<[1], [0], [0], [1], [0, 0, 1, 1], [], []>} : vector<40x64xbf16>, vector<64x128xbf16>, vector<40x128xf32> -> vector<40x128xf32>
    %49 = arith.addf %42, %48 : vector<40x128xf32>
    %c0_56 = arith.constant 0 : index
    %c0_57 = arith.constant 0 : index
    %c0_58 = arith.constant 0 : index
    %50 = vector.load %arg4[%c0_56, %c0_57, %c0_58] : memref<1x1x128xf32, #tpu.memory_space<vmem>>, vector<1x1x128xf32>
    %51 = vector.shape_cast %50 : vector<1x1x128xf32> to vector<1x128xf32>
    %52 = vector.broadcast %51 : vector<1x128xf32> to vector<40x128xf32>
    %53 = arith.addf %49, %52 : vector<40x128xf32>
    %cst_59 = arith.constant 0.000000e+00 : f32
    %54 = vector.broadcast %cst_59 : f32 to vector<40x128xf32>
    %55 = arith.maximumf %53, %54 : vector<40x128xf32>
    %c0_60 = arith.constant 0 : index
    %c0_61 = arith.constant 0 : index
    %c0_62 = arith.constant 0 : index
    %c0_63 = arith.constant 0 : index
    %56 = vector.load %arg5[%c0_60, %c0_61, %c0_62, %c0_63] : memref<1x1x40x1xf32, #tpu.memory_space<vmem>>, vector<1x1x40x1xf32>
    %57 = vector.shape_cast %56 : vector<1x1x40x1xf32> to vector<40x1xf32>
    %58 = vector.broadcast %57 : vector<40x1xf32> to vector<40x128xf32>
    %59 = arith.mulf %55, %58 : vector<40x128xf32>
    %c0_64 = arith.constant 0 : index
    %c0_65 = arith.constant 0 : index
    %c0_66 = arith.constant 0 : index
    %c0_67 = arith.constant 0 : index
    %60 = vector.load %arg6[%c0_64, %c0_65, %c0_66, %c0_67] : memref<1x1x40x128xf32, #tpu.memory_space<vmem>>, vector<1x1x40x128xf32>
    %61 = vector.shape_cast %60 : vector<1x1x40x128xf32> to vector<40x128xf32>
    %62 = vector.shape_cast %59 : vector<40x128xf32> to vector<1x1x40x128xf32>
    tpu.vector_store %arg6[%c0_64, %c0_65, %c0_66, %c0_67], %62 {strides = array<i32>} : memref<1x1x40x128xf32, #tpu.memory_space<vmem>>, vector<1x1x40x128xf32>,
    return
  }
  func.func @transform_0(%arg0: i32, %arg1: i32) -> (i32, i32, i32, i32) {
    %c0_i32 = arith.constant 0 : i32
    %c0_i32_0 = arith.constant 0 : i32
    %c0_i32_1 = arith.constant 0 : i32
    return %arg0, %arg1, %c0_i32, %c0_i32_0 : i32, i32, i32, i32
  }
  func.func @transform_1(%arg0: i32, %arg1: i32) -> (i32, i32, i32, i32) {
    %c0_i32 = arith.constant 0 : i32
    %c0_i32_0 = arith.constant 0 : i32
    %c0_i32_1 = arith.constant 0 : i32
    %c0_i32_2 = arith.constant 0 : i32
    return %arg0, %c0_i32, %c0_i32_0, %c0_i32_1 : i32, i32, i32, i32
  }
  func.func @transform_2(%arg0: i32, %arg1: i32) -> (i32, i32, i32) {
    %c0_i32 = arith.constant 0 : i32
    %c0_i32_0 = arith.constant 0 : i32
    %c0_i32_1 = arith.constant 0 : i32
    return %arg0, %c0_i32, %c0_i32_0 : i32, i32, i32
  }
  func.func @transform_3(%arg0: i32, %arg1: i32) -> (i32, i32, i32, i32) {
    %c0_i32 = arith.constant 0 : i32
    %c0_i32_0 = arith.constant 0 : i32
    %c0_i32_1 = arith.constant 0 : i32
    return %arg0, %arg1, %c0_i32, %c0_i32_0 : i32, i32, i32, i32
  }
  func.func @transform_4(%arg0: i32, %arg1: i32) -> (i32, i32, i32, i32) {
    %c0_i32 = arith.constant 0 : i32
    %c0_i32_0 = arith.constant 0 : i32
    %c0_i32_1 = arith.constant 0 : i32
    return %arg0, %arg1, %c0_i32, %c0_i32_0 : i32, i32, i32, i32
  }
}

module attributes {stable_mosaic.version = 11 : i64} {
  func.func @_linear_kernel(%arg0: i32, %arg1: memref<16x3840xbf16, #tpu.memory_space<vmem>>, %arg2: memref<3840x32xbf16, #tpu.memory_space<vmem>>, %arg3: memref<1x32xf32, #tpu.memory_space<vmem>>, %arg4: memref<16x32xf32, #tpu.memory_space<vmem>>) attributes {dimension_semantics = [#tpu.dimension_semantics<parallel>], iteration_bounds = array<i64: 1>, scalar_prefetch = 0 : i64, scratch_operands = 0 : i64, tpu.core_type = #tpu.core_type<tc>, window_params = [{transform_indices = @transform_0, window_bounds = array<i64: 16, 3840>}, {pipeline_mode = #tpu.pipeline_mode<synchronous>, transform_indices = @transform_1, window_bounds = array<i64: 3840, 32>}, {pipeline_mode = #tpu.pipeline_mode<synchronous>, transform_indices = @transform_2, window_bounds = array<i64: 1, 32>}, {transform_indices = @transform_3, window_bounds = array<i64: 16, 32>}]} {
    %c0 = arith.constant 0 : index
    %c0_0 = arith.constant 0 : index
    %0 = vector.load %arg1[%c0, %c0_0] : memref<16x3840xbf16, #tpu.memory_space<vmem>>, vector<16x3840xbf16>
    %c0_1 = arith.constant 0 : index
    %c0_2 = arith.constant 0 : index
    %1 = vector.load %arg2[%c0_1, %c0_2] : memref<3840x32xbf16, #tpu.memory_space<vmem>>, vector<3840x32xbf16>
    %cst = arith.constant dense<0.000000e+00> : vector<16x32xf32>
    %2 = tpu.matmul %0, %1, %cst {dimension_numbers = #tpu.dot_dimension_numbers<[1], [0], [0], [1], [0, 0, 1, 1], [], []>} : vector<16x3840xbf16>, vector<3840x32xbf16>, vector<16x32xf32> -> vector<16x32xf32>
    %c0_3 = arith.constant 0 : index
    %c0_4 = arith.constant 0 : index
    %3 = vector.load %arg3[%c0_3, %c0_4] : memref<1x32xf32, #tpu.memory_space<vmem>>, vector<1x32xf32>
    %4 = vector.broadcast %3 : vector<1x32xf32> to vector<16x32xf32>
    %5 = arith.addf %2, %4 : vector<16x32xf32>
    %c0_5 = arith.constant 0 : index
    %c0_6 = arith.constant 0 : index
    %6 = vector.load %arg4[%c0_5, %c0_6] : memref<16x32xf32, #tpu.memory_space<vmem>>, vector<16x32xf32>
    tpu.vector_store %arg4[%c0_5, %c0_6], %5 {strides = array<i32>} : memref<16x32xf32, #tpu.memory_space<vmem>>, vector<16x32xf32>,
    return
  }
  func.func @transform_0(%arg0: i32) -> (i32, i32) {
    %c0_i32 = arith.constant 0 : i32
    %c0_i32_0 = arith.constant 0 : i32
    return %arg0, %c0_i32 : i32, i32
  }
  func.func @transform_1(%arg0: i32) -> (i32, i32) {
    %c0_i32 = arith.constant 0 : i32
    %c0_i32_0 = arith.constant 0 : i32
    %c0_i32_1 = arith.constant 0 : i32
    return %c0_i32, %c0_i32_0 : i32, i32
  }
  func.func @transform_2(%arg0: i32) -> (i32, i32) {
    %c0_i32 = arith.constant 0 : i32
    %c0_i32_0 = arith.constant 0 : i32
    %c0_i32_1 = arith.constant 0 : i32
    return %c0_i32, %c0_i32_0 : i32, i32
  }
  func.func @transform_3(%arg0: i32) -> (i32, i32) {
    %c0_i32 = arith.constant 0 : i32
    %c0_i32_0 = arith.constant 0 : i32
    return %arg0, %c0_i32 : i32, i32
  }
}

module attributes {stable_mosaic.version = 11 : i64} {
  func.func @_tail_kernel(%arg0: i32, %arg1: memref<1x8x64xf32, #tpu.memory_space<vmem>>, %arg2: memref<1x1x8xf32, #tpu.memory_space<vmem>>, %arg3: memref<64x192xbf16, #tpu.memory_space<vmem>>, %arg4: memref<1x192xf32, #tpu.memory_space<vmem>>, %arg5: memref<64x64xbf16, #tpu.memory_space<vmem>>, %arg6: memref<1x64xf32, #tpu.memory_space<vmem>>, %arg7: memref<64x64xbf16, #tpu.memory_space<vmem>>, %arg8: memref<1x64xf32, #tpu.memory_space<vmem>>, %arg9: memref<64x1xbf16, #tpu.memory_space<vmem>>, %arg10: memref<1x1xf32, #tpu.memory_space<vmem>>, %arg11: memref<1x1x1xf32, #tpu.memory_space<vmem>>) attributes {dimension_semantics = [#tpu.dimension_semantics<parallel>], iteration_bounds = array<i64: 2>, scalar_prefetch = 0 : i64, scratch_operands = 0 : i64, tpu.core_type = #tpu.core_type<tc>, window_params = [{transform_indices = @transform_0, window_bounds = array<i64: 1, 8, 64>}, {transform_indices = @transform_1, window_bounds = array<i64: 1, 1, 8>}, {pipeline_mode = #tpu.pipeline_mode<synchronous>, transform_indices = @transform_2, window_bounds = array<i64: 64, 192>}, {pipeline_mode = #tpu.pipeline_mode<synchronous>, transform_indices = @transform_3, window_bounds = array<i64: 1, 192>}, {pipeline_mode = #tpu.pipeline_mode<synchronous>, transform_indices = @transform_4, window_bounds = array<i64: 64, 64>}, {pipeline_mode = #tpu.pipeline_mode<synchronous>, transform_indices = @transform_5, window_bounds = array<i64: 1, 64>}, {pipeline_mode = #tpu.pipeline_mode<synchronous>, transform_indices = @transform_6, window_bounds = array<i64: 64, 64>}, {pipeline_mode = #tpu.pipeline_mode<synchronous>, transform_indices = @transform_7, window_bounds = array<i64: 1, 64>}, {pipeline_mode = #tpu.pipeline_mode<synchronous>, transform_indices = @transform_8, window_bounds = array<i64: 64, 1>}, {pipeline_mode = #tpu.pipeline_mode<synchronous>, transform_indices = @transform_9, window_bounds = array<i64: 1, 1>}, {transform_indices = @transform_10, window_bounds = array<i64: 1, 1, 1>}]} {
    %c0 = arith.constant 0 : index
    %c0_0 = arith.constant 0 : index
    %c0_1 = arith.constant 0 : index
    %0 = vector.load %arg1[%c0, %c0_0, %c0_1] : memref<1x8x64xf32, #tpu.memory_space<vmem>>, vector<1x8x64xf32>
    %1 = vector.shape_cast %0 : vector<1x8x64xf32> to vector<8x64xf32>
    %c0_2 = arith.constant 0 : index
    %c0_3 = arith.constant 0 : index
    %c0_4 = arith.constant 0 : index
    %2 = vector.load %arg2[%c0_2, %c0_3, %c0_4] : memref<1x1x8xf32, #tpu.memory_space<vmem>>, vector<1x1x8xf32>
    %3 = vector.shape_cast %2 : vector<1x1x8xf32> to vector<1x8xf32>
    %4 = arith.truncf %1 : vector<8x64xf32> to vector<8x64xbf16>
    %c0_5 = arith.constant 0 : index
    %c0_6 = arith.constant 0 : index
    %5 = vector.load %arg3[%c0_5, %c0_6] : memref<64x192xbf16, #tpu.memory_space<vmem>>, vector<64x192xbf16>
    %cst = arith.constant dense<0.000000e+00> : vector<8x192xf32>
    %6 = tpu.matmul %4, %5, %cst {dimension_numbers = #tpu.dot_dimension_numbers<[1], [0], [0], [1], [0, 0, 1, 1], [], []>} : vector<8x64xbf16>, vector<64x192xbf16>, vector<8x192xf32> -> vector<8x192xf32>
    %c0_7 = arith.constant 0 : index
    %c0_8 = arith.constant 0 : index
    %7 = vector.load %arg4[%c0_7, %c0_8] : memref<1x192xf32, #tpu.memory_space<vmem>>, vector<1x192xf32>
    %8 = vector.broadcast %7 : vector<1x192xf32> to vector<8x192xf32>
    %9 = arith.addf %6, %8 : vector<8x192xf32>
    %10 = vector.extract_strided_slice %9 {offsets = [0, 0], sizes = [8, 16], strides = [1, 1]} : vector<8x192xf32> to vector<8x16xf32>
    %11 = arith.truncf %10 : vector<8x16xf32> to vector<8x16xbf16>
    %12 = vector.extract_strided_slice %9 {offsets = [0, 64], sizes = [8, 16], strides = [1, 1]} : vector<8x192xf32> to vector<8x16xf32>
    %13 = arith.truncf %12 : vector<8x16xf32> to vector<8x16xbf16>
    %14 = vector.extract_strided_slice %9 {offsets = [0, 128], sizes = [8, 16], strides = [1, 1]} : vector<8x192xf32> to vector<8x16xf32>
    %15 = arith.truncf %14 : vector<8x16xf32> to vector<8x16xbf16>
    %cst_9 = arith.constant dense<0.000000e+00> : vector<8x8xf32>
    %16 = tpu.matmul %11, %13, %cst_9 {dimension_numbers = #tpu.dot_dimension_numbers<[1], [1], [0], [0], [0, 0, 1, 0], [], []>} : vector<8x16xbf16>, vector<8x16xbf16>, vector<8x8xf32> -> vector<8x8xf32>
    %cst_10 = arith.constant 2.500000e-01 : f32
    %17 = vector.broadcast %cst_10 : f32 to vector<8x8xf32>
    %18 = arith.mulf %16, %17 : vector<8x8xf32>
    %cst_11 = arith.constant 5.000000e-01 : f32
    %19 = vector.broadcast %cst_11 : f32 to vector<1x8xf32>
    %20 = arith.cmpf ogt, %3, %19 : vector<1x8xf32>
    %cst_12 = arith.constant -1.000000e+30 : f32
    %21 = vector.shape_cast %20 : vector<1x8xi1> to vector<1x8xi1>
    %22 = vector.broadcast %21 : vector<1x8xi1> to vector<8x8xi1>
    %23 = vector.broadcast %cst_12 : f32 to vector<8x8xf32>
    %24 = arith.select %22, %18, %23 : vector<8x8xi1>, vector<8x8xf32>
    %cst_13 = arith.constant dense<0xFF800000> : vector<8xf32>
    %25 = vector.multi_reduction <maximumf>, %24, %cst_13 [1] : vector<8x8xf32> to vector<8xf32>
    %26 = vector.shape_cast %25 : vector<8xf32> to vector<8x1xf32>
    %27 = vector.broadcast %26 : vector<8x1xf32> to vector<8x8xf32>
    %28 = arith.subf %24, %27 : vector<8x8xf32>
    %29 = math.exp %28 : vector<8x8xf32>
    %cst_14 = arith.constant dense<0.000000e+00> : vector<8xf32>
    %30 = vector.multi_reduction <add>, %29, %cst_14 [1] : vector<8x8xf32> to vector<8xf32>
    %31 = vector.shape_cast %30 : vector<8xf32> to vector<8x1xf32>
    %32 = tpu.reciprocal %31 {approx = true} : vector<8x1xf32> -> vector<8x1xf32>
    %33 = vector.broadcast %32 : vector<8x1xf32> to vector<8x8xf32>
    %34 = arith.mulf %29, %33 : vector<8x8xf32>
    %35 = arith.truncf %34 : vector<8x8xf32> to vector<8x8xbf16>
    %cst_15 = arith.constant dense<0.000000e+00> : vector<8x16xf32>
    %36 = tpu.matmul %35, %15, %cst_15 {dimension_numbers = #tpu.dot_dimension_numbers<[1], [0], [0], [1], [0, 0, 1, 1], [], []>} : vector<8x8xbf16>, vector<8x16xbf16>, vector<8x16xf32> -> vector<8x16xf32>
    %37 = vector.extract_strided_slice %9 {offsets = [0, 16], sizes = [8, 16], strides = [1, 1]} : vector<8x192xf32> to vector<8x16xf32>
    %38 = arith.truncf %37 : vector<8x16xf32> to vector<8x16xbf16>
    %39 = vector.extract_strided_slice %9 {offsets = [0, 80], sizes = [8, 16], strides = [1, 1]} : vector<8x192xf32> to vector<8x16xf32>
    %40 = arith.truncf %39 : vector<8x16xf32> to vector<8x16xbf16>
    %41 = vector.extract_strided_slice %9 {offsets = [0, 144], sizes = [8, 16], strides = [1, 1]} : vector<8x192xf32> to vector<8x16xf32>
    %42 = arith.truncf %41 : vector<8x16xf32> to vector<8x16xbf16>
    %cst_16 = arith.constant dense<0.000000e+00> : vector<8x8xf32>
    %43 = tpu.matmul %38, %40, %cst_16 {dimension_numbers = #tpu.dot_dimension_numbers<[1], [1], [0], [0], [0, 0, 1, 0], [], []>} : vector<8x16xbf16>, vector<8x16xbf16>, vector<8x8xf32> -> vector<8x8xf32>
    %cst_17 = arith.constant 2.500000e-01 : f32
    %44 = vector.broadcast %cst_17 : f32 to vector<8x8xf32>
    %45 = arith.mulf %43, %44 : vector<8x8xf32>
    %cst_18 = arith.constant 5.000000e-01 : f32
    %46 = vector.broadcast %cst_18 : f32 to vector<1x8xf32>
    %47 = arith.cmpf ogt, %3, %46 : vector<1x8xf32>
    %cst_19 = arith.constant -1.000000e+30 : f32
    %48 = vector.shape_cast %47 : vector<1x8xi1> to vector<1x8xi1>
    %49 = vector.broadcast %48 : vector<1x8xi1> to vector<8x8xi1>
    %50 = vector.broadcast %cst_19 : f32 to vector<8x8xf32>
    %51 = arith.select %49, %45, %50 : vector<8x8xi1>, vector<8x8xf32>
    %cst_20 = arith.constant dense<0xFF800000> : vector<8xf32>
    %52 = vector.multi_reduction <maximumf>, %51, %cst_20 [1] : vector<8x8xf32> to vector<8xf32>
    %53 = vector.shape_cast %52 : vector<8xf32> to vector<8x1xf32>
    %54 = vector.broadcast %53 : vector<8x1xf32> to vector<8x8xf32>
    %55 = arith.subf %51, %54 : vector<8x8xf32>
    %56 = math.exp %55 : vector<8x8xf32>
    %cst_21 = arith.constant dense<0.000000e+00> : vector<8xf32>
    %57 = vector.multi_reduction <add>, %56, %cst_21 [1] : vector<8x8xf32> to vector<8xf32>
    %58 = vector.shape_cast %57 : vector<8xf32> to vector<8x1xf32>
    %59 = tpu.reciprocal %58 {approx = true} : vector<8x1xf32> -> vector<8x1xf32>
    %60 = vector.broadcast %59 : vector<8x1xf32> to vector<8x8xf32>
    %61 = arith.mulf %56, %60 : vector<8x8xf32>
    %62 = arith.truncf %61 : vector<8x8xf32> to vector<8x8xbf16>
    %cst_22 = arith.constant dense<0.000000e+00> : vector<8x16xf32>
    %63 = tpu.matmul %62, %42, %cst_22 {dimension_numbers = #tpu.dot_dimension_numbers<[1], [0], [0], [1], [0, 0, 1, 1], [], []>} : vector<8x8xbf16>, vector<8x16xbf16>, vector<8x16xf32> -> vector<8x16xf32>
    %64 = vector.extract_strided_slice %9 {offsets = [0, 32], sizes = [8, 16], strides = [1, 1]} : vector<8x192xf32> to vector<8x16xf32>
    %65 = arith.truncf %64 : vector<8x16xf32> to vector<8x16xbf16>
    %66 = vector.extract_strided_slice %9 {offsets = [0, 96], sizes = [8, 16], strides = [1, 1]} : vector<8x192xf32> to vector<8x16xf32>
    %67 = arith.truncf %66 : vector<8x16xf32> to vector<8x16xbf16>
    %68 = vector.extract_strided_slice %9 {offsets = [0, 160], sizes = [8, 16], strides = [1, 1]} : vector<8x192xf32> to vector<8x16xf32>
    %69 = arith.truncf %68 : vector<8x16xf32> to vector<8x16xbf16>
    %cst_23 = arith.constant dense<0.000000e+00> : vector<8x8xf32>
    %70 = tpu.matmul %65, %67, %cst_23 {dimension_numbers = #tpu.dot_dimension_numbers<[1], [1], [0], [0], [0, 0, 1, 0], [], []>} : vector<8x16xbf16>, vector<8x16xbf16>, vector<8x8xf32> -> vector<8x8xf32>
    %cst_24 = arith.constant 2.500000e-01 : f32
    %71 = vector.broadcast %cst_24 : f32 to vector<8x8xf32>
    %72 = arith.mulf %70, %71 : vector<8x8xf32>
    %cst_25 = arith.constant 5.000000e-01 : f32
    %73 = vector.broadcast %cst_25 : f32 to vector<1x8xf32>
    %74 = arith.cmpf ogt, %3, %73 : vector<1x8xf32>
    %cst_26 = arith.constant -1.000000e+30 : f32
    %75 = vector.shape_cast %74 : vector<1x8xi1> to vector<1x8xi1>
    %76 = vector.broadcast %75 : vector<1x8xi1> to vector<8x8xi1>
    %77 = vector.broadcast %cst_26 : f32 to vector<8x8xf32>
    %78 = arith.select %76, %72, %77 : vector<8x8xi1>, vector<8x8xf32>
    %cst_27 = arith.constant dense<0xFF800000> : vector<8xf32>
    %79 = vector.multi_reduction <maximumf>, %78, %cst_27 [1] : vector<8x8xf32> to vector<8xf32>
    %80 = vector.shape_cast %79 : vector<8xf32> to vector<8x1xf32>
    %81 = vector.broadcast %80 : vector<8x1xf32> to vector<8x8xf32>
    %82 = arith.subf %78, %81 : vector<8x8xf32>
    %83 = math.exp %82 : vector<8x8xf32>
    %cst_28 = arith.constant dense<0.000000e+00> : vector<8xf32>
    %84 = vector.multi_reduction <add>, %83, %cst_28 [1] : vector<8x8xf32> to vector<8xf32>
    %85 = vector.shape_cast %84 : vector<8xf32> to vector<8x1xf32>
    %86 = tpu.reciprocal %85 {approx = true} : vector<8x1xf32> -> vector<8x1xf32>
    %87 = vector.broadcast %86 : vector<8x1xf32> to vector<8x8xf32>
    %88 = arith.mulf %83, %87 : vector<8x8xf32>
    %89 = arith.truncf %88 : vector<8x8xf32> to vector<8x8xbf16>
    %cst_29 = arith.constant dense<0.000000e+00> : vector<8x16xf32>
    %90 = tpu.matmul %89, %69, %cst_29 {dimension_numbers = #tpu.dot_dimension_numbers<[1], [0], [0], [1], [0, 0, 1, 1], [], []>} : vector<8x8xbf16>, vector<8x16xbf16>, vector<8x16xf32> -> vector<8x16xf32>
    %91 = vector.extract_strided_slice %9 {offsets = [0, 48], sizes = [8, 16], strides = [1, 1]} : vector<8x192xf32> to vector<8x16xf32>
    %92 = arith.truncf %91 : vector<8x16xf32> to vector<8x16xbf16>
    %93 = vector.extract_strided_slice %9 {offsets = [0, 112], sizes = [8, 16], strides = [1, 1]} : vector<8x192xf32> to vector<8x16xf32>
    %94 = arith.truncf %93 : vector<8x16xf32> to vector<8x16xbf16>
    %95 = vector.extract_strided_slice %9 {offsets = [0, 176], sizes = [8, 16], strides = [1, 1]} : vector<8x192xf32> to vector<8x16xf32>
    %96 = arith.truncf %95 : vector<8x16xf32> to vector<8x16xbf16>
    %cst_30 = arith.constant dense<0.000000e+00> : vector<8x8xf32>
    %97 = tpu.matmul %92, %94, %cst_30 {dimension_numbers = #tpu.dot_dimension_numbers<[1], [1], [0], [0], [0, 0, 1, 0], [], []>} : vector<8x16xbf16>, vector<8x16xbf16>, vector<8x8xf32> -> vector<8x8xf32>
    %cst_31 = arith.constant 2.500000e-01 : f32
    %98 = vector.broadcast %cst_31 : f32 to vector<8x8xf32>
    %99 = arith.mulf %97, %98 : vector<8x8xf32>
    %cst_32 = arith.constant 5.000000e-01 : f32
    %100 = vector.broadcast %cst_32 : f32 to vector<1x8xf32>
    %101 = arith.cmpf ogt, %3, %100 : vector<1x8xf32>
    %cst_33 = arith.constant -1.000000e+30 : f32
    %102 = vector.shape_cast %101 : vector<1x8xi1> to vector<1x8xi1>
    %103 = vector.broadcast %102 : vector<1x8xi1> to vector<8x8xi1>
    %104 = vector.broadcast %cst_33 : f32 to vector<8x8xf32>
    %105 = arith.select %103, %99, %104 : vector<8x8xi1>, vector<8x8xf32>
    %cst_34 = arith.constant dense<0xFF800000> : vector<8xf32>
    %106 = vector.multi_reduction <maximumf>, %105, %cst_34 [1] : vector<8x8xf32> to vector<8xf32>
    %107 = vector.shape_cast %106 : vector<8xf32> to vector<8x1xf32>
    %108 = vector.broadcast %107 : vector<8x1xf32> to vector<8x8xf32>
    %109 = arith.subf %105, %108 : vector<8x8xf32>
    %110 = math.exp %109 : vector<8x8xf32>
    %cst_35 = arith.constant dense<0.000000e+00> : vector<8xf32>
    %111 = vector.multi_reduction <add>, %110, %cst_35 [1] : vector<8x8xf32> to vector<8xf32>
    %112 = vector.shape_cast %111 : vector<8xf32> to vector<8x1xf32>
    %113 = tpu.reciprocal %112 {approx = true} : vector<8x1xf32> -> vector<8x1xf32>
    %114 = vector.broadcast %113 : vector<8x1xf32> to vector<8x8xf32>
    %115 = arith.mulf %110, %114 : vector<8x8xf32>
    %116 = arith.truncf %115 : vector<8x8xf32> to vector<8x8xbf16>
    %cst_36 = arith.constant dense<0.000000e+00> : vector<8x16xf32>
    %117 = tpu.matmul %116, %96, %cst_36 {dimension_numbers = #tpu.dot_dimension_numbers<[1], [0], [0], [1], [0, 0, 1, 1], [], []>} : vector<8x8xbf16>, vector<8x16xbf16>, vector<8x16xf32> -> vector<8x16xf32>
    %118 = tpu.concatenate %36, %63, %90, %117 in 1 : vector<8x16xf32>, vector<8x16xf32>, vector<8x16xf32>, vector<8x16xf32> -> vector<8x64xf32>
    %119 = arith.truncf %118 : vector<8x64xf32> to vector<8x64xbf16>
    %c0_37 = arith.constant 0 : index
    %c0_38 = arith.constant 0 : index
    %120 = vector.load %arg5[%c0_37, %c0_38] : memref<64x64xbf16, #tpu.memory_space<vmem>>, vector<64x64xbf16>
    %cst_39 = arith.constant dense<0.000000e+00> : vector<8x64xf32>
    %121 = tpu.matmul %119, %120, %cst_39 {dimension_numbers = #tpu.dot_dimension_numbers<[1], [0], [0], [1], [0, 0, 1, 1], [], []>} : vector<8x64xbf16>, vector<64x64xbf16>, vector<8x64xf32> -> vector<8x64xf32>
    %c0_40 = arith.constant 0 : index
    %c0_41 = arith.constant 0 : index
    %122 = vector.load %arg6[%c0_40, %c0_41] : memref<1x64xf32, #tpu.memory_space<vmem>>, vector<1x64xf32>
    %123 = vector.broadcast %122 : vector<1x64xf32> to vector<8x64xf32>
    %124 = arith.addf %121, %123 : vector<8x64xf32>
    %cst_42 = arith.constant dense<0.000000e+00> : vector<1x64xf32>
    %125 = tpu.matmul %3, %124, %cst_42 {dimension_numbers = #tpu.dot_dimension_numbers<[1], [0], [0], [1], [0, 0, 1, 1], [], []>} : vector<1x8xf32>, vector<8x64xf32>, vector<1x64xf32> -> vector<1x64xf32>
    %126 = vector.shape_cast %3 : vector<1x8xf32> to vector<1x1x8xf32>
    %cst_43 = arith.constant dense<0.000000e+00> : vector<1xf32>
    %127 = vector.multi_reduction <add>, %126, %cst_43 [1, 2] : vector<1x1x8xf32> to vector<1xf32>
    %128 = vector.shape_cast %127 : vector<1xf32> to vector<1x1x1xf32>
    %129 = vector.extract %128[0, 0, 0] : f32 from vector<1x1x1xf32>
    %cst_44 = arith.constant 9.99999993E-9 : f32
    %130 = arith.addf %129, %cst_44 : f32
    %131 = vector.broadcast %130 : f32 to vector<1x64xf32>
    %132 = arith.divf %125, %131 : vector<1x64xf32>
    %133 = arith.truncf %132 : vector<1x64xf32> to vector<1x64xbf16>
    %c0_45 = arith.constant 0 : index
    %c0_46 = arith.constant 0 : index
    %134 = vector.load %arg7[%c0_45, %c0_46] : memref<64x64xbf16, #tpu.memory_space<vmem>>, vector<64x64xbf16>
    %cst_47 = arith.constant dense<0.000000e+00> : vector<1x64xf32>
    %135 = tpu.matmul %133, %134, %cst_47 {dimension_numbers = #tpu.dot_dimension_numbers<[1], [0], [0], [1], [0, 0, 1, 1], [], []>} : vector<1x64xbf16>, vector<64x64xbf16>, vector<1x64xf32> -> vector<1x64xf32>
    %c0_48 = arith.constant 0 : index
    %c0_49 = arith.constant 0 : index
    %136 = vector.load %arg8[%c0_48, %c0_49] : memref<1x64xf32, #tpu.memory_space<vmem>>, vector<1x64xf32>
    %137 = arith.addf %135, %136 : vector<1x64xf32>
    %cst_50 = arith.constant 0.000000e+00 : f32
    %138 = vector.broadcast %cst_50 : f32 to vector<1x64xf32>
    %139 = arith.maximumf %137, %138 : vector<1x64xf32>
    %140 = arith.truncf %139 : vector<1x64xf32> to vector<1x64xbf16>
    %c0_51 = arith.constant 0 : index
    %c0_52 = arith.constant 0 : index
    %141 = vector.load %arg9[%c0_51, %c0_52] : memref<64x1xbf16, #tpu.memory_space<vmem>>, vector<64x1xbf16>
    %cst_53 = arith.constant dense<0.000000e+00> : vector<1x1xf32>
    %142 = tpu.matmul %140, %141, %cst_53 {dimension_numbers = #tpu.dot_dimension_numbers<[1], [0], [0], [1], [0, 0, 1, 1], [], []>} : vector<1x64xbf16>, vector<64x1xbf16>, vector<1x1xf32> -> vector<1x1xf32>
    %c0_54 = arith.constant 0 : index
    %c0_55 = arith.constant 0 : index
    %143 = vector.load %arg10[%c0_54, %c0_55] : memref<1x1xf32, #tpu.memory_space<vmem>>, vector<1x1xf32>
    %144 = arith.addf %142, %143 : vector<1x1xf32>
    %c0_56 = arith.constant 0 : index
    %c0_57 = arith.constant 0 : index
    %c0_58 = arith.constant 0 : index
    %145 = vector.load %arg11[%c0_56, %c0_57, %c0_58] : memref<1x1x1xf32, #tpu.memory_space<vmem>>, vector<1x1x1xf32>
    %146 = vector.shape_cast %145 : vector<1x1x1xf32> to vector<1x1xf32>
    %147 = vector.shape_cast %144 : vector<1x1xf32> to vector<1x1x1xf32>
    tpu.vector_store %arg11[%c0_56, %c0_57, %c0_58], %147 {strides = array<i32>} : memref<1x1x1xf32, #tpu.memory_space<vmem>>, vector<1x1x1xf32>,
    return
  }
  func.func @transform_0(%arg0: i32) -> (i32, i32, i32) {
    %c0_i32 = arith.constant 0 : i32
    %c0_i32_0 = arith.constant 0 : i32
    %c0_i32_1 = arith.constant 0 : i32
    return %arg0, %c0_i32, %c0_i32_0 : i32, i32, i32
  }
  func.func @transform_1(%arg0: i32) -> (i32, i32, i32) {
    %c0_i32 = arith.constant 0 : i32
    %c0_i32_0 = arith.constant 0 : i32
    %c0_i32_1 = arith.constant 0 : i32
    return %arg0, %c0_i32, %c0_i32_0 : i32, i32, i32
  }
  func.func @transform_2(%arg0: i32) -> (i32, i32) {
    %c0_i32 = arith.constant 0 : i32
    %c0_i32_0 = arith.constant 0 : i32
    %c0_i32_1 = arith.constant 0 : i32
    return %c0_i32, %c0_i32_0 : i32, i32
  }
  func.func @transform_3(%arg0: i32) -> (i32, i32) {
    %c0_i32 = arith.constant 0 : i32
    %c0_i32_0 = arith.constant 0 : i32
    %c0_i32_1 = arith.constant 0 : i32
    return %c0_i32, %c0_i32_0 : i32, i32
  }
  func.func @transform_4(%arg0: i32) -> (i32, i32) {
    %c0_i32 = arith.constant 0 : i32
    %c0_i32_0 = arith.constant 0 : i32
    %c0_i32_1 = arith.constant 0 : i32
    return %c0_i32, %c0_i32_0 : i32, i32
  }
  func.func @transform_5(%arg0: i32) -> (i32, i32) {
    %c0_i32 = arith.constant 0 : i32
    %c0_i32_0 = arith.constant 0 : i32
    %c0_i32_1 = arith.constant 0 : i32
    return %c0_i32, %c0_i32_0 : i32, i32
  }
  func.func @transform_6(%arg0: i32) -> (i32, i32) {
    %c0_i32 = arith.constant 0 : i32
    %c0_i32_0 = arith.constant 0 : i32
    %c0_i32_1 = arith.constant 0 : i32
    return %c0_i32, %c0_i32_0 : i32, i32
  }
  func.func @transform_7(%arg0: i32) -> (i32, i32) {
    %c0_i32 = arith.constant 0 : i32
    %c0_i32_0 = arith.constant 0 : i32
    %c0_i32_1 = arith.constant 0 : i32
    return %c0_i32, %c0_i32_0 : i32, i32
  }
  func.func @transform_8(%arg0: i32) -> (i32, i32) {
    %c0_i32 = arith.constant 0 : i32
    %c0_i32_0 = arith.constant 0 : i32
    %c0_i32_1 = arith.constant 0 : i32
    return %c0_i32, %c0_i32_0 : i32, i32
  }
  func.func @transform_9(%arg0: i32) -> (i32, i32) {
    %c0_i32 = arith.constant 0 : i32
    %c0_i32_0 = arith.constant 0 : i32
    %c0_i32_1 = arith.constant 0 : i32
    return %c0_i32, %c0_i32_0 : i32, i32
  }
  func.func @transform_10(%arg0: i32) -> (i32, i32, i32) {
    %c0_i32 = arith.constant 0 : i32
    %c0_i32_0 = arith.constant 0 : i32
    %c0_i32_1 = arith.constant 0 : i32
    return %arg0, %c0_i32, %c0_i32_0 : i32, i32, i32
  }
}

</mosaic_0001>

<bundles_post_ra>
// kernel: mynet_forward.4
= control target key start
LH: loop header
LB: loop body
LE: loop exit
PB: predicated region body
PF: predicated region fallthrough
CT: control target
= control target key end

     0   :  { %vm184_vm0 = vcmask 1042432   ;;  %vm185_vm1 = vcmask 1043456   ;;  %v555_v1 = vmov 65535   ;;  %v556_v3 = vmov 0   ;;  %s917_s1 = inlined_call_operand.vmem [shape: bf16[7,192], index: 1, kind: input, shape index: {}]   ;;  %s918_s0 = inlined_call_operand.vmem [shape: bf16[240,7], index: 0, kind: input, shape index: {}]   ;;  %s919_s2 = inlined_call_operand.vmem [shape: f32[1,192], index: 2, kind: input, shape index: {}]   ;;  %s920_s3 = inlined_call_operand.vmem [shape: f32[240,192], index: 3, kind: output, shape index: {}]  }
   0x1   :  { %v45_v0 = vld [vmem:[%s917_s1] sm:$0xff]  ;;  %v186_v2 = vsel %vm184_vm0, 4294967295, %v555_v1  ;;  %226 = vmatprep.mubr.bf16.mxu0 %v556_v3  ;;  %306 = vmatprep.mubr.bf16.mxu1 %v556_v3  ;;  %vm138_vm2 = vcmask 56320   ;;  %v542_v11 = vld [vmem:[%s918_s0 + $0x8] sm:$0xff]   ;;  %v544_v13 = vld [vmem:[%s918_s0 + $0x10] sm:$0xff]   ;;  %v48_v24 = vlaneseq  ;;  %vm438_vm3 = vcmask 523264  }
   0x2   :  { %v518_v4 = vcombine.high %v45_v0, %v45_v0  ;;  %v187_v5 = vsel %vm185_vm1, %v186_v2, 0  ;;  %v517_v6 = vcombine.low %v45_v0, %v45_v0  ;;  %v540_v9 = vld [vmem:[%s918_s0] sm:$0xff]   ;;  %v543_v12 = vld [vmem:[%s918_s0 + $0x48] sm:$0xff]   ;;  %v545_v14 = vld [vmem:[%s918_s0 + $0x50] sm:$0xff]  }
   0x3   :  { %v541_v10 = vld [vmem:[%s918_s0 + $0x40] sm:$0xff]   ;;  %v546_v15 = vld [vmem:[%s918_s0 + $0x18] sm:$0xff]   ;;  %v550_v19 = vld [vmem:[%s918_s0 + $0x28] sm:$0xff]   ;;  %v49_v25 = vshrl.u32 %v48_v24, 7 }
   0x4   :  { %v192_v7 = vand.u32 %v518_v4, %v187_v5  ;;  %v189_v8 = vand.u32 %v517_v6, %v187_v5  ;;  %v547_v16 = vld [vmem:[%s918_s0 + $0x58] sm:$0xff]   ;;  %v548_v17 = vld [vmem:[%s918_s0 + $0x20] sm:$0xff]   ;;  %v551_v20 = vld [vmem:[%s918_s0 + $0x68] sm:$0xff]  }
   0x5   :  { %v549_v18 = vld [vmem:[%s918_s0 + $0x60] sm:$0xff]   ;;  %v552_v21 = vld [vmem:[%s918_s0 + $0x30] sm:$0xff]   ;;  %v554_v23 = vld [vmem:[%s918_s0 + $0x38] sm:$0xff]   ;;  %v50_v26 = vsub.s32 0, %v49_v25  ;;  %v54_v28 = vsub.s32 1, %v49_v25 }
   0x6   :  { %194 = vmatprep.subr.bf16.mxu0 %v192_v7  ;;  %534 = vmatprep.subr.bf16.mxu1 %v192_v7  ;;  %v553_v22 = vld [vmem:[%s918_s0 + $0x70] sm:$0xff]   ;;  %v46_v27 = vld [vmem:[%s919_s2] sm:$0x3] }
   0x7   :  { %195 = vmatpush1.bf16.msra.mxu0 %v189_v8  ;;  %535 = vmatpush1.bf16.msra.mxu1 %v189_v8  ;;  %v643_v29 = vrot.slane %v46_v27, %v50_v26  ;;  %v645_v30 = vrot.slane %v46_v27, %v54_v28 }
   0xa   :  { %519 = vmatmul.mubr.msk.bf16.vlgmr.msra.gmra.mrb[0].mxu0 %vm138_vm2, %v540_v9  ;;  %527 = vmatmul.mubr.msk.bf16.vlgmr.msra.gmra.mrb[0].mxu1 %vm138_vm2, %v541_v10 }
   0xb   :  { %236 = vmatprep.mubr.bf16.mxu0 %v556_v3  ;;  %316 = vmatprep.mubr.bf16.mxu1 %v556_v3 }
  0x12   :  { %520 = vmatmul.mubr.msk.bf16.gmra.mrb[4].mxu0 %vm138_vm2, %v542_v11  ;;  %528 = vmatmul.mubr.msk.bf16.gmra.mrb[4].mxu1 %vm138_vm2, %v543_v12 }
  0x13   :  { %246 = vmatprep.mubr.bf16.mxu0 %v556_v3  ;;  %326 = vmatprep.mubr.bf16.mxu1 %v556_v3 }
  0x1a   :  { %521 = vmatmul.mubr.msk.bf16.gmra.mrb[8].mxu0 %vm138_vm2, %v544_v13  ;;  %529 = vmatmul.mubr.msk.bf16.gmra.mrb[8].mxu1 %vm138_vm2, %v545_v14 }
  0x1b   :  { %256 = vmatprep.mubr.bf16.mxu0 %v556_v3  ;;  %336 = vmatprep.mubr.bf16.mxu1 %v556_v3 }
  0x22   :  { %522 = vmatmul.mubr.msk.bf16.gmra.mrb[12].mxu0 %vm138_vm2, %v546_v15  ;;  %530 = vmatmul.mubr.msk.bf16.gmra.mrb[12].mxu1 %vm138_vm2, %v547_v16 }
  0x23   :  { %266 = vmatprep.mubr.bf16.mxu0 %v556_v3  ;;  %346 = vmatprep.mubr.bf16.mxu1 %v556_v3 }
  0x2a   :  { %523 = vmatmul.mubr.msk.bf16.gmra.mrb[16].mxu0 %vm138_vm2, %v548_v17  ;;  %531 = vmatmul.mubr.msk.bf16.gmra.mrb[16].mxu1 %vm138_vm2, %v549_v18 }
  0x2b   :  { %276 = vmatprep.mubr.bf16.mxu0 %v556_v3  ;;  %356 = vmatprep.mubr.bf16.mxu1 %v556_v3 }
  0x32   :  { %524 = vmatmul.mubr.msk.bf16.gmra.mrb[20].mxu0 %vm138_vm2, %v550_v19  ;;  %532 = vmatmul.mubr.msk.bf16.gmra.mrb[20].mxu1 %vm138_vm2, %v551_v20 }
  0x33   :  { %286 = vmatprep.mubr.bf16.mxu0 %v556_v3  ;;  %366 = vmatprep.mubr.bf16.mxu1 %v556_v3 }
  0x3a   :  { %525 = vmatmul.mubr.msk.bf16.gmra.mrb[24].mxu0 %vm138_vm2, %v552_v21  ;;  %533 = vmatmul.mubr.msk.bf16.gmra.mrb[24].mxu1 %vm138_vm2, %v553_v22 }
  0x3b   :  { %296 = vmatprep.mubr.bf16.mxu0 %v556_v3 }
  0x42   :  { %526 = vmatmul.mubr.msk.bf16.gmra.mrb[28].mxu0 %vm138_vm2, %v554_v23 }
  0xdd   :  { %v228_v31 = vpop.f32.mrb[0].mxu0  ;;  %v308_v32 = vpop.f32.mrb[0].mxu1 }
  0xde   :  { %v229_v33 = vadd.f32 %v228_v31, %v643_v29  ;;  %v230_v34 = vpop.f32.mrb[1].mxu0  ;;  %v309_v35 = vadd.f32 %v308_v32, %v643_v29  ;;  %v310_v36 = vpop.f32.mrb[1].mxu1 }
  0xdf   :  { %v231_v37 = vadd.f32 %v230_v34, %v645_v30  ;;  %v232_v38 = vpop.f32.mrb[2].mxu0  ;;  %v311_v39 = vadd.f32 %v310_v36, %v645_v30  ;;  %v312_v40 = vpop.f32.mrb[2].mxu1 }
  0xe0   :  { %v377_v41 = vmax.f32 %v229_v33, 0.0  ;;  %v233_v42 = vadd.f32 %v232_v38, %v643_v29  ;;  %v234_v43 = vpop.f32.mrb[3].mxu0  ;;  %v409_v44 = vmax.f32 %v309_v35, 0.0  ;;  %v313_v45 = vadd.f32 %v312_v40, %v643_v29  ;;  %v314_v46 = vpop.f32.mrb[3].mxu1 }
  0xe1   :  { %v378_v47 = vmax.f32 %v231_v37, 0.0  ;;  %v235_v48 = vadd.f32 %v234_v43, %v645_v30  ;;  %v410_v49 = vmax.f32 %v311_v39, 0.0  ;;  %v315_v50 = vadd.f32 %v314_v46, %v645_v30 }
  0xe2   :  { %437 = vst [vmem:[%s920_s3] sm:$0xff] %v377_v41  ;;  %v379_v51 = vmax.f32 %v233_v42, 0.0  ;;  %470 = vst [vmem:[%s920_s3 + $0x100] sm:$0xff] %v409_v44  ;;  %v411_v52 = vmax.f32 %v313_v45, 0.0 }
  0xe3   :  { %439 = vst.msk [vmem:[%s920_s3 + $0x8] sm:$0xff] %vm438_vm3, %v378_v47  ;;  %v380_v53 = vmax.f32 %v235_v48, 0.0  ;;  %471 = vst.msk [vmem:[%s920_s3 + $0x108] sm:$0xff] %vm438_vm3, %v410_v49  ;;  %v412_v54 = vmax.f32 %v315_v50, 0.0 }
  0xe4   :  { %440 = vst [vmem:[%s920_s3 + $0x10] sm:$0xff] %v379_v51  ;;  %472 = vst [vmem:[%s920_s3 + $0x110] sm:$0xff] %v411_v52 }
  0xe5   :  { %441 = vst.msk [vmem:[%s920_s3 + $0x18] sm:$0xff] %vm438_vm3, %v380_v53  ;;  %v238_v55 = vpop.f32.mrb[4].mxu0  ;;  %473 = vst.msk [vmem:[%s920_s3 + $0x118] sm:$0xff] %vm438_vm3, %v412_v54  ;;  %v318_v56 = vpop.f32.mrb[4].mxu1 }
  0xe6   :  { %v239_v57 = vadd.f32 %v238_v55, %v643_v29  ;;  %v240_v58 = vpop.f32.mrb[5].mxu0  ;;  %v319_v59 = vadd.f32 %v318_v56, %v643_v29  ;;  %v320_v60 = vpop.f32.mrb[5].mxu1 }
  0xe7   :  { %v241_v61 = vadd.f32 %v240_v58, %v645_v30  ;;  %v242_v62 = vpop.f32.mrb[6].mxu0  ;;  %v321_v63 = vadd.f32 %v320_v60, %v645_v30  ;;  %v322_v0 = vpop.f32.mrb[6].mxu1 }
  0xe8   :  { %v381_v1 = vmax.f32 %v239_v57, 0.0  ;;  %v243_v2 = vadd.f32 %v242_v62, %v643_v29  ;;  %v244_v3 = vpop.f32.mrb[7].mxu0  ;;  %v413_v4 = vmax.f32 %v319_v59, 0.0  ;;  %v323_v5 = vadd.f32 %v322_v0, %v643_v29  ;;  %v324_v6 = vpop.f32.mrb[7].mxu1 }
  0xe9   :  { %v382_v7 = vmax.f32 %v241_v61, 0.0  ;;  %v245_v8 = vadd.f32 %v244_v3, %v645_v30  ;;  %v414_v9 = vmax.f32 %v321_v63, 0.0  ;;  %v325_v10 = vadd.f32 %v324_v6, %v645_v30 }
  0xea   :  { %442 = vst [vmem:[%s920_s3 + $0x20] sm:$0xff] %v381_v1  ;;  %v383_v11 = vmax.f32 %v243_v2, 0.0  ;;  %474 = vst [vmem:[%s920_s3 + $0x120] sm:$0xff] %v413_v4  ;;  %v415_v12 = vmax.f32 %v323_v5, 0.0 }
  0xeb   :  { %443 = vst.msk [vmem:[%s920_s3 + $0x28] sm:$0xff] %vm438_vm3, %v382_v7  ;;  %v384_v13 = vmax.f32 %v245_v8, 0.0  ;;  %475 = vst.msk [vmem:[%s920_s3 + $0x128] sm:$0xff] %vm438_vm3, %v414_v9  ;;  %v416_v14 = vmax.f32 %v325_v10, 0.0 }
  0xec   :  { %444 = vst [vmem:[%s920_s3 + $0x30] sm:$0xff] %v383_v11  ;;  %476 = vst [vmem:[%s920_s3 + $0x130] sm:$0xff] %v415_v12 }
  0xed   :  { %445 = vst.msk [vmem:[%s920_s3 + $0x38] sm:$0xff] %vm438_vm3, %v384_v13  ;;  %v248_v15 = vpop.f32.mrb[8].mxu0  ;;  %477 = vst.msk [vmem:[%s920_s3 + $0x138] sm:$0xff] %vm438_vm3, %v416_v14  ;;  %v328_v16 = vpop.f32.mrb[8].mxu1 }
  0xee   :  { %v249_v17 = vadd.f32 %v248_v15, %v643_v29  ;;  %v250_v18 = vpop.f32.mrb[9].mxu0  ;;  %v329_v19 = vadd.f32 %v328_v16, %v643_v29  ;;  %v330_v20 = vpop.f32.mrb[9].mxu1 }
  0xef   :  { %v251_v21 = vadd.f32 %v250_v18, %v645_v30  ;;  %v252_v22 = vpop.f32.mrb[10].mxu0  ;;  %v331_v23 = vadd.f32 %v330_v20, %v645_v30  ;;  %v332_v24 = vpop.f32.mrb[10].mxu1 }
  0xf0   :  { %v385_v25 = vmax.f32 %v249_v17, 0.0  ;;  %v253_v26 = vadd.f32 %v252_v22, %v643_v29  ;;  %v254_v27 = vpop.f32.mrb[11].mxu0  ;;  %v417_v28 = vmax.f32 %v329_v19, 0.0  ;;  %v333_v31 = vadd.f32 %v332_v24, %v643_v29  ;;  %v334_v32 = vpop.f32.mrb[11].mxu1 }
  0xf1   :  { %v386_v33 = vmax.f32 %v251_v21, 0.0  ;;  %v255_v34 = vadd.f32 %v254_v27, %v645_v30  ;;  %v418_v35 = vmax.f32 %v331_v23, 0.0  ;;  %v335_v36 = vadd.f32 %v334_v32, %v645_v30 }
  0xf2   :  { %446 = vst [vmem:[%s920_s3 + $0x40] sm:$0xff] %v385_v25  ;;  %v387_v37 = vmax.f32 %v253_v26, 0.0  ;;  %478 = vst [vmem:[%s920_s3 + $0x140] sm:$0xff] %v417_v28  ;;  %v419_v38 = vmax.f32 %v333_v31, 0.0 }
  0xf3   :  { %447 = vst.msk [vmem:[%s920_s3 + $0x48] sm:$0xff] %vm438_vm3, %v386_v33  ;;  %v388_v39 = vmax.f32 %v255_v34, 0.0  ;;  %479 = vst.msk [vmem:[%s920_s3 + $0x148] sm:$0xff] %vm438_vm3, %v418_v35  ;;  %v420_v40 = vmax.f32 %v335_v36, 0.0 }
  0xf4   :  { %448 = vst [vmem:[%s920_s3 + $0x50] sm:$0xff] %v387_v37  ;;  %480 = vst [vmem:[%s920_s3 + $0x150] sm:$0xff] %v419_v38 }
  0xf5   :  { %449 = vst.msk [vmem:[%s920_s3 + $0x58] sm:$0xff] %vm438_vm3, %v388_v39  ;;  %v258_v41 = vpop.f32.mrb[12].mxu0  ;;  %481 = vst.msk [vmem:[%s920_s3 + $0x158] sm:$0xff] %vm438_vm3, %v420_v40  ;;  %v338_v42 = vpop.f32.mrb[12].mxu1 }
  0xf6   :  { %v259_v43 = vadd.f32 %v258_v41, %v643_v29  ;;  %v260_v44 = vpop.f32.mrb[13].mxu0  ;;  %v339_v45 = vadd.f32 %v338_v42, %v643_v29  ;;  %v340_v46 = vpop.f32.mrb[13].mxu1 }
  0xf7   :  { %v261_v47 = vadd.f32 %v260_v44, %v645_v30  ;;  %v262_v48 = vpop.f32.mrb[14].mxu0  ;;  %v341_v49 = vadd.f32 %v340_v46, %v645_v30  ;;  %v342_v50 = vpop.f32.mrb[14].mxu1 }
  0xf8   :  { %v389_v51 = vmax.f32 %v259_v43, 0.0  ;;  %v263_v52 = vadd.f32 %v262_v48, %v643_v29  ;;  %v264_v53 = vpop.f32.mrb[15].mxu0  ;;  %v421_v54 = vmax.f32 %v339_v45, 0.0  ;;  %v343_v55 = vadd.f32 %v342_v50, %v643_v29  ;;  %v344_v56 = vpop.f32.mrb[15].mxu1 }
  0xf9   :  { %v390_v57 = vmax.f32 %v261_v47, 0.0  ;;  %v265_v58 = vadd.f32 %v264_v53, %v645_v30  ;;  %v422_v59 = vmax.f32 %v341_v49, 0.0  ;;  %v345_v60 = vadd.f32 %v344_v56, %v645_v30 }
  0xfa   :  { %450 = vst [vmem:[%s920_s3 + $0x60] sm:$0xff] %v389_v51  ;;  %v391_v61 = vmax.f32 %v263_v52, 0.0  ;;  %482 = vst [vmem:[%s920_s3 + $0x160] sm:$0xff] %v421_v54  ;;  %v423_v62 = vmax.f32 %v343_v55, 0.0 }
  0xfb   :  { %451 = vst.msk [vmem:[%s920_s3 + $0x68] sm:$0xff] %vm438_vm3, %v390_v57  ;;  %v392_v63 = vmax.f32 %v265_v58, 0.0  ;;  %483 = vst.msk [vmem:[%s920_s3 + $0x168] sm:$0xff] %vm438_vm3, %v422_v59  ;;  %v424_v0 = vmax.f32 %v345_v60, 0.0 }
  0xfc   :  { %452 = vst [vmem:[%s920_s3 + $0x70] sm:$0xff] %v391_v61  ;;  %484 = vst [vmem:[%s920_s3 + $0x170] sm:$0xff] %v423_v62 }
  0xfd   :  { %453 = vst.msk [vmem:[%s920_s3 + $0x78] sm:$0xff] %vm438_vm3, %v392_v63  ;;  %v268_v1 = vpop.f32.mrb[16].mxu0  ;;  %485 = vst.msk [vmem:[%s920_s3 + $0x178] sm:$0xff] %vm438_vm3, %v424_v0  ;;  %v348_v2 = vpop.f32.mrb[16].mxu1 }
  0xfe   :  { %v269_v3 = vadd.f32 %v268_v1, %v643_v29  ;;  %v270_v4 = vpop.f32.mrb[17].mxu0  ;;  %v349_v5 = vadd.f32 %v348_v2, %v643_v29  ;;  %v350_v6 = vpop.f32.mrb[17].mxu1 }
  0xff   :  { %v271_v7 = vadd.f32 %v270_v4, %v645_v30  ;;  %v272_v8 = vpop.f32.mrb[18].mxu0  ;;  %v351_v9 = vadd.f32 %v350_v6, %v645_v30  ;;  %v352_v10 = vpop.f32.mrb[18].mxu1 }
 0x100   :  { %v393_v11 = vmax.f32 %v269_v3, 0.0  ;;  %v273_v12 = vadd.f32 %v272_v8, %v643_v29  ;;  %v274_v13 = vpop.f32.mrb[19].mxu0  ;;  %v425_v14 = vmax.f32 %v349_v5, 0.0  ;;  %v353_v15 = vadd.f32 %v352_v10, %v643_v29  ;;  %v354_v16 = vpop.f32.mrb[19].mxu1 }
 0x101   :  { %v394_v17 = vmax.f32 %v271_v7, 0.0  ;;  %v275_v18 = vadd.f32 %v274_v13, %v645_v30  ;;  %v426_v19 = vmax.f32 %v351_v9, 0.0  ;;  %v355_v20 = vadd.f32 %v354_v16, %v645_v30 }
 0x102   :  { %454 = vst [vmem:[%s920_s3 + $0x80] sm:$0xff] %v393_v11  ;;  %v395_v21 = vmax.f32 %v273_v12, 0.0  ;;  %486 = vst [vmem:[%s920_s3 + $0x180] sm:$0xff] %v425_v14  ;;  %v427_v22 = vmax.f32 %v353_v15, 0.0 }
 0x103   :  { %455 = vst.msk [vmem:[%s920_s3 + $0x88] sm:$0xff] %vm438_vm3, %v394_v17  ;;  %v396_v23 = vmax.f32 %v275_v18, 0.0  ;;  %487 = vst.msk [vmem:[%s920_s3 + $0x188] sm:$0xff] %vm438_vm3, %v426_v19  ;;  %v428_v24 = vmax.f32 %v355_v20, 0.0 }
 0x104   :  { %456 = vst [vmem:[%s920_s3 + $0x90] sm:$0xff] %v395_v21  ;;  %488 = vst [vmem:[%s920_s3 + $0x190] sm:$0xff] %v427_v22 }
 0x105   :  { %457 = vst.msk [vmem:[%s920_s3 + $0x98] sm:$0xff] %vm438_vm3, %v396_v23  ;;  %v278_v25 = vpop.f32.mrb[20].mxu0  ;;  %489 = vst.msk [vmem:[%s920_s3 + $0x198] sm:$0xff] %vm438_vm3, %v428_v24  ;;  %v358_v26 = vpop.f32.mrb[20].mxu1 }
 0x106   :  { %v279_v27 = vadd.f32 %v278_v25, %v643_v29  ;;  %v280_v28 = vpop.f32.mrb[21].mxu0  ;;  %v359_v31 = vadd.f32 %v358_v26, %v643_v29  ;;  %v360_v32 = vpop.f32.mrb[21].mxu1 }
 0x107   :  { %v281_v33 = vadd.f32 %v280_v28, %v645_v30  ;;  %v282_v34 = vpop.f32.mrb[22].mxu0  ;;  %v361_v35 = vadd.f32 %v360_v32, %v645_v30  ;;  %v362_v36 = vpop.f32.mrb[22].mxu1 }
 0x108   :  { %v397_v37 = vmax.f32 %v279_v27, 0.0  ;;  %v283_v38 = vadd.f32 %v282_v34, %v643_v29  ;;  %v284_v39 = vpop.f32.mrb[23].mxu0  ;;  %v429_v40 = vmax.f32 %v359_v31, 0.0  ;;  %v363_v41 = vadd.f32 %v362_v36, %v643_v29  ;;  %v364_v42 = vpop.f32.mrb[23].mxu1 }
 0x109   :  { %v398_v43 = vmax.f32 %v281_v33, 0.0  ;;  %v285_v44 = vadd.f32 %v284_v39, %v645_v30  ;;  %v430_v45 = vmax.f32 %v361_v35, 0.0  ;;  %v365_v46 = vadd.f32 %v364_v42, %v645_v30 }
 0x10a   :  { %458 = vst [vmem:[%s920_s3 + $0xa0] sm:$0xff] %v397_v37  ;;  %v399_v47 = vmax.f32 %v283_v38, 0.0  ;;  %490 = vst [vmem:[%s920_s3 + $0x1a0] sm:$0xff] %v429_v40  ;;  %v431_v48 = vmax.f32 %v363_v41, 0.0 }
 0x10b   :  { %459 = vst.msk [vmem:[%s920_s3 + $0xa8] sm:$0xff] %vm438_vm3, %v398_v43  ;;  %v400_v49 = vmax.f32 %v285_v44, 0.0  ;;  %491 = vst.msk [vmem:[%s920_s3 + $0x1a8] sm:$0xff] %vm438_vm3, %v430_v45  ;;  %v432_v50 = vmax.f32 %v365_v46, 0.0 }
 0x10c   :  { %460 = vst [vmem:[%s920_s3 + $0xb0] sm:$0xff] %v399_v47  ;;  %492 = vst [vmem:[%s920_s3 + $0x1b0] sm:$0xff] %v431_v48 }
 0x10d   :  { %461 = vst.msk [vmem:[%s920_s3 + $0xb8] sm:$0xff] %vm438_vm3, %v400_v49  ;;  %v288_v51 = vpop.f32.mrb[24].mxu0  ;;  %493 = vst.msk [vmem:[%s920_s3 + $0x1b8] sm:$0xff] %vm438_vm3, %v432_v50  ;;  %v368_v52 = vpop.f32.mrb[24].mxu1 }
 0x10e   :  { %v289_v53 = vadd.f32 %v288_v51, %v643_v29  ;;  %v290_v54 = vpop.f32.mrb[25].mxu0  ;;  %v369_v55 = vadd.f32 %v368_v52, %v643_v29  ;;  %v370_v56 = vpop.f32.mrb[25].mxu1 }
 0x10f   :  { %v291_v57 = vadd.f32 %v290_v54, %v645_v30  ;;  %v292_v58 = vpop.f32.mrb[26].mxu0  ;;  %v371_v59 = vadd.f32 %v370_v56, %v645_v30  ;;  %v372_v60 = vpop.f32.mrb[26].mxu1 }
 0x110   :  { %v401_v61 = vmax.f32 %v289_v53, 0.0  ;;  %v293_v62 = vadd.f32 %v292_v58, %v643_v29  ;;  %v294_v63 = vpop.f32.mrb[27].mxu0  ;;  %v433_v0 = vmax.f32 %v369_v55, 0.0  ;;  %v373_v1 = vadd.f32 %v372_v60, %v643_v29  ;;  %v374_v2 = vpop.f32.mrb[27].mxu1 }
 0x111   :  { %v402_v3 = vmax.f32 %v291_v57, 0.0  ;;  %v295_v4 = vadd.f32 %v294_v63, %v645_v30  ;;  %v434_v5 = vmax.f32 %v371_v59, 0.0  ;;  %v375_v6 = vadd.f32 %v374_v2, %v645_v30 }
 0x112   :  { %462 = vst [vmem:[%s920_s3 + $0xc0] sm:$0xff] %v401_v61  ;;  %v403_v7 = vmax.f32 %v293_v62, 0.0  ;;  %494 = vst [vmem:[%s920_s3 + $0x1c0] sm:$0xff] %v433_v0  ;;  %v435_v8 = vmax.f32 %v373_v1, 0.0 }
 0x113   :  { %463 = vst.msk [vmem:[%s920_s3 + $0xc8] sm:$0xff] %vm438_vm3, %v402_v3  ;;  %v404_v9 = vmax.f32 %v295_v4, 0.0  ;;  %495 = vst.msk [vmem:[%s920_s3 + $0x1c8] sm:$0xff] %vm438_vm3, %v434_v5  ;;  %v436_v10 = vmax.f32 %v375_v6, 0.0 }
 0x114   :  { %464 = vst [vmem:[%s920_s3 + $0xd0] sm:$0xff] %v403_v7  ;;  %496 = vst [vmem:[%s920_s3 + $0x1d0] sm:$0xff] %v435_v8 }
 0x115   :  { %465 = vst.msk [vmem:[%s920_s3 + $0xd8] sm:$0xff] %vm438_vm3, %v404_v9  ;;  %v298_v11 = vpop.f32.mrb[28].mxu0  ;;  %497 = vst.msk [vmem:[%s920_s3 + $0x1d8] sm:$0xff] %vm438_vm3, %v436_v10 }
 0x116   :  { %v299_v12 = vadd.f32 %v298_v11, %v643_v29  ;;  %v300_v13 = vpop.f32.mrb[29].mxu0 }
 0x117   :  { %v301_v14 = vadd.f32 %v300_v13, %v645_v30  ;;  %v302_v15 = vpop.f32.mrb[30].mxu0 }
 0x118   :  { %v405_v16 = vmax.f32 %v299_v12, 0.0  ;;  %v303_v17 = vadd.f32 %v302_v15, %v643_v29  ;;  %v304_v18 = vpop.f32.mrb[31].mxu0 }
 0x119   :  { %v406_v19 = vmax.f32 %v301_v14, 0.0  ;;  %v305_v20 = vadd.f32 %v304_v18, %v645_v30 }
 0x11a   :  { %466 = vst [vmem:[%s920_s3 + $0xe0] sm:$0xff] %v405_v16  ;;  %v407_v21 = vmax.f32 %v303_v17, 0.0 }
 0x11b   :  { %467 = vst.msk [vmem:[%s920_s3 + $0xe8] sm:$0xff] %vm438_vm3, %v406_v19  ;;  %v408_v22 = vmax.f32 %v305_v20, 0.0 }
 0x11c   :  { %468 = vst [vmem:[%s920_s3 + $0xf0] sm:$0xff] %v407_v21 }
 0x11d   :  { %469 = vst.msk [vmem:[%s920_s3 + $0xf8] sm:$0xff] %vm438_vm3, %v408_v22 }

// kernel: mynet_forward.5
= control target key start
LH: loop header
LB: loop body
LE: loop exit
PB: predicated region body
PF: predicated region fallthrough
CT: control target
= control target key end

     0   :  { %s1716_s15 = smov 0   ;;  %s1718_s16 = smov 0   ;;  %s1969_s0 = inlined_call_operand.vmem [shape: f32[3,6,46,64], index: 0, kind: input, shape index: {}]   ;;  %s1970_s1 = inlined_call_operand.vmem [shape: bf16[3,7,64,128], index: 1, kind: input, shape index: {}]   ;;  %s1971_s2 = inlined_call_operand.vmem [shape: f32[3,1,128], index: 2, kind: input, shape index: {}]   ;;  %s1972_s3 = inlined_call_operand.vmem [shape: f32[3,6,40,1], index: 3, kind: input, shape index: {}]   ;;  %s1973_s4 = inlined_call_operand.vmem [shape: f32[3,6,40,128], index: 4, kind: output, shape index: {}]  }
   0x1   :  { %s1720_s17 = smov 0   ;;  %s1722_s18 = smov 0  }
   0x2   :  { %s1724_s19 = smov 0  }
   0x3 LB: > { %s23_s20 = sadd.s32 1, %s1678_s17  ;;  %s26_s21 = sadd.s32 1, %s1682_s18  ;;  %s1686_s19 = sphi %s1724_s19, %s14_s19   ;;  %s1682_s18 = sphi %s1722_s18, %s1977_s18   ;;  %s1678_s17 = sphi %s1720_s17, %s1976_s17   ;;  %s1674_s16 = sphi %s1718_s16, %s1975_s16   ;;  %s1670_s15 = sphi %s1716_s15, %s1974_s15  }
   0x4   : > { %p24_p0 = scmp.ge.s32.totalorder %s23_s20, 6  ;;  %p1268_p1 = scmp.ge.s32.totalorder %s1686_s19, 1 }
   0x5   : > { %p216_p2 = scmp.lt.s32.totalorder %s1686_s19, 19 }
   0x6   : > { %s1979_s20 = smov (%p24_p0, %s23_s20), 0  ;;  %s1981_s21 = smov (!%p24_p0, %s26_s21), %s1682_s18 }
   0x7   : > { %p217_p3 = pnand %p1268_p1, %p216_p2  ;;  %p28_p4 = scmp.ge.s32.totalorder %s1981_s21, 3 }
   0x8   : > { %p267_p5 = scmp.lt.s32.totalorder (!%p217_p3), %s1674_s16, 2  ;;  %p269_p6 = scmp.lt.s32.totalorder (!%p217_p3), %s1670_s15, 5  ;;  %v1688_v0 = vmov (!%p217_p3), 0.0   ;;  %vm1689_vm0 = vmmov (!%p217_p3), 0   ;;  %v1690_v1 = vmov (!%p217_p3), 0   ;;  %vm360_vm1 = vcmask (!%p217_p3), 523264  }
   0x9   : > { %s1983_s21 = smov (%p28_p4, %s1981_s21), 0  ;;  %220 = sbr.rel (%p217_p3) target bundleno = 339 (0x153), region = 36 }
   0xa   : > { %1422 = vmatprep.subr.bf16.mxu0 (!%p217_p3), %v1688_v0  ;;  %1562 = vmatprep.subr.bf16.mxu1 (!%p217_p3), %v1688_v0 }
   0xb   : > { %1430 = vmatprep.mubr.msk.bf16.mxu0 (!%p217_p3), %vm1689_vm0, %v1688_v0  ;;  %1438 = vmatprep.mubr.msk.bf16.mxu1 (!%p217_p3), %vm1689_vm0, %v1688_v0 }
   0xc   : > { %1618 = vset.pattern.permute.xlu0 (!%p217_p3), %v1690_v1  ;;  %1619 = vset.pattern.permute.xlu1 (!%p217_p3), %v1690_v1 }
  0x10   : > { %s1985_s16 = smov (!%p267_p5, %s1674_s16), 2  ;;  %s1987_s15 = smov (!%p269_p6, %s1670_s15), 5 }
  0x11   : > { %s1572_s22 = smul.u32 224, %s1985_s16 }
  0x12   : > { %s1570_s23 = smul.u32 6, %s1987_s15 }
  0x13   : > { %s1761_s26 = scalar_lea.vmem %s1970_s1, %s1572_s22  ;;  %s1571_s27 = smul.u32 36, %s1985_s16 }
  0x14   : > { %v1620_v2 = vld [vmem:[%s1761_s26 + $0x20] sm:$0xff]   ;;  %v1621_v3 = vld [vmem:[%s1761_s26 + $0x28] sm:$0xff]   ;;  %v1622_v4 = vld [vmem:[%s1761_s26 + $0x30] sm:$0xff]   ;;  %s1573_s7 = smul.u32 5, %s1987_s15  ;;  %s283_s22 = scalar_lea.vmem %s1971_s2, %s1985_s16 }
  0x15   : > { %s273_s28 = sadd.s32 %s1571_s27, %s1570_s23  ;;  %1423 = vmatpush3.bf16.msra.mxu0 %v1620_v2  ;;  %1566 = vmatpush3.bf16.msra.mxu1 %v1620_v2  ;;  %v1623_v5 = vld [vmem:[%s1761_s26 + $0x38] sm:$0xff]   ;;  %v1624_v11 = vld [vmem:[%s1761_s26] sm:$0xff]   ;;  %v1626_v13 = vld [vmem:[%s1761_s26 + $0x8] sm:$0xff]   ;;  %s1574_s8 = smul.u32 30, %s1985_s16 }
  0x16   : > { %1424 = vmatprep.subr.bf16.mxu0 %v1688_v0  ;;  %1563 = vmatprep.subr.bf16.mxu1 %v1688_v0  ;;  %s1269_s29 = sshll.u32 %s273_s28, 3  ;;  %v1625_v12 = vld [vmem:[%s1761_s26 + $0x40] sm:$0xff]   ;;  %v1627_v14 = vld [vmem:[%s1761_s26 + $0x48] sm:$0xff]   ;;  %v1628_v18 = vld [vmem:[%s1761_s26 + $0x10] sm:$0xff]  }
  0x17   : > { %s1772_s6 = scalar_lea.vmem %s1969_s0, %s1269_s29  ;;  %v1629_v19 = vld [vmem:[%s1761_s26 + $0x50] sm:$0xff]   ;;  %v1630_v20 = vld [vmem:[%s1761_s26 + $0x18] sm:$0xff]   ;;  %v1632_v28 = vld [vmem:[%s1761_s26 + $0x60] sm:$0xff]   ;;  %s1817_s9 = sadd.s32 %s1574_s8, %s1573_s7 }
  0x18   : > { %v319_v6 = vld [vmem:[%s1772_s6 + $0x1] sm:$0xff]  ;;  %v320_v7 = vld [vmem:[%s1772_s6 + $0x9] sm:$0xff]  ;;  %v321_v15 = vld [vmem:[%s1772_s6 + $0x11] sm:$0xff]  ;;  %s1271_s10 = sshll.u32 %s1817_s9, 3 }
  0x19   : > { %1425 = vmatpush3.bf16.msra.mxu0 %v1621_v3  ;;  %1567 = vmatpush3.bf16.msra.mxu1 %v1621_v3  ;;  %v323_v8 = vld [vmem:[%s1772_s6 + $0x21] sm:$0xff]  ;;  %v324_v9 = vpack.c.bf16 %v320_v7, %v319_v6  ;;  %v322_v16 = vld [vmem:[%s1772_s6 + $0x19] sm:$0xff]  ;;  %v516_v25 = vld [vmem:[%s1772_s6 + $0xa] sm:$0xff]  ;;  %s1841_s13 = scalar_lea.vmem %s1972_s3, %s1271_s10  ;;  %s1947_s24 = scalar_lea.vmem %s1973_s4, %s1271_s10 }
  0x1a   : > { %1426 = vmatprep.subr.bf16.mxu0 %v1688_v0  ;;  %1564 = vmatprep.subr.bf16.mxu1 %v1688_v0  ;;  %v326_v10 = vpack.c.bf16 %v323_v8, %v323_v8  ;;  %v325_v17 = vpack.c.bf16 %v322_v16, %v321_v15  ;;  %v1631_v21 = vld [vmem:[%s1761_s26 + $0x58] sm:$0xff]   ;;  %v303_v22 = vld [vmem:[%s1772_s6] sm:$0xff]  ;;  %v304_v23 = vld [vmem:[%s1772_s6 + $0x8] sm:$0xff] }
  0x1b   : > { %v515_v24 = vld [vmem:[%s1772_s6 + $0x2] sm:$0xff]  ;;  %v308_v26 = vpack.c.bf16 %v304_v23, %v303_v22  ;;  %v305_v31 = vld [vmem:[%s1772_s6 + $0x10] sm:$0xff]  ;;  %v306_v32 = vld [vmem:[%s1772_s6 + $0x18] sm:$0xff] }
  0x1c   : > { %v520_v27 = vpack.c.bf16 %v516_v25, %v515_v24  ;;  %v1633_v29 = vld [vmem:[%s1761_s26 + $0x80] sm:$0xff]   ;;  %v1634_v30 = vld [vmem:[%s1761_s26 + $0x68] sm:$0xff]   ;;  %v517_v33 = vld [vmem:[%s1772_s6 + $0x12] sm:$0xff]  ;;  %v309_v36 = vpack.c.bf16 %v306_v32, %v305_v31 }
  0x1d   : > { %1427 = vmatpush3.bf16.msra.mxu0 %v1622_v4  ;;  %1568 = vmatpush3.bf16.msra.mxu1 %v1622_v4  ;;  %v518_v34 = vld [vmem:[%s1772_s6 + $0x1a] sm:$0xff]  ;;  %v1635_v35 = vld [vmem:[%s1761_s26 + $0x88] sm:$0xff]   ;;  %v1636_v38 = vld [vmem:[%s1761_s26 + $0x70] sm:$0xff]  }
  0x1e   : > { %1428 = vmatprep.subr.bf16.mxu0 %v1688_v0  ;;  %1565 = vmatprep.subr.bf16.mxu1 %v1688_v0  ;;  %v521_v37 = vpack.c.bf16 %v518_v34, %v517_v33  ;;  %v1637_v39 = vld [vmem:[%s1761_s26 + $0x90] sm:$0xff]   ;;  %v1087_v40 = vld [vmem:[%s1841_s13] sm:$0xff]  ;;  %v1638_v43 = vld [vmem:[%s1761_s26 + $0x78] sm:$0xff]  }
  0x1f   : > { %1094 = vperm.xlu0 %1618, %v1087_v40   ;;  %v307_v41 = vld [vmem:[%s1772_s6 + $0x20] sm:$0xff]  ;;  %v1088_v44 = vld [vmem:[%s1841_s13 + $0x8] sm:$0xff]  ;;  %v1089_v45 = vld [vmem:[%s1841_s13 + $0x10] sm:$0xff] }
  0x20   : > { %v519_v42 = vld [vmem:[%s1772_s6 + $0x22] sm:$0xff]  ;;  %v1639_v46 = vld [vmem:[%s1761_s26 + $0x98] sm:$0xff]   ;;  %v310_v47 = vpack.c.bf16 %v307_v41, %v307_v41  ;;  %1104 = vperm.xlu1 %1619, %v1089_v45   ;;  %v627_v52 = vld [vmem:[%s1772_s6 + $0xb] sm:$0xff] }
  0x21   : > { %1429 = vmatpush3.bf16.msra.mxu0 %v1623_v5  ;;  %1569 = vmatpush3.bf16.msra.mxu1 %v1623_v5  ;;  %v522_v48 = vpack.c.bf16 %v519_v42, %v519_v42  ;;  %v1091_v49 = vld [vmem:[%s1841_s13 + $0x20] sm:$0xff]  ;;  %v1090_v50 = vld [vmem:[%s1841_s13 + $0x18] sm:$0xff]  ;;  %v738_v54 = vld [vmem:[%s1772_s6 + $0xc] sm:$0xff] }
  0x22   : > { %1442 = vmatprep.subr.bf16.mxu1 %v1688_v0  ;;  %1462 = vmatprep.subr.bf16.mxu0 %v1688_v0  ;;  %v626_v51 = vld [vmem:[%s1772_s6 + $0x3] sm:$0xff]  ;;  %v628_v60 = vld [vmem:[%s1772_s6 + $0x13] sm:$0xff]  ;;  %v629_v61 = vld [vmem:[%s1772_s6 + $0x1b] sm:$0xff] }
  0x23   : > { %1099 = vperm.xlu0 %1618, %v1088_v44   ;;  %v737_v53 = vld [vmem:[%s1772_s6 + $0x4] sm:$0xff]  ;;  %v631_v55 = vpack.c.bf16 %v627_v52, %v626_v51  ;;  %v739_v62 = vld [vmem:[%s1772_s6 + $0x14] sm:$0xff]  ;;  %v740_v63 = vld [vmem:[%s1772_s6 + $0x1c] sm:$0xff]  ;;  %v632_v2 = vpack.c.bf16 %v629_v61, %v628_v60 }
  0x24   : > { %1431 = vmatmul.mubr.msk.bf16.vlgmr.msra.gmra.mrb[0].mxu0 %vm360_vm1, %v324_v9  ;;  %1439 = vmatmul.mubr.msk.bf16.vlgmr.msra.gmra.mrb[0].mxu1 %vm360_vm1, %v326_v10  ;;  %v742_v56 = vpack.c.bf16 %v738_v54, %v737_v53  ;;  %v1640_v57 = vld [vmem:[%s1761_s26 + $0xa0] sm:$0xff]   ;;  %v1642_v59 = vld [vmem:[%s1761_s26 + $0xa8] sm:$0xff]   ;;  %v743_v3 = vpack.c.bf16 %v740_v63, %v739_v62  ;;  %v1644_v4 = vld [vmem:[%s1761_s26 + $0xb0] sm:$0xff]  }
  0x25   : > { %1443 = vmatpush3.bf16.msra.mxu1 %v1624_v11  ;;  %1463 = vmatpush3.bf16.msra.mxu0 %v1625_v12  ;;  %v1641_v58 = vld [vmem:[%s1761_s26 + $0xc0] sm:$0xff]   ;;  %v1643_v1 = vld [vmem:[%s1761_s26 + $0xc8] sm:$0xff]   ;;  %v1645_v5 = vld [vmem:[%s1761_s26 + $0xd0] sm:$0xff]  }
  0x26   : > { %1444 = vmatprep.subr.bf16.mxu1 %v1688_v0  ;;  %1464 = vmatprep.subr.bf16.mxu0 %v1688_v0  ;;  %v630_v6 = vld [vmem:[%s1772_s6 + $0x23] sm:$0xff]  ;;  %v1646_v8 = vld [vmem:[%s1761_s26 + $0xb8] sm:$0xff]   ;;  %v960_v15 = vld [vmem:[%s1772_s6 + $0xe] sm:$0xff] }
  0x27   : > { %1434 = vmatprep.mubr.msk.bf16.mxu0 %vm1689_vm0, %v1688_v0  ;;  %1450 = vmatprep.mubr.msk.bf16.mxu1 %vm1689_vm0, %v1688_v0  ;;  %v741_v7 = vld [vmem:[%s1772_s6 + $0x24] sm:$0xff]  ;;  %v1647_v9 = vld [vmem:[%s1761_s26 + $0xd8] sm:$0xff]   ;;  %v633_v10 = vpack.c.bf16 %v630_v6, %v630_v6 }
  0x28   : > { %1114 = vperm.xlu0 %1618, %v1091_v49   ;;  %1109 = vperm.xlu1 %1619, %v1090_v50   ;;  %v744_v11 = vpack.c.bf16 %v741_v7, %v741_v7  ;;  %v848_v12 = vld [vmem:[%s1772_s6 + $0x5] sm:$0xff] }
  0x29   : > { %1445 = vmatpush3.bf16.msra.mxu1 %v1626_v13  ;;  %1465 = vmatpush3.bf16.msra.mxu0 %v1627_v14  ;;  %v849_v13 = vld [vmem:[%s1772_s6 + $0xd] sm:$0xff]  ;;  %v852_v24 = vld [vmem:[%s1772_s6 + $0x25] sm:$0xff] }
  0x2a   : > { %1446 = vmatprep.subr.bf16.mxu1 %v1688_v0  ;;  %1466 = vmatprep.subr.bf16.mxu0 %v1688_v0  ;;  %v959_v14 = vld [vmem:[%s1772_s6 + $0x6] sm:$0xff]  ;;  %v853_v16 = vpack.c.bf16 %v849_v13, %v848_v12 }
  0x2b   : > { %v963_v25 = vld [vmem:[%s1772_s6 + $0x26] sm:$0xff] }
  0x2c   : > { %1435 = vmatmul.mubr.msk.bf16.gmra.mrb[4].mxu0 %vm360_vm1, %v325_v17  ;;  %v964_v17 = vpack.c.bf16 %v960_v15, %v959_v14 }
  0x2d   : > { %1447 = vmatpush3.bf16.msra.mxu1 %v1628_v18  ;;  %1467 = vmatpush3.bf16.msra.mxu0 %v1629_v19  ;;  %v850_v18 = vld [vmem:[%s1772_s6 + $0x15] sm:$0xff]  ;;  %v851_v19 = vld [vmem:[%s1772_s6 + $0x1d] sm:$0xff] }
  0x2e   : > { %1448 = vmatprep.subr.bf16.mxu1 %v1688_v0  ;;  %1468 = vmatprep.subr.bf16.mxu0 %v1688_v0  ;;  %v854_v22 = vpack.c.bf16 %v851_v19, %v850_v18 }
  0x2f   : > { %1470 = vmatprep.mubr.msk.bf16.mxu0 %vm1689_vm0, %v1688_v0 }
  0x31   : > { %1449 = vmatpush3.bf16.msra.mxu1 %v1630_v20  ;;  %1469 = vmatpush3.bf16.msra.mxu0 %v1631_v21  ;;  %v961_v20 = vld [vmem:[%s1772_s6 + $0x16] sm:$0xff]  ;;  %v962_v21 = vld [vmem:[%s1772_s6 + $0x1e] sm:$0xff] }
  0x32   : > { %1482 = vmatprep.subr.bf16.mxu1 %v1688_v0  ;;  %1502 = vmatprep.subr.bf16.mxu0 %v1688_v0  ;;  %v965_v23 = vpack.c.bf16 %v962_v21, %v961_v20 }
  0x34   : > { %1451 = vmatmul.mubr.msk.bf16.vlgmr.msra.gmra.mrb[4].mxu1 %vm360_vm1, %v308_v26  ;;  %1471 = vmatmul.mubr.msk.bf16.vlgmr.msra.gmra.mrb[8].mxu0 %vm360_vm1, %v520_v27  ;;  %v855_v26 = vpack.c.bf16 %v852_v24, %v852_v24  ;;  %v966_v27 = vpack.c.bf16 %v963_v25, %v963_v25 }
  0x35   : > { %1483 = vmatpush3.bf16.msra.mxu1 %v1632_v28  ;;  %1503 = vmatpush3.bf16.msra.mxu0 %v1633_v29 }
  0x36   : > { %1484 = vmatprep.subr.bf16.mxu1 %v1688_v0  ;;  %1454 = vmatprep.mubr.msk.bf16.mxu1 %vm1689_vm0, %v1688_v0 }
  0x37   : > { %1474 = vmatprep.mubr.msk.bf16.mxu0 %vm1689_vm0, %v1688_v0  ;;  %1504 = vmatprep.subr.bf16.mxu0 %v1688_v0 }
  0x39   : > { %1485 = vmatpush3.bf16.msra.mxu1 %v1634_v30  ;;  %1505 = vmatpush3.bf16.msra.mxu0 %v1635_v35 }
  0x3a   : > { %1486 = vmatprep.subr.bf16.mxu1 %v1688_v0  ;;  %1506 = vmatprep.subr.bf16.mxu0 %v1688_v0 }
  0x3c   : > { %1455 = vmatmul.mubr.msk.bf16.gmra.mrb[8].mxu1 %vm360_vm1, %v309_v36  ;;  %1475 = vmatmul.mubr.msk.bf16.gmra.mrb[12].mxu0 %vm360_vm1, %v521_v37 }
  0x3d   : > { %1487 = vmatpush3.bf16.msra.mxu1 %v1636_v38  ;;  %1458 = vmatprep.mubr.msk.bf16.mxu1 %vm1689_vm0, %v1688_v0 }
  0x3e   : > { %1478 = vmatprep.mubr.msk.bf16.mxu0 %vm1689_vm0, %v1688_v0  ;;  %1507 = vmatpush3.bf16.msra.mxu0 %v1637_v39 }
  0x3f   : > { %1488 = vmatprep.subr.bf16.mxu1 %v1688_v0  ;;  %1508 = vmatprep.subr.bf16.mxu0 %v1688_v0 }
  0x41   : > { %1489 = vmatpush3.bf16.msra.mxu1 %v1638_v43 }
  0x42   : > { %1509 = vmatpush3.bf16.msra.mxu0 %v1639_v46  ;;  %1522 = vmatprep.subr.bf16.mxu1 %v1688_v0 }
  0x43   : > { %1542 = vmatprep.subr.bf16.mxu0 %v1688_v0 }
  0x44   : > { %1459 = vmatmul.mubr.msk.bf16.gmra.mrb[12].mxu1 %vm360_vm1, %v310_v47  ;;  %1479 = vmatmul.mubr.msk.bf16.gmra.mrb[16].mxu0 %vm360_vm1, %v522_v48 }
  0x45   : > { %1490 = vmatprep.mubr.msk.bf16.mxu1 %vm1689_vm0, %v1688_v0  ;;  %1510 = vmatprep.mubr.msk.bf16.mxu0 %vm1689_vm0, %v1688_v0 }
  0x4c   : > { %1491 = vmatmul.mubr.msk.bf16.vlgmr.msra.gmra.mrb[16].mxu1 %vm360_vm1, %v631_v55  ;;  %1511 = vmatmul.mubr.msk.bf16.vlgmr.msra.gmra.mrb[20].mxu0 %vm360_vm1, %v742_v56 }
  0x4d   : > { %1523 = vmatpush3.bf16.msra.mxu1 %v1640_v57  ;;  %1543 = vmatpush3.bf16.msra.mxu0 %v1641_v58 }
  0x4e   : > { %1524 = vmatprep.subr.bf16.mxu1 %v1688_v0  ;;  %1494 = vmatprep.mubr.msk.bf16.mxu1 %vm1689_vm0, %v1688_v0 }
  0x4f   : > { %1514 = vmatprep.mubr.msk.bf16.mxu0 %vm1689_vm0, %v1688_v0  ;;  %1544 = vmatprep.subr.bf16.mxu0 %v1688_v0 }
  0x51   : > { %1525 = vmatpush3.bf16.msra.mxu1 %v1642_v59  ;;  %1545 = vmatpush3.bf16.msra.mxu0 %v1643_v1 }
  0x52   : > { %1526 = vmatprep.subr.bf16.mxu1 %v1688_v0  ;;  %1546 = vmatprep.subr.bf16.mxu0 %v1688_v0 }
  0x54   : > { %1495 = vmatmul.mubr.msk.bf16.gmra.mrb[20].mxu1 %vm360_vm1, %v632_v2  ;;  %1515 = vmatmul.mubr.msk.bf16.gmra.mrb[24].mxu0 %vm360_vm1, %v743_v3 }
  0x55   : > { %1527 = vmatpush3.bf16.msra.mxu1 %v1644_v4  ;;  %1498 = vmatprep.mubr.msk.bf16.mxu1 %vm1689_vm0, %v1688_v0 }
  0x56   : > { %1518 = vmatprep.mubr.msk.bf16.mxu0 %vm1689_vm0, %v1688_v0  ;;  %1547 = vmatpush3.bf16.msra.mxu0 %v1645_v5 }
  0x57   : > { %1528 = vmatprep.subr.bf16.mxu1 %v1688_v0  ;;  %1548 = vmatprep.subr.bf16.mxu0 %v1688_v0 }
  0x59   : > { %1529 = vmatpush3.bf16.msra.mxu1 %v1646_v8 }
  0x5a   : > { %1549 = vmatpush3.bf16.msra.mxu0 %v1647_v9 }
  0x5c   : > { %1499 = vmatmul.mubr.msk.bf16.gmra.mrb[24].mxu1 %vm360_vm1, %v633_v10  ;;  %1519 = vmatmul.mubr.msk.bf16.gmra.mrb[28].mxu0 %vm360_vm1, %v744_v11 }
  0x5d   : > { %1530 = vmatprep.mubr.msk.bf16.mxu1 %vm1689_vm0, %v1688_v0  ;;  %1550 = vmatprep.mubr.msk.bf16.mxu0 %vm1689_vm0, %v1688_v0 }
  0x64   : > { %1531 = vmatmul.mubr.msk.bf16.vlgmr.msra.gmra.mrb[28].mxu1 %vm360_vm1, %v853_v16  ;;  %1551 = vmatmul.mubr.msk.bf16.vlgmr.msra.gmra.mrb[32].mxu0 %vm360_vm1, %v964_v17 }
  0x65   : > { %1534 = vmatprep.mubr.msk.bf16.mxu1 %vm1689_vm0, %v1688_v0  ;;  %1554 = vmatprep.mubr.msk.bf16.mxu0 %vm1689_vm0, %v1688_v0 }
  0x6c   : > { %1535 = vmatmul.mubr.msk.bf16.gmra.mrb[32].mxu1 %vm360_vm1, %v854_v22  ;;  %1555 = vmatmul.mubr.msk.bf16.gmra.mrb[36].mxu0 %vm360_vm1, %v965_v23 }
  0x6d   : > { %1538 = vmatprep.mubr.msk.bf16.mxu1 %vm1689_vm0, %v1688_v0  ;;  %1558 = vmatprep.mubr.msk.bf16.mxu0 %vm1689_vm0, %v1688_v0 }
  0x74   : > { %1539 = vmatmul.mubr.msk.bf16.gmra.mrb[36].mxu1 %vm360_vm1, %v855_v26  ;;  %1559 = vmatmul.mubr.msk.bf16.gmra.mrb[40].mxu0 %vm360_vm1, %v966_v27 }
  0xf7   : > { %v404_v28 = vpop.f32.mrb[0].mxu0  ;;  %v420_v29 = vpop.f32.mrb[0].mxu1 }
  0xf8   : > { %v1432_v30 = vpop.f32.mrb[1].mxu0  ;;  %v1440_v31 = vpop.f32.mrb[1].mxu1 }
  0xf9   : > { %v407_v32 = vpop.f32.mrb[2].mxu0  ;;  %v423_v33 = vpop.f32.mrb[2].mxu1 }
  0xfa   : > { %v1433_v34 = vpop.f32.mrb[3].mxu0  ;;  %v1441_v35 = vpop.f32.mrb[3].mxu1 }
  0xff   : > { %v412_v36 = vpop.f32.mrb[4].mxu0 }
 0x100   : > { %v1436_v37 = vpop.f32.mrb[5].mxu0 }
 0x101   : > { %v415_v38 = vpop.f32.mrb[6].mxu0 }
 0x102   : > { %v1437_v0 = vpop.f32.mrb[7].mxu0 }
 0x107   : > { %v493_v39 = vpop.f32.mrb[4].mxu1  ;;  %v599_v40 = vpop.f32.mrb[8].mxu0 }
 0x108   : > { %v494_v41 = vadd.f32 %v493_v39, %v404_v28  ;;  %v1452_v42 = vpop.f32.mrb[5].mxu1  ;;  %v1472_v43 = vpop.f32.mrb[9].mxu0 }
 0x109   : > { %v496_v44 = vpop.f32.mrb[6].mxu1  ;;  %v602_v45 = vpop.f32.mrb[10].mxu0 }
 0x10a   : > { %v621_v46 = vadd.f32 %v599_v40, %v494_v41  ;;  %v497_v47 = vadd.f32 %v496_v44, %v407_v32  ;;  %v1453_v48 = vpop.f32.mrb[7].mxu1  ;;  %v1473_v49 = vpop.f32.mrb[11].mxu0 }
 0x10b   : > { %v1095_v43 = vpop.permute.xlu0 %1094  ;;  %v1370_v49 = vld [vmem:[%s283_s22] ss:$0 sm:$0xff] }
 0x10c   : > { %v622_v50 = vadd.f32 %v602_v45, %v497_v47 }
 0x10f   : > { %v501_v51 = vpop.f32.mrb[8].mxu1  ;;  %v607_v52 = vpop.f32.mrb[12].mxu0 }
 0x110   : > { %v502_v53 = vadd.f32 %v501_v51, %v412_v36  ;;  %v1456_v54 = vpop.f32.mrb[9].mxu1  ;;  %v1476_v55 = vpop.f32.mrb[13].mxu0 }
 0x111   : > { %v504_v56 = vpop.f32.mrb[10].mxu1  ;;  %v610_v57 = vpop.f32.mrb[14].mxu0 }
 0x112   : > { %v623_v58 = vadd.f32 %v607_v52, %v502_v53  ;;  %v505_v59 = vadd.f32 %v504_v56, %v415_v38  ;;  %v1457_v60 = vpop.f32.mrb[11].mxu1  ;;  %v1477_v61 = vpop.f32.mrb[15].mxu0 }
 0x113   : > { %v1100_v60 = vpop.permute.xlu0 %1099  ;;  %v1105_v61 = vpop.permute.xlu1 %1104 }
 0x114   : > { %v624_v62 = vadd.f32 %v610_v57, %v505_v59 }
 0x117   : > { %v509_v63 = vpop.f32.mrb[12].mxu1  ;;  %v615_v1 = vpop.f32.mrb[16].mxu0 }
 0x118   : > { %v510_v2 = vadd.f32 %v509_v63, %v420_v29  ;;  %v1460_v3 = vpop.f32.mrb[13].mxu1  ;;  %v1480_v4 = vpop.f32.mrb[17].mxu0 }
 0x119   : > { %v512_v5 = vpop.f32.mrb[14].mxu1  ;;  %v618_v6 = vpop.f32.mrb[18].mxu0 }
 0x11a   : > { %v625_v7 = vadd.f32 %v615_v1, %v510_v2  ;;  %v1461_v8 = vpop.f32.mrb[15].mxu1  ;;  %v1481_v9 = vpop.f32.mrb[19].mxu0 }
 0x11f   : > { %v710_v10 = vpop.f32.mrb[16].mxu1  ;;  %v821_v11 = vpop.f32.mrb[20].mxu0 }
 0x120   : > { %v732_v12 = vadd.f32 %v710_v10, %v621_v46  ;;  %v1492_v13 = vpop.f32.mrb[17].mxu1  ;;  %v1512_v14 = vpop.f32.mrb[21].mxu0 }
 0x121   : > { %v713_v15 = vpop.f32.mrb[18].mxu1  ;;  %v824_v16 = vpop.f32.mrb[22].mxu0 }
 0x122   : > { %v843_v17 = vadd.f32 %v821_v11, %v732_v12  ;;  %v733_v18 = vadd.f32 %v713_v15, %v622_v50  ;;  %v1493_v19 = vpop.f32.mrb[19].mxu1  ;;  %v1513_v20 = vpop.f32.mrb[23].mxu0 }
 0x124   : > { %v844_v21 = vadd.f32 %v824_v16, %v733_v18 }
 0x127   : > { %v718_v22 = vpop.f32.mrb[20].mxu1  ;;  %v829_v23 = vpop.f32.mrb[24].mxu0 }
 0x128   : > { %v734_v24 = vadd.f32 %v718_v22, %v623_v58  ;;  %v1496_v25 = vpop.f32.mrb[21].mxu1  ;;  %v1516_v26 = vpop.f32.mrb[25].mxu0 }
 0x129   : > { %v721_v27 = vpop.f32.mrb[22].mxu1  ;;  %v832_v28 = vpop.f32.mrb[26].mxu0 }
 0x12a   : > { %v845_v29 = vadd.f32 %v829_v23, %v734_v24  ;;  %v735_v30 = vadd.f32 %v721_v27, %v624_v62  ;;  %v1497_v31 = vpop.f32.mrb[23].mxu1  ;;  %v1517_v32 = vpop.f32.mrb[27].mxu0 }
 0x12c   : > { %v846_v33 = vadd.f32 %v832_v28, %v735_v30 }
 0x12f   : > { %v726_v34 = vpop.f32.mrb[24].mxu1  ;;  %v837_v35 = vpop.f32.mrb[28].mxu0 }
 0x130   : > { %v736_v36 = vadd.f32 %v726_v34, %v625_v7  ;;  %v1500_v37 = vpop.f32.mrb[25].mxu1  ;;  %v1520_v38 = vpop.f32.mrb[29].mxu0 }
 0x131   : > { %v729_v0 = vpop.f32.mrb[26].mxu1  ;;  %v840_v39 = vpop.f32.mrb[30].mxu0 }
 0x132   : > { %v847_v40 = vadd.f32 %v837_v35, %v736_v36  ;;  %v1501_v41 = vpop.f32.mrb[27].mxu1  ;;  %v1521_v42 = vpop.f32.mrb[31].mxu0 }
 0x137   : > { %v932_v44 = vpop.f32.mrb[28].mxu1  ;;  %v1043_v45 = vpop.f32.mrb[32].mxu0 }
 0x138   : > { %v954_v46 = vadd.f32 %v932_v44, %v843_v17  ;;  %v1532_v47 = vpop.f32.mrb[29].mxu1  ;;  %v1552_v48 = vpop.f32.mrb[33].mxu0 }
 0x139   : > { %v935_v50 = vpop.f32.mrb[30].mxu1  ;;  %v1046_v51 = vpop.f32.mrb[34].mxu0 }
 0x13a   : > { %v1065_v52 = vadd.f32 %v1043_v45, %v954_v46  ;;  %v955_v53 = vadd.f32 %v935_v50, %v844_v21  ;;  %v1533_v54 = vpop.f32.mrb[31].mxu1  ;;  %v1553_v55 = vpop.f32.mrb[35].mxu0 }
 0x13b   : > { %v1110_v17 = vpop.permute.xlu1 %1109 }
 0x13c   : > { %v1077_v56 = vadd.f32 %v1370_v49, %v1065_v52  ;;  %v1066_v57 = vadd.f32 %v1046_v51, %v955_v53 }
 0x13e   : > { %v1078_v58 = vadd.f32 %v1370_v49, %v1066_v57  ;;  %v1082_v59 = vmax.f32 %v1077_v56, 0.0 }
 0x13f   : > { %v940_v62 = vpop.f32.mrb[32].mxu1  ;;  %v1051_v63 = vpop.f32.mrb[36].mxu0 }
 0x140   : > { %v1117_v1 = vmul.f32 %v1095_v43, %v1082_v59  ;;  %v956_v2 = vadd.f32 %v940_v62, %v845_v29  ;;  %v1536_v3 = vpop.f32.mrb[33].mxu1  ;;  %v1556_v4 = vpop.f32.mrb[37].mxu0  ;;  %v1083_v5 = vmax.f32 %v1078_v58, 0.0 }
 0x141   : > { %v943_v6 = vpop.f32.mrb[34].mxu1  ;;  %v1054_v7 = vpop.f32.mrb[38].mxu0 }
 0x142   : > { %1122 = vst [vmem:[%s1947_s24] sm:$0xff] %v1117_v1  ;;  %v1067_v8 = vadd.f32 %v1051_v63, %v956_v2  ;;  %v1118_v9 = vmul.f32 %v1100_v60, %v1083_v5  ;;  %v957_v10 = vadd.f32 %v943_v6, %v846_v33  ;;  %v1537_v11 = vpop.f32.mrb[35].mxu1  ;;  %v1557_v12 = vpop.f32.mrb[39].mxu0 }
 0x143   : > { %v1115_v33 = vpop.permute.xlu0 %1114 }
 0x144   : > { %v1079_v13 = vadd.f32 %v1370_v49, %v1067_v8  ;;  %1123 = vst [vmem:[%s1947_s24 + $0x8] sm:$0xff] %v1118_v9  ;;  %v1068_v14 = vadd.f32 %v1054_v7, %v957_v10 }
 0x146   : > { %v1080_v15 = vadd.f32 %v1370_v49, %v1068_v14  ;;  %v1084_v16 = vmax.f32 %v1079_v13, 0.0 }
 0x147   : > { %v948_v18 = vpop.f32.mrb[36].mxu1  ;;  %v1059_v19 = vpop.f32.mrb[40].mxu0 }
 0x148   : > { %v1119_v20 = vmul.f32 %v1105_v61, %v1084_v16  ;;  %v958_v21 = vadd.f32 %v948_v18, %v847_v40  ;;  %v1540_v22 = vpop.f32.mrb[37].mxu1  ;;  %v1560_v23 = vpop.f32.mrb[41].mxu0  ;;  %v1085_v24 = vmax.f32 %v1080_v15, 0.0 }
 0x149   : > { %v951_v25 = vpop.f32.mrb[38].mxu1  ;;  %v1062_v26 = vpop.f32.mrb[42].mxu0 }
 0x14a   : > { %1124 = vst [vmem:[%s1947_s24 + $0x10] sm:$0xff] %v1119_v20  ;;  %v1069_v27 = vadd.f32 %v1059_v19, %v958_v21  ;;  %v1120_v28 = vmul.f32 %v1110_v17, %v1085_v24  ;;  %v1541_v29 = vpop.f32.mrb[39].mxu1  ;;  %v1561_v30 = vpop.f32.mrb[43].mxu0 }
 0x14c   : > { %v1081_v31 = vadd.f32 %v1370_v49, %v1069_v27  ;;  %1125 = vst [vmem:[%s1947_s24 + $0x18] sm:$0xff] %v1120_v28 }
 0x14e   : > { %v1086_v32 = vmax.f32 %v1081_v31, 0.0 }
 0x150   : > { %v1121_v34 = vmul.f32 %v1115_v33, %v1086_v32 }
 0x152   : > { %1126 = vst [vmem:[%s1947_s24 + $0x20] sm:$0xff] %v1121_v34 }
 0x153 PF: > { %s14_s19 = sadd.s32 1, %s1686_s19   ;;  %s1974_s15 = smov %s1678_s17 }
 0x154   : > { %p11_p7 = scmp.ge.s32.totalorder %s14_s19, 20   ;;  %s1975_s16 = smov %s1682_s18 }
 0x155   : > { %s1976_s17 = smov %s1979_s20  ;;  %s1977_s18 = smov %s1983_s21 }
 0x156   :  { %13 = sbr.rel (!%p11_p7) target bundleno = 3 (0x3), region = 81 }

// kernel: mynet_forward.6
= control target key start
LH: loop header
LB: loop body
LE: loop exit
PB: predicated region body
PF: predicated region fallthrough
CT: control target
= control target key end

     0   :  { %vm2737_vm0 = vcmask 261120   ;;  %s4469_s1 = inlined_call_operand.vmem [shape: bf16[3840,32], index: 1, kind: input, shape index: {}]   ;;  %s4470_s0 = inlined_call_operand.vmem [shape: bf16[16,3840], index: 0, kind: input, shape index: {}]   ;;  %s4471_s2 = inlined_call_operand.vmem [shape: f32[1,32], index: 2, kind: input, shape index: {}]   ;;  %s4472_s3 = inlined_call_operand.vmem [shape: f32[16,32], index: 3, kind: output, shape index: {}]  }
   0x1   :  { %v3345_v0 = vld [vmem:[%s4469_s1 + $0x40] sm:$0xff]   ;;  %v3349_v4 = vld [vmem:[%s4469_s1 + $0x48] sm:$0xff]   ;;  %v3353_v8 = vld [vmem:[%s4469_s1 + $0x50] sm:$0xff]  }
   0x2   :  { %v3346_v1 = vld [vmem:[%s4469_s1] sm:$0xff]   ;;  %3015 = vmatprep.subr.bf16.mxu0 %v3345_v0  ;;  %v3350_v5 = vld [vmem:[%s4469_s1 + $0x8] sm:$0xff]   ;;  %v3354_v9 = vld [vmem:[%s4469_s1 + $0x10] sm:$0xff]  }
   0x3   :  { %v3347_v2 = vld [vmem:[%s4469_s1 + $0xc0] sm:$0xff]   ;;  %3016 = vmatpush3.bf16.msra.mxu0 %v3346_v1  ;;  %v3351_v6 = vld [vmem:[%s4469_s1 + $0xc8] sm:$0xff]   ;;  %v3355_v10 = vld [vmem:[%s4469_s1 + $0xd0] sm:$0xff]  }
   0x4   :  { %v3348_v3 = vld [vmem:[%s4469_s1 + $0x80] sm:$0xff]   ;;  %3037 = vmatprep.subr.bf16.mxu1 %v3347_v2  ;;  %3017 = vmatprep.subr.bf16.mxu0 %v3349_v4  ;;  %v3352_v7 = vld [vmem:[%s4469_s1 + $0x88] sm:$0xff]   ;;  %v3356_v11 = vld [vmem:[%s4469_s1 + $0x90] sm:$0xff]  }
   0x5   :  { %3038 = vmatpush3.bf16.msra.mxu1 %v3348_v3  ;;  %v3357_v12 = vld [vmem:[%s4469_s1 + $0x58] sm:$0xff]   ;;  %v3361_v16 = vld [vmem:[%s4469_s1 + $0x60] sm:$0xff]   ;;  %v3365_v20 = vld [vmem:[%s4469_s1 + $0x68] sm:$0xff]  }
   0x6   :  { %3039 = vmatprep.subr.bf16.mxu1 %v3351_v6  ;;  %v3358_v13 = vld [vmem:[%s4469_s1 + $0x18] sm:$0xff]   ;;  %v3362_v17 = vld [vmem:[%s4469_s1 + $0x20] sm:$0xff]   ;;  %v3366_v21 = vld [vmem:[%s4469_s1 + $0x28] sm:$0xff]  }
   0x7   :  { %3018 = vmatpush3.bf16.msra.mxu0 %v3350_v5  ;;  %v3359_v14 = vld [vmem:[%s4469_s1 + $0xd8] sm:$0xff]   ;;  %v3363_v18 = vld [vmem:[%s4469_s1 + $0xe0] sm:$0xff]   ;;  %v3367_v22 = vld [vmem:[%s4469_s1 + $0xe8] sm:$0xff]  }
   0x8   :  { %3019 = vmatprep.subr.bf16.mxu0 %v3353_v8  ;;  %v3360_v15 = vld [vmem:[%s4469_s1 + $0x98] sm:$0xff]   ;;  %v3364_v19 = vld [vmem:[%s4469_s1 + $0xa0] sm:$0xff]   ;;  %v3368_v23 = vld [vmem:[%s4469_s1 + $0xa8] sm:$0xff]  }
   0x9   :  { %3040 = vmatpush3.bf16.msra.mxu1 %v3352_v7  ;;  %v3369_v24 = vld [vmem:[%s4469_s1 + $0x70] sm:$0xff]   ;;  %v3373_v28 = vld [vmem:[%s4469_s1 + $0x78] sm:$0xff]   ;;  %v3380_v34 = vld [vmem:[%s4469_s1 + $0x140] sm:$0xff]  }
   0xa   :  { %3041 = vmatprep.subr.bf16.mxu1 %v3355_v10  ;;  %v3370_v25 = vld [vmem:[%s4469_s1 + $0x30] sm:$0xff]   ;;  %v3374_v29 = vld [vmem:[%s4469_s1 + $0x38] sm:$0xff]   ;;  %v3381_v35 = vld [vmem:[%s4470_s0 + $0x8] ss:$120 sps:$4 sm:$0xff]  }
   0xb   :  { %3020 = vmatpush3.bf16.msra.mxu0 %v3354_v9  ;;  %v3371_v26 = vld [vmem:[%s4469_s1 + $0xf0] sm:$0xff]   ;;  %v3375_v30 = vld [vmem:[%s4469_s1 + $0xf8] sm:$0xff]   ;;  %v3383_v36 = vld [vmem:[%s4470_s0 + $0xc] ss:$120 sps:$4 sm:$0xff]  }
   0xc   :  { %3021 = vmatprep.subr.bf16.mxu0 %v3357_v12  ;;  %v3372_v27 = vld [vmem:[%s4469_s1 + $0xb0] sm:$0xff]   ;;  %v3376_v31 = vld [vmem:[%s4470_s0] ss:$120 sps:$4 sm:$0xff]   ;;  %v3378_v32 = vld [vmem:[%s4470_s0 + $0x4] ss:$120 sps:$4 sm:$0xff]   ;;  %2195 = vmatprep.mubr.bf16.mxu1 %v3383_v36 }
   0xd   :  { %3042 = vmatpush3.bf16.msra.mxu1 %v3356_v11  ;;  %v3379_v33 = vld [vmem:[%s4469_s1 + $0xb8] sm:$0xff]   ;;  %2154 = vmatprep.mubr.bf16.mxu0 %v3378_v32  ;;  %v3384_v37 = vld [vmem:[%s4469_s1 + $0x100] sm:$0xff]   ;;  %v3387_v40 = vld [vmem:[%s4469_s1 + $0x148] sm:$0xff]  }
   0xe   :  { %3043 = vmatprep.subr.bf16.mxu1 %v3359_v14  ;;  %v3385_v38 = vld [vmem:[%s4469_s1 + $0x1c0] sm:$0xff]   ;;  %v3388_v41 = vld [vmem:[%s4469_s1 + $0x108] sm:$0xff]   ;;  %v3391_v44 = vld [vmem:[%s4469_s1 + $0x150] sm:$0xff]  }
   0xf   :  { %3022 = vmatpush3.bf16.msra.mxu0 %v3358_v13  ;;  %v3386_v39 = vld [vmem:[%s4469_s1 + $0x180] sm:$0xff]   ;;  %v3389_v42 = vld [vmem:[%s4469_s1 + $0x1c8] sm:$0xff]   ;;  %v3392_v45 = vld [vmem:[%s4469_s1 + $0x110] sm:$0xff]  }
  0x10   :  { %3023 = vmatprep.subr.bf16.mxu0 %v3361_v16  ;;  %v3390_v43 = vld [vmem:[%s4469_s1 + $0x188] sm:$0xff]   ;;  %v3393_v46 = vld [vmem:[%s4469_s1 + $0x1d0] sm:$0xff]   ;;  %v3395_v48 = vld [vmem:[%s4469_s1 + $0x158] sm:$0xff]  }
  0x11   :  { %3044 = vmatpush3.bf16.msra.mxu1 %v3360_v15  ;;  %v3394_v47 = vld [vmem:[%s4469_s1 + $0x190] sm:$0xff]   ;;  %v3396_v49 = vld [vmem:[%s4469_s1 + $0x118] sm:$0xff]   ;;  %v3399_v52 = vld [vmem:[%s4469_s1 + $0x160] sm:$0xff]  }
  0x12   :  { %3045 = vmatprep.subr.bf16.mxu1 %v3363_v18  ;;  %v3397_v50 = vld [vmem:[%s4469_s1 + $0x1d8] sm:$0xff]   ;;  %v3400_v53 = vld [vmem:[%s4469_s1 + $0x120] sm:$0xff]   ;;  %v3403_v56 = vld [vmem:[%s4469_s1 + $0x168] sm:$0xff]  }
  0x13   :  { %3024 = vmatpush3.bf16.msra.mxu0 %v3362_v17  ;;  %v3398_v51 = vld [vmem:[%s4469_s1 + $0x198] sm:$0xff]   ;;  %v3401_v54 = vld [vmem:[%s4469_s1 + $0x1e0] sm:$0xff]   ;;  %v3404_v57 = vld [vmem:[%s4469_s1 + $0x128] sm:$0xff]  }
  0x14   :  { %3025 = vmatprep.subr.bf16.mxu0 %v3365_v20  ;;  %v3402_v55 = vld [vmem:[%s4469_s1 + $0x1a0] sm:$0xff]   ;;  %v3405_v58 = vld [vmem:[%s4469_s1 + $0x1e8] sm:$0xff]   ;;  %v3407_v60 = vld [vmem:[%s4469_s1 + $0x170] sm:$0xff]  }
  0x15   :  { %3046 = vmatpush3.bf16.msra.mxu1 %v3364_v19  ;;  %v3406_v59 = vld [vmem:[%s4469_s1 + $0x1a8] sm:$0xff]   ;;  %v3408_v61 = vld [vmem:[%s4469_s1 + $0x130] sm:$0xff]   ;;  %v3411_v0 = vld [vmem:[%s4469_s1 + $0x178] sm:$0xff]  }
  0x16   :  { %3047 = vmatprep.subr.bf16.mxu1 %v3367_v22  ;;  %v3409_v62 = vld [vmem:[%s4469_s1 + $0x1f0] sm:$0xff]   ;;  %v3412_v1 = vld [vmem:[%s4469_s1 + $0x138] sm:$0xff]   ;;  %v3418_v6 = vld [vmem:[%s4469_s1 + $0x240] sm:$0xff]  }
  0x17   :  { %3026 = vmatpush3.bf16.msra.mxu0 %v3366_v21  ;;  %v3410_v63 = vld [vmem:[%s4469_s1 + $0x1b0] sm:$0xff]   ;;  %v3413_v2 = vld [vmem:[%s4469_s1 + $0x1f8] sm:$0xff]   ;;  %v3422_v9 = vld [vmem:[%s4469_s1 + $0x200] sm:$0xff]  }
  0x18   :  { %3027 = vmatprep.subr.bf16.mxu0 %v3369_v24  ;;  %v3414_v3 = vld [vmem:[%s4470_s0 + $0x10] ss:$120 sps:$4 sm:$0xff]   ;;  %v3416_v4 = vld [vmem:[%s4470_s0 + $0x14] ss:$120 sps:$4 sm:$0xff]   ;;  %v3417_v5 = vld [vmem:[%s4469_s1 + $0x1b8] sm:$0xff]  }
  0x19   :  { %3048 = vmatpush3.bf16.msra.mxu1 %v3368_v23  ;;  %v3419_v7 = vld [vmem:[%s4470_s0 + $0x18] ss:$120 sps:$4 sm:$0xff]   ;;  %v3421_v8 = vld [vmem:[%s4470_s0 + $0x1c] ss:$120 sps:$4 sm:$0xff]   ;;  %v3423_v10 = vld [vmem:[%s4469_s1 + $0x2c0] sm:$0xff]  }
  0x1a   :  { %3049 = vmatprep.subr.bf16.mxu1 %v3371_v26  ;;  %v3424_v11 = vld [vmem:[%s4469_s1 + $0x280] sm:$0xff]   ;;  %v3425_v12 = vld [vmem:[%s4469_s1 + $0x248] sm:$0xff]   ;;  %v3429_v16 = vld [vmem:[%s4469_s1 + $0x250] sm:$0xff]  }
  0x1b   :  { %3028 = vmatpush3.bf16.msra.mxu0 %v3370_v25  ;;  %v3426_v13 = vld [vmem:[%s4469_s1 + $0x208] sm:$0xff]   ;;  %v3430_v17 = vld [vmem:[%s4469_s1 + $0x210] sm:$0xff]   ;;  %v3433_v20 = vld [vmem:[%s4469_s1 + $0x258] sm:$0xff]  }
  0x1c   :  { %3029 = vmatprep.subr.bf16.mxu0 %v3373_v28  ;;  %v3427_v14 = vld [vmem:[%s4469_s1 + $0x2c8] sm:$0xff]   ;;  %v3431_v18 = vld [vmem:[%s4469_s1 + $0x2d0] sm:$0xff]   ;;  %v3434_v21 = vld [vmem:[%s4469_s1 + $0x218] sm:$0xff]  }
  0x1d   :  { %3050 = vmatpush3.bf16.msra.mxu1 %v3372_v27  ;;  %v3428_v15 = vld [vmem:[%s4469_s1 + $0x288] sm:$0xff]   ;;  %v3432_v19 = vld [vmem:[%s4469_s1 + $0x290] sm:$0xff]   ;;  %v3435_v22 = vld [vmem:[%s4469_s1 + $0x2d8] sm:$0xff]  }
  0x1e   :  { %3051 = vmatprep.subr.bf16.mxu1 %v3375_v30  ;;  %v3436_v23 = vld [vmem:[%s4469_s1 + $0x298] sm:$0xff]   ;;  %v3437_v24 = vld [vmem:[%s4469_s1 + $0x260] sm:$0xff]   ;;  %v3441_v28 = vld [vmem:[%s4469_s1 + $0x268] sm:$0xff]  }
  0x1f   :  { %3030 = vmatpush3.bf16.msra.mxu0 %v3374_v29  ;;  %v3438_v25 = vld [vmem:[%s4469_s1 + $0x220] sm:$0xff]   ;;  %v3442_v29 = vld [vmem:[%s4469_s1 + $0x228] sm:$0xff]   ;;  %v3445_v32 = vld [vmem:[%s4469_s1 + $0x270] sm:$0xff]  }
  0x20   :  { %3059 = vmatprep.subr.bf16.mxu0 %v3380_v34  ;;  %v3439_v26 = vld [vmem:[%s4469_s1 + $0x2e0] sm:$0xff]   ;;  %v3443_v30 = vld [vmem:[%s4469_s1 + $0x2e8] sm:$0xff]   ;;  %v3447_v34 = vld [vmem:[%s4469_s1 + $0x2f0] sm:$0xff]  }
  0x21   :  { %3052 = vmatpush3.bf16.msra.mxu1 %v3379_v33  ;;  %v3440_v27 = vld [vmem:[%s4469_s1 + $0x2a0] sm:$0xff]   ;;  %v3446_v33 = vld [vmem:[%s4469_s1 + $0x230] sm:$0xff]   ;;  %v3449_v36 = vld [vmem:[%s4469_s1 + $0x278] sm:$0xff]  }
  0x22   :  { %2155 = vmatmul.mubr.bf16.vlgmr.msra.gmra.mrb[0].mxu0 %v3376_v31  ;;  %3081 = vmatprep.subr.bf16.mxu1 %v3385_v38  ;;  %v3444_v31 = vld [vmem:[%s4469_s1 + $0x2a8] sm:$0xff]   ;;  %v3451_v38 = vld [vmem:[%s4469_s1 + $0x2f8] sm:$0xff]  }
  0x23   :  { %3060 = vmatpush3.bf16.msra.mxu0 %v3384_v37  ;;  %2236 = vmatprep.mubr.bf16.mxu0 %v3416_v4  ;;  %v3450_v37 = vld [vmem:[%s4469_s1 + $0x238] sm:$0xff]   ;;  %v3483_v4 = vld [vmem:[%s4469_s1 + $0x370] sm:$0xff]  }
  0x24   :  { %2196 = vmatmul.mubr.bf16.vlgmr.msra.gmra.mrb[0].mxu1 %v3381_v35  ;;  %3061 = vmatprep.subr.bf16.mxu0 %v3387_v40  ;;  %v3448_v35 = vld [vmem:[%s4469_s1 + $0x2b0] sm:$0xff]   ;;  %v3454_v40 = vld [vmem:[%s4470_s0 + $0x24] ss:$120 sps:$4 sm:$0xff]  }
  0x25   :  { %3082 = vmatpush3.bf16.msra.mxu1 %v3386_v39  ;;  %2277 = vmatprep.mubr.bf16.mxu1 %v3421_v8  ;;  %v3452_v39 = vld [vmem:[%s4470_s0 + $0x20] ss:$120 sps:$4 sm:$0xff]  }
  0x26   :  { %3083 = vmatprep.subr.bf16.mxu1 %v3389_v42  ;;  %v3456_v42 = vld [vmem:[%s4469_s1 + $0x340] sm:$0xff]   ;;  %v3487_v8 = vld [vmem:[%s4469_s1 + $0x378] sm:$0xff]  }
  0x27   :  { %3062 = vmatpush3.bf16.msra.mxu0 %v3388_v41  ;;  %v3455_v41 = vld [vmem:[%s4469_s1 + $0x2b8] sm:$0xff]  }
  0x28   :  { %3063 = vmatprep.subr.bf16.mxu0 %v3391_v44  ;;  %v3459_v44 = vld [vmem:[%s4470_s0 + $0x2c] ss:$120 sps:$4 sm:$0xff]  }
  0x29   :  { %3084 = vmatpush3.bf16.msra.mxu1 %v3390_v43  ;;  %v3457_v43 = vld [vmem:[%s4470_s0 + $0x28] ss:$120 sps:$4 sm:$0xff]  }
  0x2a   :  { %3085 = vmatprep.subr.bf16.mxu1 %v3393_v46  ;;  %v3461_v46 = vld [vmem:[%s4469_s1 + $0x3c0] sm:$0xff]  }
  0x2b   :  { %3064 = vmatpush3.bf16.msra.mxu0 %v3392_v45  ;;  %v3460_v45 = vld [vmem:[%s4469_s1 + $0x300] sm:$0xff]  }
  0x2c   :  { %3065 = vmatprep.subr.bf16.mxu0 %v3395_v48  ;;  %v3463_v48 = vld [vmem:[%s4469_s1 + $0x348] sm:$0xff]  }
  0x2d   :  { %3086 = vmatpush3.bf16.msra.mxu1 %v3394_v47  ;;  %v3462_v47 = vld [vmem:[%s4469_s1 + $0x380] sm:$0xff]  }
  0x2e   :  { %3087 = vmatprep.subr.bf16.mxu1 %v3397_v50  ;;  %v3465_v50 = vld [vmem:[%s4469_s1 + $0x3c8] sm:$0xff]  }
  0x2f   :  { %3066 = vmatpush3.bf16.msra.mxu0 %v3396_v49  ;;  %v3464_v49 = vld [vmem:[%s4469_s1 + $0x308] sm:$0xff]  }
  0x30   :  { %3067 = vmatprep.subr.bf16.mxu0 %v3399_v52  ;;  %v3467_v52 = vld [vmem:[%s4469_s1 + $0x350] sm:$0xff]  }
  0x31   :  { %3088 = vmatpush3.bf16.msra.mxu1 %v3398_v51  ;;  %v3466_v51 = vld [vmem:[%s4469_s1 + $0x388] sm:$0xff]  }
  0x32   :  { %3089 = vmatprep.subr.bf16.mxu1 %v3401_v54  ;;  %v3469_v54 = vld [vmem:[%s4469_s1 + $0x3d0] sm:$0xff]  }
  0x33   :  { %3068 = vmatpush3.bf16.msra.mxu0 %v3400_v53  ;;  %v3468_v53 = vld [vmem:[%s4469_s1 + $0x310] sm:$0xff]  }
  0x34   :  { %3069 = vmatprep.subr.bf16.mxu0 %v3403_v56  ;;  %v3471_v56 = vld [vmem:[%s4469_s1 + $0x358] sm:$0xff]  }
  0x35   :  { %3090 = vmatpush3.bf16.msra.mxu1 %v3402_v55  ;;  %v3470_v55 = vld [vmem:[%s4469_s1 + $0x390] sm:$0xff]  }
  0x36   :  { %3091 = vmatprep.subr.bf16.mxu1 %v3405_v58  ;;  %v3473_v58 = vld [vmem:[%s4469_s1 + $0x3d8] sm:$0xff]  }
  0x37   :  { %3070 = vmatpush3.bf16.msra.mxu0 %v3404_v57  ;;  %v3472_v57 = vld [vmem:[%s4469_s1 + $0x318] sm:$0xff]  }
  0x38   :  { %3071 = vmatprep.subr.bf16.mxu0 %v3407_v60  ;;  %v3475_v60 = vld [vmem:[%s4469_s1 + $0x360] sm:$0xff]  }
  0x39   :  { %3092 = vmatpush3.bf16.msra.mxu1 %v3406_v59  ;;  %v3474_v59 = vld [vmem:[%s4469_s1 + $0x398] sm:$0xff]  }
  0x3a   :  { %3093 = vmatprep.subr.bf16.mxu1 %v3409_v62  ;;  %v3477_v62 = vld [vmem:[%s4469_s1 + $0x3e0] sm:$0xff]  }
  0x3b   :  { %3072 = vmatpush3.bf16.msra.mxu0 %v3408_v61  ;;  %v3476_v61 = vld [vmem:[%s4469_s1 + $0x320] sm:$0xff]  }
  0x3c   :  { %3073 = vmatprep.subr.bf16.mxu0 %v3411_v0  ;;  %v3479_v0 = vld [vmem:[%s4469_s1 + $0x368] sm:$0xff]  }
  0x3d   :  { %3094 = vmatpush3.bf16.msra.mxu1 %v3410_v63  ;;  %v3478_v63 = vld [vmem:[%s4469_s1 + $0x3a0] sm:$0xff]  }
  0x3e   :  { %3095 = vmatprep.subr.bf16.mxu1 %v3413_v2  ;;  %v3481_v2 = vld [vmem:[%s4469_s1 + $0x3e8] sm:$0xff]  }
  0x3f   :  { %3074 = vmatpush3.bf16.msra.mxu0 %v3412_v1  ;;  %v3480_v1 = vld [vmem:[%s4469_s1 + $0x328] sm:$0xff]  }
  0x40   :  { %3103 = vmatprep.subr.bf16.mxu0 %v3418_v6  ;;  %v3485_v6 = vld [vmem:[%s4469_s1 + $0x3f0] sm:$0xff]  }
  0x41   :  { %3096 = vmatpush3.bf16.msra.mxu1 %v3417_v5  ;;  %v3484_v5 = vld [vmem:[%s4469_s1 + $0x330] sm:$0xff]  }
  0x42   :  { %2237 = vmatmul.mubr.bf16.vlgmr.msra.gmra.mrb[4].mxu0 %v3414_v3  ;;  %3125 = vmatprep.subr.bf16.mxu1 %v3423_v10  ;;  %v3482_v3 = vld [vmem:[%s4469_s1 + $0x3a8] sm:$0xff]   ;;  %v3489_v10 = vld [vmem:[%s4469_s1 + $0x3f8] sm:$0xff]  }
  0x43   :  { %3104 = vmatpush3.bf16.msra.mxu0 %v3422_v9  ;;  %2318 = vmatprep.mubr.bf16.mxu0 %v3454_v40  ;;  %v3488_v9 = vld [vmem:[%s4469_s1 + $0x338] sm:$0xff]   ;;  %v3521_v40 = vld [vmem:[%s4469_s1 + $0x470] sm:$0xff]  }
  0x44   :  { %2278 = vmatmul.mubr.bf16.vlgmr.msra.gmra.mrb[4].mxu1 %v3419_v7  ;;  %3105 = vmatprep.subr.bf16.mxu0 %v3425_v12  ;;  %v3486_v7 = vld [vmem:[%s4469_s1 + $0x3b0] sm:$0xff]  }
  0x45   :  { %3126 = vmatpush3.bf16.msra.mxu1 %v3424_v11  ;;  %2359 = vmatprep.mubr.bf16.mxu1 %v3459_v44  ;;  %v3490_v11 = vld [vmem:[%s4470_s0 + $0x30] ss:$120 sps:$4 sm:$0xff]   ;;  %v3492_v12 = vld [vmem:[%s4470_s0 + $0x34] ss:$120 sps:$4 sm:$0xff]   ;;  %v3525_v44 = vld [vmem:[%s4469_s1 + $0x478] sm:$0xff]  }
  0x46   :  { %3127 = vmatprep.subr.bf16.mxu1 %v3427_v14  ;;  %v3494_v14 = vld [vmem:[%s4469_s1 + $0x440] sm:$0xff]  }
  0x47   :  { %3106 = vmatpush3.bf16.msra.mxu0 %v3426_v13  ;;  %v3493_v13 = vld [vmem:[%s4469_s1 + $0x3b8] sm:$0xff]  }
  0x48   :  { %3107 = vmatprep.subr.bf16.mxu0 %v3429_v16  ;;  %v3497_v16 = vld [vmem:[%s4470_s0 + $0x3c] ss:$120 sps:$4 sm:$0xff]  }
  0x49   :  { %3128 = vmatpush3.bf16.msra.mxu1 %v3428_v15  ;;  %v3495_v15 = vld [vmem:[%s4470_s0 + $0x38] ss:$120 sps:$4 sm:$0xff]  }
  0x4a   :  { %3129 = vmatprep.subr.bf16.mxu1 %v3431_v18  ;;  %v3499_v18 = vld [vmem:[%s4469_s1 + $0x4c0] sm:$0xff]  }
  0x4b   :  { %3108 = vmatpush3.bf16.msra.mxu0 %v3430_v17  ;;  %v3498_v17 = vld [vmem:[%s4469_s1 + $0x400] sm:$0xff]  }
  0x4c   :  { %3109 = vmatprep.subr.bf16.mxu0 %v3433_v20  ;;  %v3501_v20 = vld [vmem:[%s4469_s1 + $0x448] sm:$0xff]  }
  0x4d   :  { %3130 = vmatpush3.bf16.msra.mxu1 %v3432_v19  ;;  %v3500_v19 = vld [vmem:[%s4469_s1 + $0x480] sm:$0xff]  }
  0x4e   :  { %3131 = vmatprep.subr.bf16.mxu1 %v3435_v22  ;;  %v3503_v22 = vld [vmem:[%s4469_s1 + $0x4c8] sm:$0xff]  }
  0x4f   :  { %3110 = vmatpush3.bf16.msra.mxu0 %v3434_v21  ;;  %v3502_v21 = vld [vmem:[%s4469_s1 + $0x408] sm:$0xff]  }
  0x50   :  { %3111 = vmatprep.subr.bf16.mxu0 %v3437_v24  ;;  %v3505_v24 = vld [vmem:[%s4469_s1 + $0x450] sm:$0xff]  }
  0x51   :  { %3132 = vmatpush3.bf16.msra.mxu1 %v3436_v23  ;;  %v3504_v23 = vld [vmem:[%s4469_s1 + $0x488] sm:$0xff]  }
  0x52   :  { %3133 = vmatprep.subr.bf16.mxu1 %v3439_v26  ;;  %v3507_v26 = vld [vmem:[%s4469_s1 + $0x4d0] sm:$0xff]  }
  0x53   :  { %3112 = vmatpush3.bf16.msra.mxu0 %v3438_v25  ;;  %v3506_v25 = vld [vmem:[%s4469_s1 + $0x410] sm:$0xff]  }
  0x54   :  { %3113 = vmatprep.subr.bf16.mxu0 %v3441_v28  ;;  %v3509_v28 = vld [vmem:[%s4469_s1 + $0x458] sm:$0xff]  }
  0x55   :  { %3134 = vmatpush3.bf16.msra.mxu1 %v3440_v27  ;;  %v3508_v27 = vld [vmem:[%s4469_s1 + $0x490] sm:$0xff]  }
  0x56   :  { %3135 = vmatprep.subr.bf16.mxu1 %v3443_v30  ;;  %v3511_v30 = vld [vmem:[%s4469_s1 + $0x4d8] sm:$0xff]  }
  0x57   :  { %3114 = vmatpush3.bf16.msra.mxu0 %v3442_v29  ;;  %v3510_v29 = vld [vmem:[%s4469_s1 + $0x418] sm:$0xff]  }
  0x58   :  { %3115 = vmatprep.subr.bf16.mxu0 %v3445_v32  ;;  %v3513_v32 = vld [vmem:[%s4469_s1 + $0x460] sm:$0xff]  }
  0x59   :  { %3136 = vmatpush3.bf16.msra.mxu1 %v3444_v31  ;;  %v3512_v31 = vld [vmem:[%s4469_s1 + $0x498] sm:$0xff]  }
  0x5a   :  { %3137 = vmatprep.subr.bf16.mxu1 %v3447_v34  ;;  %v3515_v34 = vld [vmem:[%s4469_s1 + $0x4e0] sm:$0xff]  }
  0x5b   :  { %3116 = vmatpush3.bf16.msra.mxu0 %v3446_v33  ;;  %v3514_v33 = vld [vmem:[%s4469_s1 + $0x420] sm:$0xff]  }
  0x5c   :  { %3117 = vmatprep.subr.bf16.mxu0 %v3449_v36  ;;  %v3517_v36 = vld [vmem:[%s4469_s1 + $0x468] sm:$0xff]  }
  0x5d   :  { %3138 = vmatpush3.bf16.msra.mxu1 %v3448_v35  ;;  %v3516_v35 = vld [vmem:[%s4469_s1 + $0x4a0] sm:$0xff]  }
  0x5e   :  { %3139 = vmatprep.subr.bf16.mxu1 %v3451_v38  ;;  %v3519_v38 = vld [vmem:[%s4469_s1 + $0x4e8] sm:$0xff]  }
  0x5f   :  { %3118 = vmatpush3.bf16.msra.mxu0 %v3450_v37  ;;  %v3518_v37 = vld [vmem:[%s4469_s1 + $0x428] sm:$0xff]  }
  0x60   :  { %3147 = vmatprep.subr.bf16.mxu0 %v3456_v42  ;;  %v3523_v42 = vld [vmem:[%s4469_s1 + $0x4f0] sm:$0xff]  }
  0x61   :  { %3140 = vmatpush3.bf16.msra.mxu1 %v3455_v41  ;;  %v3522_v41 = vld [vmem:[%s4469_s1 + $0x430] sm:$0xff]  }
  0x62   :  { %2319 = vmatmul.mubr.bf16.vlgmr.msra.gmra.mrb[8].mxu0 %v3452_v39  ;;  %3169 = vmatprep.subr.bf16.mxu1 %v3461_v46  ;;  %v3520_v39 = vld [vmem:[%s4469_s1 + $0x4a8] sm:$0xff]   ;;  %v3527_v46 = vld [vmem:[%s4469_s1 + $0x4f8] sm:$0xff]  }
  0x63   :  { %3148 = vmatpush3.bf16.msra.mxu0 %v3460_v45  ;;  %2400 = vmatprep.mubr.bf16.mxu0 %v3492_v12  ;;  %v3526_v45 = vld [vmem:[%s4469_s1 + $0x438] sm:$0xff]   ;;  %v3559_v12 = vld [vmem:[%s4469_s1 + $0x570] sm:$0xff]  }
  0x64   :  { %2360 = vmatmul.mubr.bf16.vlgmr.msra.gmra.mrb[8].mxu1 %v3457_v43  ;;  %3149 = vmatprep.subr.bf16.mxu0 %v3463_v48  ;;  %v3524_v43 = vld [vmem:[%s4469_s1 + $0x4b0] sm:$0xff]   ;;  %v3530_v48 = vld [vmem:[%s4470_s0 + $0x44] ss:$120 sps:$4 sm:$0xff]  }
  0x65   :  { %3170 = vmatpush3.bf16.msra.mxu1 %v3462_v47  ;;  %2441 = vmatprep.mubr.bf16.mxu1 %v3497_v16  ;;  %v3528_v47 = vld [vmem:[%s4470_s0 + $0x40] ss:$120 sps:$4 sm:$0xff]  }
  0x66   :  { %3171 = vmatprep.subr.bf16.mxu1 %v3465_v50  ;;  %v3532_v50 = vld [vmem:[%s4469_s1 + $0x540] sm:$0xff]   ;;  %v3563_v16 = vld [vmem:[%s4469_s1 + $0x578] sm:$0xff]  }
  0x67   :  { %3150 = vmatpush3.bf16.msra.mxu0 %v3464_v49  ;;  %v3531_v49 = vld [vmem:[%s4469_s1 + $0x4b8] sm:$0xff]  }
  0x68   :  { %3151 = vmatprep.subr.bf16.mxu0 %v3467_v52  ;;  %v3535_v52 = vld [vmem:[%s4470_s0 + $0x4c] ss:$120 sps:$4 sm:$0xff]  }
  0x69   :  { %3172 = vmatpush3.bf16.msra.mxu1 %v3466_v51  ;;  %v3533_v51 = vld [vmem:[%s4470_s0 + $0x48] ss:$120 sps:$4 sm:$0xff]  }
  0x6a   :  { %3173 = vmatprep.subr.bf16.mxu1 %v3469_v54  ;;  %v3537_v54 = vld [vmem:[%s4469_s1 + $0x5c0] sm:$0xff]  }
  0x6b   :  { %3152 = vmatpush3.bf16.msra.mxu0 %v3468_v53  ;;  %v3536_v53 = vld [vmem:[%s4469_s1 + $0x500] sm:$0xff]  }
  0x6c   :  { %3153 = vmatprep.subr.bf16.mxu0 %v3471_v56  ;;  %v3539_v56 = vld [vmem:[%s4469_s1 + $0x548] sm:$0xff]  }
  0x6d   :  { %3174 = vmatpush3.bf16.msra.mxu1 %v3470_v55  ;;  %v3538_v55 = vld [vmem:[%s4469_s1 + $0x580] sm:$0xff]  }
  0x6e   :  { %3175 = vmatprep.subr.bf16.mxu1 %v3473_v58  ;;  %v3541_v58 = vld [vmem:[%s4469_s1 + $0x5c8] sm:$0xff]  }
  0x6f   :  { %3154 = vmatpush3.bf16.msra.mxu0 %v3472_v57  ;;  %v3540_v57 = vld [vmem:[%s4469_s1 + $0x508] sm:$0xff]  }
  0x70   :  { %3155 = vmatprep.subr.bf16.mxu0 %v3475_v60  ;;  %v3543_v60 = vld [vmem:[%s4469_s1 + $0x550] sm:$0xff]  }
  0x71   :  { %3176 = vmatpush3.bf16.msra.mxu1 %v3474_v59  ;;  %v3542_v59 = vld [vmem:[%s4469_s1 + $0x588] sm:$0xff]  }
  0x72   :  { %3177 = vmatprep.subr.bf16.mxu1 %v3477_v62  ;;  %v3545_v62 = vld [vmem:[%s4469_s1 + $0x5d0] sm:$0xff]  }
  0x73   :  { %3156 = vmatpush3.bf16.msra.mxu0 %v3476_v61  ;;  %v3544_v61 = vld [vmem:[%s4469_s1 + $0x510] sm:$0xff]  }
  0x74   :  { %3157 = vmatprep.subr.bf16.mxu0 %v3479_v0  ;;  %v3547_v0 = vld [vmem:[%s4469_s1 + $0x558] sm:$0xff]  }
  0x75   :  { %3178 = vmatpush3.bf16.msra.mxu1 %v3478_v63  ;;  %v3546_v63 = vld [vmem:[%s4469_s1 + $0x590] sm:$0xff]  }
  0x76   :  { %3179 = vmatprep.subr.bf16.mxu1 %v3481_v2  ;;  %v3549_v2 = vld [vmem:[%s4469_s1 + $0x5d8] sm:$0xff]  }
  0x77   :  { %3158 = vmatpush3.bf16.msra.mxu0 %v3480_v1  ;;  %v3548_v1 = vld [vmem:[%s4469_s1 + $0x518] sm:$0xff]  }
  0x78   :  { %3159 = vmatprep.subr.bf16.mxu0 %v3483_v4  ;;  %v3551_v4 = vld [vmem:[%s4469_s1 + $0x560] sm:$0xff]  }
  0x79   :  { %3180 = vmatpush3.bf16.msra.mxu1 %v3482_v3  ;;  %v3550_v3 = vld [vmem:[%s4469_s1 + $0x598] sm:$0xff]  }
  0x7a   :  { %3181 = vmatprep.subr.bf16.mxu1 %v3485_v6  ;;  %v3553_v6 = vld [vmem:[%s4469_s1 + $0x5e0] sm:$0xff]  }
  0x7b   :  { %3160 = vmatpush3.bf16.msra.mxu0 %v3484_v5  ;;  %v3552_v5 = vld [vmem:[%s4469_s1 + $0x520] sm:$0xff]  }
  0x7c   :  { %3161 = vmatprep.subr.bf16.mxu0 %v3487_v8  ;;  %v3555_v8 = vld [vmem:[%s4469_s1 + $0x568] sm:$0xff]  }
  0x7d   :  { %3182 = vmatpush3.bf16.msra.mxu1 %v3486_v7  ;;  %v3554_v7 = vld [vmem:[%s4469_s1 + $0x5a0] sm:$0xff]  }
  0x7e   :  { %3183 = vmatprep.subr.bf16.mxu1 %v3489_v10  ;;  %v3557_v10 = vld [vmem:[%s4469_s1 + $0x5e8] sm:$0xff]  }
  0x7f   :  { %3162 = vmatpush3.bf16.msra.mxu0 %v3488_v9  ;;  %v3556_v9 = vld [vmem:[%s4469_s1 + $0x528] sm:$0xff]  }
  0x80   :  { %3191 = vmatprep.subr.bf16.mxu0 %v3494_v14  ;;  %v3561_v14 = vld [vmem:[%s4469_s1 + $0x5f0] sm:$0xff]  }
  0x81   :  { %3184 = vmatpush3.bf16.msra.mxu1 %v3493_v13  ;;  %v3560_v13 = vld [vmem:[%s4469_s1 + $0x530] sm:$0xff]  }
  0x82   :  { %2401 = vmatmul.mubr.bf16.vlgmr.msra.gmra.mrb[12].mxu0 %v3490_v11  ;;  %3213 = vmatprep.subr.bf16.mxu1 %v3499_v18  ;;  %v3558_v11 = vld [vmem:[%s4469_s1 + $0x5a8] sm:$0xff]   ;;  %v3565_v18 = vld [vmem:[%s4469_s1 + $0x5f8] sm:$0xff]  }
  0x83   :  { %3192 = vmatpush3.bf16.msra.mxu0 %v3498_v17  ;;  %2482 = vmatprep.mubr.bf16.mxu0 %v3530_v48  ;;  %v3564_v17 = vld [vmem:[%s4469_s1 + $0x538] sm:$0xff]   ;;  %v3597_v48 = vld [vmem:[%s4469_s1 + $0x670] sm:$0xff]  }
  0x84   :  { %2442 = vmatmul.mubr.bf16.vlgmr.msra.gmra.mrb[12].mxu1 %v3495_v15  ;;  %3193 = vmatprep.subr.bf16.mxu0 %v3501_v20  ;;  %v3562_v15 = vld [vmem:[%s4469_s1 + $0x5b0] sm:$0xff]  }
  0x85   :  { %3214 = vmatpush3.bf16.msra.mxu1 %v3500_v19  ;;  %2523 = vmatprep.mubr.bf16.mxu1 %v3535_v52  ;;  %v3566_v19 = vld [vmem:[%s4470_s0 + $0x50] ss:$120 sps:$4 sm:$0xff]   ;;  %v3568_v20 = vld [vmem:[%s4470_s0 + $0x54] ss:$120 sps:$4 sm:$0xff]   ;;  %v3601_v52 = vld [vmem:[%s4469_s1 + $0x678] sm:$0xff]  }
  0x86   :  { %3215 = vmatprep.subr.bf16.mxu1 %v3503_v22  ;;  %v3570_v22 = vld [vmem:[%s4469_s1 + $0x640] sm:$0xff]  }
  0x87   :  { %3194 = vmatpush3.bf16.msra.mxu0 %v3502_v21  ;;  %v3569_v21 = vld [vmem:[%s4469_s1 + $0x5b8] sm:$0xff]  }
  0x88   :  { %3195 = vmatprep.subr.bf16.mxu0 %v3505_v24  ;;  %v3573_v24 = vld [vmem:[%s4470_s0 + $0x5c] ss:$120 sps:$4 sm:$0xff]  }
  0x89   :  { %3216 = vmatpush3.bf16.msra.mxu1 %v3504_v23  ;;  %v3571_v23 = vld [vmem:[%s4470_s0 + $0x58] ss:$120 sps:$4 sm:$0xff]  }
  0x8a   :  { %3217 = vmatprep.subr.bf16.mxu1 %v3507_v26  ;;  %v3575_v26 = vld [vmem:[%s4469_s1 + $0x6c0] sm:$0xff]  }
  0x8b   :  { %3196 = vmatpush3.bf16.msra.mxu0 %v3506_v25  ;;  %v3574_v25 = vld [vmem:[%s4469_s1 + $0x600] sm:$0xff]  }
  0x8c   :  { %3197 = vmatprep.subr.bf16.mxu0 %v3509_v28  ;;  %v3577_v28 = vld [vmem:[%s4469_s1 + $0x648] sm:$0xff]  }
  0x8d   :  { %3218 = vmatpush3.bf16.msra.mxu1 %v3508_v27  ;;  %v3576_v27 = vld [vmem:[%s4469_s1 + $0x680] sm:$0xff]  }
  0x8e   :  { %3219 = vmatprep.subr.bf16.mxu1 %v3511_v30  ;;  %v3579_v30 = vld [vmem:[%s4469_s1 + $0x6c8] sm:$0xff]  }
  0x8f   :  { %3198 = vmatpush3.bf16.msra.mxu0 %v3510_v29  ;;  %v3578_v29 = vld [vmem:[%s4469_s1 + $0x608] sm:$0xff]  }
  0x90   :  { %3199 = vmatprep.subr.bf16.mxu0 %v3513_v32  ;;  %v3581_v32 = vld [vmem:[%s4469_s1 + $0x650] sm:$0xff]  }
  0x91   :  { %3220 = vmatpush3.bf16.msra.mxu1 %v3512_v31  ;;  %v3580_v31 = vld [vmem:[%s4469_s1 + $0x688] sm:$0xff]  }
  0x92   :  { %3221 = vmatprep.subr.bf16.mxu1 %v3515_v34  ;;  %v3583_v34 = vld [vmem:[%s4469_s1 + $0x6d0] sm:$0xff]  }
  0x93   :  { %3200 = vmatpush3.bf16.msra.mxu0 %v3514_v33  ;;  %v3582_v33 = vld [vmem:[%s4469_s1 + $0x610] sm:$0xff]  }
  0x94   :  { %3201 = vmatprep.subr.bf16.mxu0 %v3517_v36  ;;  %v3585_v36 = vld [vmem:[%s4469_s1 + $0x658] sm:$0xff]  }
  0x95   :  { %3222 = vmatpush3.bf16.msra.mxu1 %v3516_v35  ;;  %v3584_v35 = vld [vmem:[%s4469_s1 + $0x690] sm:$0xff]  }
  0x96   :  { %3223 = vmatprep.subr.bf16.mxu1 %v3519_v38  ;;  %v3587_v38 = vld [vmem:[%s4469_s1 + $0x6d8] sm:$0xff]  }
  0x97   :  { %3202 = vmatpush3.bf16.msra.mxu0 %v3518_v37  ;;  %v3586_v37 = vld [vmem:[%s4469_s1 + $0x618] sm:$0xff]  }
  0x98   :  { %3203 = vmatprep.subr.bf16.mxu0 %v3521_v40  ;;  %v3589_v40 = vld [vmem:[%s4469_s1 + $0x660] sm:$0xff]  }
  0x99   :  { %3224 = vmatpush3.bf16.msra.mxu1 %v3520_v39  ;;  %v3588_v39 = vld [vmem:[%s4469_s1 + $0x698] sm:$0xff]  }
  0x9a   :  { %3225 = vmatprep.subr.bf16.mxu1 %v3523_v42  ;;  %v3591_v42 = vld [vmem:[%s4469_s1 + $0x6e0] sm:$0xff]  }
  0x9b   :  { %3204 = vmatpush3.bf16.msra.mxu0 %v3522_v41  ;;  %v3590_v41 = vld [vmem:[%s4469_s1 + $0x620] sm:$0xff]  }
  0x9c   :  { %3205 = vmatprep.subr.bf16.mxu0 %v3525_v44  ;;  %v3593_v44 = vld [vmem:[%s4469_s1 + $0x668] sm:$0xff]  }
  0x9d   :  { %3226 = vmatpush3.bf16.msra.mxu1 %v3524_v43  ;;  %v3592_v43 = vld [vmem:[%s4469_s1 + $0x6a0] sm:$0xff]  }
  0x9e   :  { %3227 = vmatprep.subr.bf16.mxu1 %v3527_v46  ;;  %v3595_v46 = vld [vmem:[%s4469_s1 + $0x6e8] sm:$0xff]  }
  0x9f   :  { %3206 = vmatpush3.bf16.msra.mxu0 %v3526_v45  ;;  %v3594_v45 = vld [vmem:[%s4469_s1 + $0x628] sm:$0xff]  }
  0xa0   :  { %3235 = vmatprep.subr.bf16.mxu0 %v3532_v50  ;;  %v3599_v50 = vld [vmem:[%s4469_s1 + $0x6f0] sm:$0xff]  }
  0xa1   :  { %3228 = vmatpush3.bf16.msra.mxu1 %v3531_v49  ;;  %v3598_v49 = vld [vmem:[%s4469_s1 + $0x630] sm:$0xff]  }
  0xa2   :  { %2483 = vmatmul.mubr.bf16.vlgmr.msra.gmra.mrb[16].mxu0 %v3528_v47  ;;  %3257 = vmatprep.subr.bf16.mxu1 %v3537_v54  ;;  %v3596_v47 = vld [vmem:[%s4469_s1 + $0x6a8] sm:$0xff]   ;;  %v3603_v54 = vld [vmem:[%s4469_s1 + $0x6f8] sm:$0xff]  }
  0xa3   :  { %3236 = vmatpush3.bf16.msra.mxu0 %v3536_v53  ;;  %2564 = vmatprep.mubr.bf16.mxu0 %v3568_v20  ;;  %v3602_v53 = vld [vmem:[%s4469_s1 + $0x638] sm:$0xff]  }
  0xa4   :  { %2524 = vmatmul.mubr.bf16.vlgmr.msra.gmra.mrb[16].mxu1 %v3533_v51  ;;  %3237 = vmatprep.subr.bf16.mxu0 %v3539_v56  ;;  %v3600_v51 = vld [vmem:[%s4469_s1 + $0x6b0] sm:$0xff]   ;;  %v3606_v56 = vld [vmem:[%s4470_s0 + $0x64] ss:$120 sps:$4 sm:$0xff]  }
  0xa5   :  { %3258 = vmatpush3.bf16.msra.mxu1 %v3538_v55  ;;  %2605 = vmatprep.mubr.bf16.mxu1 %v3573_v24  ;;  %v3604_v55 = vld [vmem:[%s4470_s0 + $0x60] ss:$120 sps:$4 sm:$0xff]   ;;  %v3629_v24 = vld [vmem:[%s4470_s0 + $0x74] ss:$120 sps:$4 sm:$0xff]  }
  0xa6   :  { %3259 = vmatprep.subr.bf16.mxu1 %v3541_v58  ;;  %v3608_v58 = vld [vmem:[%s4469_s1 + $0x740] sm:$0xff]  }
  0xa7   :  { %3238 = vmatpush3.bf16.msra.mxu0 %v3540_v57  ;;  %v3607_v57 = vld [vmem:[%s4469_s1 + $0x6b8] sm:$0xff]  }
  0xa8   :  { %3239 = vmatprep.subr.bf16.mxu0 %v3543_v60  ;;  %v3611_v60 = vld [vmem:[%s4470_s0 + $0x6c] ss:$120 sps:$4 sm:$0xff]  }
  0xa9   :  { %3260 = vmatpush3.bf16.msra.mxu1 %v3542_v59  ;;  %v3609_v59 = vld [vmem:[%s4470_s0 + $0x68] ss:$120 sps:$4 sm:$0xff]  }
  0xaa   :  { %3261 = vmatprep.subr.bf16.mxu1 %v3545_v62  ;;  %v3613_v62 = vld [vmem:[%s4469_s1 + $0x748] sm:$0xff]  }
  0xab   :  { %3240 = vmatpush3.bf16.msra.mxu0 %v3544_v61  ;;  %v3612_v61 = vld [vmem:[%s4469_s1 + $0x700] sm:$0xff]  }
  0xac   :  { %3241 = vmatprep.subr.bf16.mxu0 %v3547_v0 }
  0xad   :  { %3262 = vmatpush3.bf16.msra.mxu1 %v3546_v63  ;;  %v3614_v63 = vld [vmem:[%s4469_s1 + $0x708] sm:$0xff]  }
  0xae   :  { %3263 = vmatprep.subr.bf16.mxu1 %v3549_v2 }
  0xaf   :  { %3242 = vmatpush3.bf16.msra.mxu0 %v3548_v1  ;;  %v3615_v1 = vld [vmem:[%s4469_s1 + $0x750] sm:$0xff]  }
  0xb0   :  { %3243 = vmatprep.subr.bf16.mxu0 %v3551_v4 }
  0xb1   :  { %3264 = vmatpush3.bf16.msra.mxu1 %v3550_v3 }
  0xb2   :  { %3265 = vmatprep.subr.bf16.mxu1 %v3553_v6  ;;  %v3616_v6 = vld [vmem:[%s4469_s1 + $0x710] sm:$0xff]  }
  0xb3   :  { %3244 = vmatpush3.bf16.msra.mxu0 %v3552_v5 }
  0xb4   :  { %3245 = vmatprep.subr.bf16.mxu0 %v3555_v8  ;;  %v3617_v8 = vld [vmem:[%s4469_s1 + $0x758] sm:$0xff]  }
  0xb5   :  { %3266 = vmatpush3.bf16.msra.mxu1 %v3554_v7 }
  0xb6   :  { %3267 = vmatprep.subr.bf16.mxu1 %v3557_v10 }
  0xb7   :  { %3246 = vmatpush3.bf16.msra.mxu0 %v3556_v9 }
  0xb8   :  { %3247 = vmatprep.subr.bf16.mxu0 %v3559_v12 }
  0xb9   :  { %3268 = vmatpush3.bf16.msra.mxu1 %v3558_v11  ;;  %v2744_v11 = vld [vmem:[%s4471_s2] ss:$0 sm:$0xff] }
  0xba   :  { %3269 = vmatprep.subr.bf16.mxu1 %v3561_v14 }
  0xbb   :  { %3248 = vmatpush3.bf16.msra.mxu0 %v3560_v13 }
  0xbc   :  { %3249 = vmatprep.subr.bf16.mxu0 %v3563_v16 }
  0xbd   :  { %3270 = vmatpush3.bf16.msra.mxu1 %v3562_v15 }
  0xbe   :  { %3271 = vmatprep.subr.bf16.mxu1 %v3565_v18 }
  0xbf   :  { %3250 = vmatpush3.bf16.msra.mxu0 %v3564_v17  ;;  %v3618_v17 = vld [vmem:[%s4469_s1 + $0x718] sm:$0xff]  }
  0xc0   :  { %3279 = vmatprep.subr.bf16.mxu0 %v3570_v22  ;;  %v3620_v22 = vld [vmem:[%s4469_s1 + $0x720] sm:$0xff]  }
  0xc1   :  { %3272 = vmatpush3.bf16.msra.mxu1 %v3569_v21 }
  0xc2   :  { %2565 = vmatmul.mubr.bf16.vlgmr.msra.gmra.mrb[20].mxu0 %v3566_v19  ;;  %3301 = vmatprep.subr.bf16.mxu1 %v3575_v26  ;;  %v3619_v19 = vld [vmem:[%s4469_s1 + $0x760] sm:$0xff]   ;;  %v3623_v26 = vld [vmem:[%s4469_s1 + $0x770] sm:$0xff]  }
  0xc3   :  { %3280 = vmatpush3.bf16.msra.mxu0 %v3574_v25  ;;  %2646 = vmatprep.mubr.bf16.mxu0 %v3606_v56  ;;  %v3622_v25 = vld [vmem:[%s4469_s1 + $0x728] sm:$0xff]  }
  0xc4   :  { %2606 = vmatmul.mubr.bf16.vlgmr.msra.gmra.mrb[20].mxu1 %v3571_v23  ;;  %3281 = vmatprep.subr.bf16.mxu0 %v3577_v28  ;;  %v3621_v23 = vld [vmem:[%s4469_s1 + $0x768] sm:$0xff]   ;;  %v3625_v28 = vld [vmem:[%s4469_s1 + $0x778] sm:$0xff]  }
  0xc5   :  { %3302 = vmatpush3.bf16.msra.mxu1 %v3576_v27  ;;  %2687 = vmatprep.mubr.bf16.mxu1 %v3611_v60  ;;  %v3624_v27 = vld [vmem:[%s4469_s1 + $0x730] sm:$0xff]  }
  0xc6   :  { %3303 = vmatprep.subr.bf16.mxu1 %v3579_v30  ;;  %v3627_v30 = vld [vmem:[%s4470_s0 + $0x70] ss:$120 sps:$4 sm:$0xff]  }
  0xc7   :  { %3282 = vmatpush3.bf16.msra.mxu0 %v3578_v29  ;;  %v3626_v29 = vld [vmem:[%s4469_s1 + $0x738] sm:$0xff]  }
  0xc8   :  { %3283 = vmatprep.subr.bf16.mxu0 %v3581_v32 }
  0xc9   :  { %3304 = vmatpush3.bf16.msra.mxu1 %v3580_v31 }
  0xca   :  { %3305 = vmatprep.subr.bf16.mxu1 %v3583_v34 }
  0xcb   :  { %3284 = vmatpush3.bf16.msra.mxu0 %v3582_v33 }
  0xcc   :  { %3285 = vmatprep.subr.bf16.mxu0 %v3585_v36 }
  0xcd   :  { %3306 = vmatpush3.bf16.msra.mxu1 %v3584_v35 }
  0xce   :  { %3307 = vmatprep.subr.bf16.mxu1 %v3587_v38 }
  0xcf   :  { %3286 = vmatpush3.bf16.msra.mxu0 %v3586_v37 }
  0xd0   :  { %3287 = vmatprep.subr.bf16.mxu0 %v3589_v40 }
  0xd1   :  { %3308 = vmatpush3.bf16.msra.mxu1 %v3588_v39 }
  0xd2   :  { %3309 = vmatprep.subr.bf16.mxu1 %v3591_v42 }
  0xd3   :  { %3288 = vmatpush3.bf16.msra.mxu0 %v3590_v41 }
  0xd4   :  { %3289 = vmatprep.subr.bf16.mxu0 %v3593_v44 }
  0xd5   :  { %3310 = vmatpush3.bf16.msra.mxu1 %v3592_v43 }
  0xd6   :  { %3311 = vmatprep.subr.bf16.mxu1 %v3595_v46 }
  0xd7   :  { %3290 = vmatpush3.bf16.msra.mxu0 %v3594_v45 }
  0xd8   :  { %3291 = vmatprep.subr.bf16.mxu0 %v3597_v48 }
  0xd9   :  { %3312 = vmatpush3.bf16.msra.mxu1 %v3596_v47 }
  0xda   :  { %3313 = vmatprep.subr.bf16.mxu1 %v3599_v50 }
  0xdb   :  { %3292 = vmatpush3.bf16.msra.mxu0 %v3598_v49 }
  0xdc   :  { %3293 = vmatprep.subr.bf16.mxu0 %v3601_v52 }
  0xdd   :  { %3314 = vmatpush3.bf16.msra.mxu1 %v3600_v51 }
  0xde   :  { %3315 = vmatprep.subr.bf16.mxu1 %v3603_v54 }
  0xdf   :  { %3294 = vmatpush3.bf16.msra.mxu0 %v3602_v53 }
  0xe0   :  { %3323 = vmatprep.subr.bf16.mxu0 %v3608_v58 }
  0xe1   :  { %3316 = vmatpush3.bf16.msra.mxu1 %v3607_v57 }
  0xe2   :  { %2647 = vmatmul.mubr.bf16.vlgmr.msra.gmra.mrb[24].mxu0 %v3604_v55 }
  0xe3   :  { %3324 = vmatpush3.bf16.msra.mxu0 %v3612_v61  ;;  %2728 = vmatprep.mubr.bf16.mxu0 %v3629_v24 }
  0xe4   :  { %2688 = vmatmul.mubr.bf16.vlgmr.msra.gmra.mrb[24].mxu1 %v3609_v59  ;;  %3325 = vmatprep.subr.bf16.mxu0 %v3613_v62 }
  0xe7   :  { %3326 = vmatpush3.bf16.msra.mxu0 %v3614_v63 }
  0xe8   :  { %3327 = vmatprep.subr.bf16.mxu0 %v3615_v1 }
  0xeb   :  { %3328 = vmatpush3.bf16.msra.mxu0 %v3616_v6 }
  0xec   :  { %3329 = vmatprep.subr.bf16.mxu0 %v3617_v8 }
  0xef   :  { %3330 = vmatpush3.bf16.msra.mxu0 %v3618_v17 }
  0xf0   :  { %3331 = vmatprep.subr.bf16.mxu0 %v3619_v19 }
  0xf3   :  { %3332 = vmatpush3.bf16.msra.mxu0 %v3620_v22 }
  0xf4   :  { %3333 = vmatprep.subr.bf16.mxu0 %v3621_v23 }
  0xf5   :  { %v3031_v0 = vpop.f32.mrb[0].mxu0 }
  0xf6   :  { %v3032_v2 = vpop.f32.mrb[1].mxu0 }
  0xf7   :  { %v3033_v3 = vadd.f32 %v3032_v2, %v3031_v0  ;;  %v3034_v4 = vpop.f32.mrb[2].mxu0  ;;  %v3053_v5 = vpop.f32.mrb[0].mxu1  ;;  %3334 = vmatpush3.bf16.msra.mxu0 %v3622_v25 }
  0xf8   :  { %v3035_v7 = vpop.f32.mrb[3].mxu0  ;;  %v3054_v10 = vpop.f32.mrb[1].mxu1  ;;  %3335 = vmatprep.subr.bf16.mxu0 %v3623_v26 }
  0xf9   :  { %v3036_v9 = vadd.f32 %v3035_v7, %v3034_v4  ;;  %v3055_v12 = vadd.f32 %v3054_v10, %v3053_v5  ;;  %v3056_v13 = vpop.f32.mrb[2].mxu1  ;;  %v2157_v14 = vadd.f32 %v3033_v3, %v2744_v11 }
  0xfa   :  { %v3057_v16 = vpop.f32.mrb[3].mxu1 }
  0xfb   :  { %v2160_v15 = vadd.f32 %v3036_v9, %v2744_v11  ;;  %v3058_v18 = vadd.f32 %v3057_v16, %v3056_v13  ;;  %v2198_v20 = vadd.f32 %v3055_v12, %v2157_v14  ;;  %3336 = vmatpush3.bf16.msra.mxu0 %v3624_v27 }
  0xfc   :  { %3337 = vmatprep.subr.bf16.mxu0 %v3625_v28 }
  0xfd   :  { %v2201_v21 = vadd.f32 %v3058_v18, %v2160_v15 }
  0xff   :  { %3338 = vmatpush3.bf16.msra.mxu0 %v3626_v29 }
 0x102   :  { %2729 = vmatmul.mubr.bf16.vlgmr.msra.gmra.mrb[28].mxu0 %v3627_v30 }
 0x115   :  { %v3075_v31 = vpop.f32.mrb[4].mxu0 }
 0x116   :  { %v3076_v32 = vpop.f32.mrb[5].mxu0 }
 0x117   :  { %v3077_v33 = vadd.f32 %v3076_v32, %v3075_v31  ;;  %v3078_v34 = vpop.f32.mrb[6].mxu0  ;;  %v3097_v37 = vpop.f32.mrb[4].mxu1 }
 0x118   :  { %v3079_v35 = vpop.f32.mrb[7].mxu0  ;;  %v3098_v39 = vpop.f32.mrb[5].mxu1 }
 0x119   :  { %v2239_v36 = vadd.f32 %v3077_v33, %v2198_v20  ;;  %v3080_v38 = vadd.f32 %v3079_v35, %v3078_v34  ;;  %v3099_v41 = vadd.f32 %v3098_v39, %v3097_v37  ;;  %v3100_v42 = vpop.f32.mrb[6].mxu1 }
 0x11a   :  { %v3101_v43 = vpop.f32.mrb[7].mxu1 }
 0x11b   :  { %v2242_v40 = vadd.f32 %v3080_v38, %v2201_v21  ;;  %v2280_v44 = vadd.f32 %v3099_v41, %v2239_v36  ;;  %v3102_v45 = vadd.f32 %v3101_v43, %v3100_v42 }
 0x11d   :  { %v2283_v46 = vadd.f32 %v3102_v45, %v2242_v40 }
 0x135   :  { %v3119_v47 = vpop.f32.mrb[8].mxu0 }
 0x136   :  { %v3120_v48 = vpop.f32.mrb[9].mxu0 }
 0x137   :  { %v3121_v49 = vadd.f32 %v3120_v48, %v3119_v47  ;;  %v3122_v50 = vpop.f32.mrb[10].mxu0  ;;  %v3141_v51 = vpop.f32.mrb[8].mxu1 }
 0x138   :  { %v3123_v52 = vpop.f32.mrb[11].mxu0  ;;  %v3142_v55 = vpop.f32.mrb[9].mxu1 }
 0x139   :  { %v2321_v53 = vadd.f32 %v3121_v49, %v2280_v44  ;;  %v3124_v54 = vadd.f32 %v3123_v52, %v3122_v50  ;;  %v3143_v56 = vadd.f32 %v3142_v55, %v3141_v51  ;;  %v3144_v57 = vpop.f32.mrb[10].mxu1 }
 0x13a   :  { %v3145_v59 = vpop.f32.mrb[11].mxu1 }
 0x13b   :  { %v2324_v58 = vadd.f32 %v3124_v54, %v2283_v46  ;;  %v2362_v60 = vadd.f32 %v3143_v56, %v2321_v53  ;;  %v3146_v61 = vadd.f32 %v3145_v59, %v3144_v57 }
 0x13d   :  { %v2365_v62 = vadd.f32 %v3146_v61, %v2324_v58 }
 0x155   :  { %v3163_v63 = vpop.f32.mrb[12].mxu0 }
 0x156   :  { %v3164_v0 = vpop.f32.mrb[13].mxu0 }
 0x157   :  { %v3165_v1 = vadd.f32 %v3164_v0, %v3163_v63  ;;  %v3166_v2 = vpop.f32.mrb[14].mxu0  ;;  %v3185_v3 = vpop.f32.mrb[12].mxu1 }
 0x158   :  { %v3167_v4 = vpop.f32.mrb[15].mxu0  ;;  %v3186_v7 = vpop.f32.mrb[13].mxu1 }
 0x159   :  { %v2403_v5 = vadd.f32 %v3165_v1, %v2362_v60  ;;  %v3168_v6 = vadd.f32 %v3167_v4, %v3166_v2  ;;  %v3187_v8 = vadd.f32 %v3186_v7, %v3185_v3  ;;  %v3188_v9 = vpop.f32.mrb[14].mxu1 }
 0x15a   :  { %v3189_v11 = vpop.f32.mrb[15].mxu1 }
 0x15b   :  { %v2406_v10 = vadd.f32 %v3168_v6, %v2365_v62  ;;  %v2444_v12 = vadd.f32 %v3187_v8, %v2403_v5  ;;  %v3190_v13 = vadd.f32 %v3189_v11, %v3188_v9 }
 0x15d   :  { %v2447_v14 = vadd.f32 %v3190_v13, %v2406_v10 }
 0x175   :  { %v3207_v15 = vpop.f32.mrb[16].mxu0 }
 0x176   :  { %v3208_v16 = vpop.f32.mrb[17].mxu0 }
 0x177   :  { %v3209_v17 = vadd.f32 %v3208_v16, %v3207_v15  ;;  %v3210_v18 = vpop.f32.mrb[18].mxu0  ;;  %v3229_v21 = vpop.f32.mrb[16].mxu1 }
 0x178   :  { %v3211_v19 = vpop.f32.mrb[19].mxu0  ;;  %v3230_v23 = vpop.f32.mrb[17].mxu1 }
 0x179   :  { %v2485_v20 = vadd.f32 %v3209_v17, %v2444_v12  ;;  %v3212_v22 = vadd.f32 %v3211_v19, %v3210_v18  ;;  %v3231_v25 = vadd.f32 %v3230_v23, %v3229_v21  ;;  %v3232_v26 = vpop.f32.mrb[18].mxu1 }
 0x17a   :  { %v3233_v27 = vpop.f32.mrb[19].mxu1 }
 0x17b   :  { %v2488_v24 = vadd.f32 %v3212_v22, %v2447_v14  ;;  %v2526_v28 = vadd.f32 %v3231_v25, %v2485_v20  ;;  %v3234_v29 = vadd.f32 %v3233_v27, %v3232_v26 }
 0x17d   :  { %v2529_v30 = vadd.f32 %v3234_v29, %v2488_v24 }
 0x195   :  { %v3251_v31 = vpop.f32.mrb[20].mxu0 }
 0x196   :  { %v3252_v32 = vpop.f32.mrb[21].mxu0 }
 0x197   :  { %v3253_v33 = vadd.f32 %v3252_v32, %v3251_v31  ;;  %v3254_v34 = vpop.f32.mrb[22].mxu0  ;;  %v3273_v35 = vpop.f32.mrb[20].mxu1 }
 0x198   :  { %v3255_v36 = vpop.f32.mrb[23].mxu0  ;;  %v3274_v39 = vpop.f32.mrb[21].mxu1 }
 0x199   :  { %v2567_v37 = vadd.f32 %v3253_v33, %v2526_v28  ;;  %v3256_v38 = vadd.f32 %v3255_v36, %v3254_v34  ;;  %v3275_v40 = vadd.f32 %v3274_v39, %v3273_v35  ;;  %v3276_v41 = vpop.f32.mrb[22].mxu1 }
 0x19a   :  { %v3277_v43 = vpop.f32.mrb[23].mxu1 }
 0x19b   :  { %v2570_v42 = vadd.f32 %v3256_v38, %v2529_v30  ;;  %v2608_v44 = vadd.f32 %v3275_v40, %v2567_v37  ;;  %v3278_v45 = vadd.f32 %v3277_v43, %v3276_v41 }
 0x19d   :  { %v2611_v46 = vadd.f32 %v3278_v45, %v2570_v42 }
 0x1b5   :  { %v3295_v47 = vpop.f32.mrb[24].mxu0 }
 0x1b6   :  { %v3296_v48 = vpop.f32.mrb[25].mxu0 }
 0x1b7   :  { %v3297_v49 = vadd.f32 %v3296_v48, %v3295_v47  ;;  %v3298_v50 = vpop.f32.mrb[26].mxu0  ;;  %v3317_v51 = vpop.f32.mrb[24].mxu1 }
 0x1b8   :  { %v3299_v52 = vpop.f32.mrb[27].mxu0  ;;  %v3318_v55 = vpop.f32.mrb[25].mxu1 }
 0x1b9   :  { %v2649_v53 = vadd.f32 %v3297_v49, %v2608_v44  ;;  %v3300_v54 = vadd.f32 %v3299_v52, %v3298_v50  ;;  %v3319_v56 = vadd.f32 %v3318_v55, %v3317_v51  ;;  %v3320_v57 = vpop.f32.mrb[26].mxu1 }
 0x1ba   :  { %v3321_v59 = vpop.f32.mrb[27].mxu1 }
 0x1bb   :  { %v2652_v58 = vadd.f32 %v3300_v54, %v2611_v46  ;;  %v2690_v60 = vadd.f32 %v3319_v56, %v2649_v53  ;;  %v3322_v61 = vadd.f32 %v3321_v59, %v3320_v57 }
 0x1bd   :  { %v2693_v62 = vadd.f32 %v3322_v61, %v2652_v58 }
 0x1d5   :  { %v3339_v63 = vpop.f32.mrb[28].mxu0 }
 0x1d6   :  { %v3340_v0 = vpop.f32.mrb[29].mxu0 }
 0x1d7   :  { %v3341_v1 = vadd.f32 %v3340_v0, %v3339_v63  ;;  %v3342_v2 = vpop.f32.mrb[30].mxu0 }
 0x1d8   :  { %v3343_v3 = vpop.f32.mrb[31].mxu0 }
 0x1d9   :  { %v2731_v4 = vadd.f32 %v3341_v1, %v2690_v60  ;;  %v3344_v5 = vadd.f32 %v3343_v3, %v3342_v2 }
 0x1db   :  { %2738 = vst.msk [vmem:[%s4472_s3] sm:$0xff] %vm2737_vm0, %v2731_v4  ;;  %v2734_v6 = vadd.f32 %v3344_v5, %v2693_v62 }
 0x1dd   :  { %2739 = vst.msk [vmem:[%s4472_s3 + $0x8] sm:$0xff] %vm2737_vm0, %v2734_v6 }

// kernel: mynet_forward.7
= control target key start
LH: loop header
LB: loop body
LE: loop exit
PB: predicated region body
PF: predicated region fallthrough
CT: control target
= control target key end

     0   :  { %s1639_s15 = smov 0   ;;  %s1842_s0 = inlined_call_operand.vmem [shape: f32[2,8,64], index: 0, kind: input, shape index: {}]   ;;  %s1843_s1 = inlined_call_operand.vmem [shape: f32[2,1,8], index: 1, kind: input, shape index: {}]   ;;  %s1844_s2 = inlined_call_operand.vmem [shape: bf16[64,192], index: 2, kind: input, shape index: {}]   ;;  %s1845_s3 = inlined_call_operand.vmem [shape: f32[1,192], index: 3, kind: input, shape index: {}]   ;;  %s1846_s4 = inlined_call_operand.vmem [shape: bf16[64,64], index: 4, kind: input, shape index: {}]   ;;  %s1847_s5 = inlined_call_operand.vmem [shape: f32[1,64], index: 5, kind: input, shape index: {}]   ;;  %s1848_s6 = inlined_call_operand.vmem [shape: bf16[64,64], index: 6, kind: input, shape index: {}]   ;;  %s1849_s7 = inlined_call_operand.vmem [shape: f32[1,64], index: 7, kind: input, shape index: {}]   ;;  %s1850_s8 = inlined_call_operand.vmem [shape: bf16[64,1], index: 8, kind: input, shape index: {}]   ;;  %s1851_s9 = inlined_call_operand.<no memory space> [shape: f32[1,1], index: 9, kind: input, shape index: {}]   ;;  %s1852_s10 = inlined_call_operand.vmem [shape: f32[2,1,1], index: 10, kind: output, shape index: {}]  }
   0x1   :  { %v15_v0 = vstv %s1851_s9 }
   0x2   :  { %16 = vst [vmem:[#allocation2] sm:$0x1] %v15_v0 }
   0x3 LB: > { %s1337_s16 = sadd.s32 4294967295, %s1569_s15   ;;  %p1341_p0 = scmp.ge.s32.totalorder %s1569_s15, 1  ;;  %s1569_s15 = sphi %s1639_s15, %s22_s15  }
   0x4   : > { %p321_p1 = scmp.lt.s32.totalorder %s1569_s15, 3 }
   0x6   : > { %p322_p2 = pnand %p1341_p0, %p321_p1 }
   0x7   : > { %v1521_v1 = vld [vmem:[%s1844_s2 + $0x4] ss:$8 sps:$4 sm:$0xff] (!%p322_p2)   ;;  %p359_p3 = scmp.lt.s32.totalorder (!%p322_p2), %s1337_s16, 1  ;;  %v383_v2 = vlaneseq (!%p322_p2)  ;;  %v1523_v3 = vld [vmem:[%s1844_s2] ss:$8 sps:$4 sm:$0xff] (!%p322_p2)   ;;  %v1571_v4 = vmov (!%p322_p2), 0  }
   0x8   : > { %325 = sbr.rel (%p322_p2) target bundleno = 2145 (0x861), region = 60  ;;  %469 = vmatprep.mubr.bf16.mxu0 (!%p322_p2), %v1571_v4  ;;  %437 = vmatprep.subr.bf16.mxu0 (!%p322_p2), %v1521_v1  ;;  %v1524_v5 = vld [vmem:[%s1844_s2 + $0x14] ss:$8 sps:$4 sm:$0xff] (!%p322_p2)   ;;  %v1526_v6 = vld [vmem:[%s1844_s2 + $0x10] ss:$8 sps:$4 sm:$0xff] (!%p322_p2)   ;;  %vm433_vm1 = vcmask (!%p322_p2), 523264  }
   0x9   : > { %438 = vmatpush1.bf16.msra.mxu0 (!%p322_p2), %v1523_v3  ;;  %v384_v7 = vshrl.u32 (!%p322_p2), %v383_v2, 7  ;;  %v1527_v8 = vld [vmem:[%s1844_s2 + $0x24] ss:$8 sps:$4 sm:$0xff] (!%p322_p2)   ;;  %v1529_v9 = vld [vmem:[%s1844_s2 + $0x20] ss:$8 sps:$4 sm:$0xff] (!%p322_p2)   ;;  %v1572_v18 = vmov (!%p322_p2), 0.0  }
   0xa   : > { %439 = vmatprep.subr.bf16.mxu0 (!%p322_p2), %v1524_v5  ;;  %v1530_v11 = vld [vmem:[%s1844_s2 + $0x34] ss:$8 sps:$4 sm:$0xff] (!%p322_p2)   ;;  %v1532_v15 = vld [vmem:[%s1844_s2 + $0x30] ss:$8 sps:$4 sm:$0xff] (!%p322_p2)   ;;  %1412 = vmatprep.subr.bf16.mxu1 (!%p322_p2), %v1572_v18  ;;  %v381_v19 = vld [vmem:[%s1845_s3] sm:$0x3] (!%p322_p2) }
   0xb   : > { %v385_v12 = vsub.s32 (!%p322_p2), 0, %v384_v7  ;;  %vm1573_vm2 = vmmov (!%p322_p2), 0   ;;  %s1574_s22 = smov (!%p322_p2), 112   ;;  %s1575_s23 = smov (!%p322_p2), 64   ;;  %v389_v27 = vsub.s32 (!%p322_p2), 1, %v384_v7  ;;  %vm483_vm3 = vcmask (!%p322_p2), 130048  }
   0xc   : > { %1414 = vmatprep.mubr.msk.bf16.mxu1 (!%p322_p2), %vm1573_vm2, %v1572_v18  ;;  %s1576_s24 = smov (!%p322_p2), 32   ;;  %s1577_s25 = smov (!%p322_p2), 48   ;;  %vm555_vm4 = vcmask (!%p322_p2), 1043456   ;;  %vm539_vm6 = vcmask (!%p322_p2), 64512   ;;  %vm1109_vm7 = vcmask (!%p322_p2), 57344   ;;  %vm949_vm8 = vcmask (!%p322_p2), 261120  }
   0xd   : > { %440 = vmatpush1.bf16.msra.mxu0 (!%p322_p2), %v1526_v6  ;;  %v386_v20 = vrot.slane (!%p322_p2), %v381_v19, %v385_v12  ;;  %s1578_s26 = smov (!%p322_p2), 16   ;;  %s1579_s27 = smov (!%p322_p2), 96   ;;  %v390_v28 = vrot.slane (!%p322_p2), %v381_v19, %v389_v27  ;;  %vm951_vm9 = vcmask (!%p322_p2), 392192   ;;  %vm1279_vm10 = vcmask (!%p322_p2), 0  }
   0xe   : > { %441 = vmatprep.subr.bf16.mxu0 (!%p322_p2), %v1527_v8 }
   0xf   : > { %s1854_s16 = smov (!%p359_p3, %s1337_s16), 1 }
  0x10   : > { %s365_s28 = scalar_lea.vmem %s1843_s1, %s1854_s16  ;;  %s1342_s29 = sshll.u32 %s1854_s16, 3 }
  0x11   : > { %v1672_v10 = vld [vmem:[%s365_s28] sm:$0x1]  ;;  %s362_s18 = scalar_lea.vmem %s1842_s0, %s1342_s29  ;;  %442 = vmatpush1.bf16.msra.mxu0 %v1529_v9  ;;  %s1580_s28 = smov 80  }
  0x12   : > { %vm531_vm0 = vcmp.gt.f32.partialorder %v1672_v10, 0.5  ;;  %v370_v16 = vld [vmem:[%s362_s18] sm:$0xff]  ;;  %443 = vmatprep.subr.bf16.mxu0 %v1530_v11 }
  0x13   : > { %v532_v13 = vsel %vm531_vm0, 1, %v1571_v4  ;;  %v372_v17 = vpack.c.bf16 %v370_v16, %v370_v16 }
  0x14   : > { %v1681_v14 = vrot.slane %v532_v13, %v385_v12 }
  0x15   : > { %444 = vmatpush1.bf16.msra.mxu0 %v1532_v15 }
  0x16   : > { %1424 = vmatprep.subr.bf16.mxu0 %v1572_v18  ;;  %vm537_vm5 = vcmp.eq.s32.totalorder %v1681_v14, 1 }
  0x18   : > { %1351 = vmatmul.mubr.msk.bf16.vlgmr.msra.gmra.mrb[0].mxu0 %vm433_vm1, %v372_v17 }
  0x19   : > { %1426 = vmatprep.mubr.msk.bf16.mxu0 %vm1573_vm2, %v1572_v18 }
  0xeb   : > { %v471_v21 = vpop.f32.mrb[0].mxu0 }
  0xec   : > { %v472_v22 = vadd.f32 %v471_v21, %v386_v20  ;;  %v473_v23 = vpop.f32.mrb[1].mxu0 }
  0xed   : > { %v475_v24 = vpop.f32.mrb[2].mxu0  ;;  %v474_v30 = vadd.f32 %v473_v23, %v390_v28 }
  0xee   : > { %v478_v25 = vpack.c.bf16 %v472_v22, %v472_v22  ;;  %v476_v26 = vpop.f32.mrb[3].mxu0 }
  0xef   : > { %v1704_v34 = vpack.c.bf16 %v474_v30, %v474_v30 }
  0xf0   : > { %599 = vrot.lane.b32.xlu1 %v478_v25, %s1574_s22  ;;  %481 = vrot.lane.b32.xlu0 %v478_v25, %s1575_s23  ;;  %s368_s23 = scalar_lea.vmem %s1852_s10, %s1854_s16 }
  0xf1   : > { %v557_v36 = vsel %vm555_vm4, %v1704_v34, 0 }
  0xf4   : > { %714 = vrot.lane.b32.xlu1 %v478_v25, %s1576_s24  ;;  %601 = vrot.lane.b32.xlu0 %v478_v25, %s1577_s25 }
  0xf8   : > { %826 = vrot.lane.b32.xlu1 %v478_v25, %s1578_s26  ;;  %712 = vrot.lane.b32.xlu0 %v478_v25, %s1579_s27 }
  0xfc   : > { %824 = vrot.lane.b32.xlu0 %v478_v25, %s1580_s28 }
 0x162   : > { %v482_v29 = vpop.permute.xlu0 %481  ;;  %v600_v32 = vpop.permute.xlu1 %599 }
 0x163   : > { %v488_v31 = vsel %vm483_vm3, %v482_v29, 0 }
 0x164   : > { %1413 = vmatpush3.bf16.xpose.msra.mxu1 %v488_v31 }
 0x165   : > { %1418 = vmatprep.subr.bf16.mxu1 %v1572_v18 }
 0x166   : > { %v602_v33 = vpop.permute.xlu0 %601  ;;  %v715_v37 = vpop.permute.xlu1 %714 }
 0x167   : > { %v607_v35 = vsel %vm483_vm3, %v602_v33, 0  ;;  %v720_v38 = vsel %vm483_vm3, %v715_v37, 0 }
 0x168   : > { %1425 = vmatpush3.bf16.xpose.msra.mxu0 %v607_v35 }
 0x169   : > { %1436 = vmatprep.subr.bf16.mxu0 %v1572_v18 }
 0x16a   : > { %v827_v39 = vpop.permute.xlu1 %826  ;;  %v713_v40 = vpop.permute.xlu0 %712 }
 0x16b   : > { %1415 = vmatmul.mubr.msk.bf16.vlgmr.msra.gmra.mrb[0].mxu1 %vm483_vm3, %v478_v25  ;;  %v832_v41 = vsel %vm483_vm3, %v827_v39, 0 }
 0x16c   : > { %1419 = vmatpush3.bf16.msra.mxu1 %v557_v36  ;;  %1420 = vmatprep.mubr.msk.bf16.mxu1 %vm1573_vm2, %v1572_v18 }
 0x16d   : > { %1430 = vmatprep.subr.bf16.mxu1 %v1572_v18 }
 0x16e   : > { %v825_v42 = vpop.permute.xlu0 %824 }
 0x16f   : > { %1427 = vmatmul.mubr.msk.bf16.vlgmr.msra.gmra.mrb[4].mxu0 %vm483_vm3, %v600_v32 }
 0x170   : > { %1437 = vmatpush3.bf16.xpose.msra.mxu0 %v720_v38  ;;  %1438 = vmatprep.mubr.msk.bf16.mxu0 %vm1573_vm2, %v1572_v18 }
 0x171   : > { %1448 = vmatprep.subr.bf16.mxu0 %v1572_v18 }
 0x177   : > { %1439 = vmatmul.mubr.msk.bf16.vlgmr.msra.gmra.mrb[8].mxu0 %vm483_vm3, %v713_v40 }
 0x178   : > { %1449 = vmatpush3.bf16.xpose.msra.mxu0 %v832_v41  ;;  %1450 = vmatprep.mubr.msk.bf16.mxu0 %vm1573_vm2, %v1572_v18 }
 0x179   : > { %1460 = vmatprep.subr.bf16.mxu0 %v1572_v18 }
 0x17f   : > { %1451 = vmatmul.mubr.msk.bf16.vlgmr.msra.gmra.mrb[12].mxu0 %vm483_vm3, %v825_v42 }
 0x180   : > { %1468 = vmatprep.mubr.msk.bf16.mxu0 %vm1573_vm2, %v1572_v18 }
 0x23e   : > { %v524_v43 = vpop.f32.mrb[0].mxu1 }
 0x23f   : > { %v530_v44 = vmul.f32 0.25, %v524_v43  ;;  %v1416_v45 = vpop.f32.mrb[1].mxu1 }
 0x240   : > { %v527_v46 = vpop.f32.mrb[2].mxu1 }
 0x241   : > { %v1417_v47 = vpop.f32.mrb[3].mxu1  ;;  %v538_v48 = vsel %vm537_vm5, %v530_v44, -1e+30 }
 0x242   : > { %v643_v49 = vpop.f32.mrb[4].mxu0  ;;  %v540_v50 = vsel %vm539_vm6, %v538_v48, -inf }
 0x243   : > { %v649_v51 = vmul.f32 0.25, %v643_v49  ;;  %541 = vmax.xlane.f32.xlu1 %v540_v50  ;;  %v1428_v52 = vpop.f32.mrb[5].mxu0 }
 0x244   : > { %v646_v53 = vpop.f32.mrb[6].mxu0 }
 0x245   : > { %v1429_v54 = vpop.f32.mrb[7].mxu0  ;;  %v650_v55 = vsel %vm537_vm5, %v649_v51, -1e+30 }
 0x246   : > { %v651_v56 = vsel %vm539_vm6, %v650_v55, -inf }
 0x247   : > { %652 = vmax.xlane.f32.xlu0 %v651_v56  ;;  %v1534_v56 = vld [vmem:[%s1846_s4 + $0x8] sm:$0xff]  }
 0x24a   : > { %v756_v57 = vpop.f32.mrb[8].mxu0 }
 0x24b   : > { %v762_v58 = vmul.f32 0.25, %v756_v57  ;;  %v1440_v59 = vpop.f32.mrb[9].mxu0 }
 0x24c   : > { %v759_v60 = vpop.f32.mrb[10].mxu0 }
 0x24d   : > { %v1441_v61 = vpop.f32.mrb[11].mxu0  ;;  %v763_v62 = vsel %vm537_vm5, %v762_v58, -1e+30  ;;  %v1535_v60 = vld [vmem:[%s1846_s4 + $0x10] sm:$0xff]  }
 0x24e   : > { %v764_v63 = vsel %vm539_vm6, %v763_v62, -inf }
 0x24f   : > { %765 = vmax.xlane.f32.xlu0 %v764_v63 }
 0x252   : > { %v868_v0 = vpop.f32.mrb[12].mxu0 }
 0x253   : > { %v874_v1 = vmul.f32 0.25, %v868_v0  ;;  %v1452_v2 = vpop.f32.mrb[13].mxu0 }
 0x254   : > { %v871_v3 = vpop.f32.mrb[14].mxu0  ;;  %v1536_v2 = vld [vmem:[%s1846_s4 + $0x18] sm:$0xff]  }
 0x255   : > { %v1453_v4 = vpop.f32.mrb[15].mxu0  ;;  %v875_v5 = vsel %vm537_vm5, %v874_v1, -1e+30  ;;  %v1110_v3 = vsel %vm1109_vm7, %v1672_v10, 0.0 }
 0x256   : > { %v876_v6 = vsel %vm539_vm6, %v875_v5, -inf }
 0x257   : > { %877 = vmax.xlane.f32.xlu1 %v876_v6 }
 0x2d0   : > { %v542_v7 = vpop.xlane.xlu1 %541 }
 0x2d1   : > { %v543_v8 = vsub.f32 %v538_v48, %v542_v7 }
 0x2d3   : > { %v544_v9 = vmul.f32 1.442695, %v543_v8 }
 0x2d4   : > { %v653_v11 = vpop.xlane.xlu0 %652 }
 0x2d5   : > { %1545 = vpow2.f32 %v544_v9  ;;  %v654_v12 = vsub.f32 %v650_v55, %v653_v11  ;;  %v1533_v55 = vld [vmem:[%s1846_s4] sm:$0xff]  }
 0x2d6   : > { %1461 = vmatpush3.bf16.msra.mxu0 %v1533_v55 }
 0x2d7   : > { %v655_v13 = vmul.f32 1.442695, %v654_v12  ;;  %1462 = vmatprep.subr.bf16.mxu0 %v1572_v18 }
 0x2d9   : > { %1547 = vpow2.f32 %v655_v13 }
 0x2da   : > { %1463 = vmatpush3.bf16.msra.mxu0 %v1534_v56 }
 0x2db   : > { %1464 = vmatprep.subr.bf16.mxu0 %v1572_v18 }
 0x2dc   : > { %v766_v15 = vpop.xlane.xlu0 %765 }
 0x2dd   : > { %v767_v16 = vsub.f32 %v763_v62, %v766_v15 }
 0x2de   : > { %1465 = vmatpush3.bf16.msra.mxu0 %v1535_v60 }
 0x2df   : > { %v1546_v17 = vpop.eup %1545  ;;  %v768_v19 = vmul.f32 1.442695, %v767_v16  ;;  %1466 = vmatprep.subr.bf16.mxu0 %v1572_v18 }
 0x2e0   : > { %v546_v20 = vsel %vm539_vm6, %v1546_v17, 0.0 }
 0x2e1   : > { %1549 = vpow2.f32 %v768_v19  ;;  %547 = vadd.xlane.f32.xlu0 %v546_v20 }
 0x2e2   : > { %1467 = vmatpush3.bf16.msra.mxu0 %v1536_v2 }
 0x2e3   : > { %v1548_v14 = vpop.eup %1547  ;;  %1489 = vmatprep.subr.bf16.mxu0 %v1572_v18 }
 0x2e4   : > { %v657_v21 = vsel %vm539_vm6, %v1548_v14, 0.0  ;;  %v878_v24 = vpop.xlane.xlu1 %877 }
 0x2e5   : > { %658 = vadd.xlane.f32.xlu1 %v657_v21  ;;  %v879_v25 = vsub.f32 %v875_v5, %v878_v24  ;;  %v1360_v24 = vld [vmem:[%s1847_s5] ss:$0 sm:$0xff] }
 0x2e7   : > { %v880_v26 = vmul.f32 1.442695, %v879_v25 }
 0x2e9   : > { %1551 = vpow2.f32 %v880_v26 }
 0x2eb   : > { %v1550_v22 = vpop.eup %1549 }
 0x2ec   : > { %v770_v23 = vsel %vm539_vm6, %v1550_v22, 0.0 }
 0x2ed   : > { %771 = vadd.xlane.f32.xlu0 %v770_v23 }
 0x2f3   : > { %v1552_v27 = vpop.eup %1551 }
 0x2f4   : > { %v882_v28 = vsel %vm539_vm6, %v1552_v27, 0.0 }
 0x2f6   : > { %776 = vrot.lane.b32.xlu1 %v1704_v34, %s1579_s27 }
 0x303   : > { %664 = vrot.lane.b32.xlu0 %v1704_v34, %s1574_s22 }
 0x31a   : > { %883 = vadd.xlane.f32.xlu1 %v882_v28  ;;  %v1537_v28 = vld [vmem:[%s1848_s6] sm:$0xff]  }
 0x32b   : > { %888 = vrot.lane.b32.xlu1 %v1704_v34, %s1580_s28 }
 0x36e   : > { %v548_v29 = vpop.xlane.xlu0 %547 }
 0x36f   : > { %1553 = vrcp.f32 %v548_v29 }
 0x372   : > { %v659_v30 = vpop.xlane.xlu1 %658 }
 0x373   : > { %1555 = vrcp.f32 %v659_v30 }
 0x376   : > { %v777_v34 = vpop.permute.xlu1 %776 }
 0x377   : > { %v782_v42 = vsel %vm555_vm4, %v777_v34, 0 }
 0x379   : > { %v1554_v31 = vpop.eup %1553 }
 0x37a   : > { %v550_v32 = vmul.f32 %v1554_v31, %v1546_v17  ;;  %v772_v33 = vpop.xlane.xlu0 %771  ;;  %v1538_v31 = vld [vmem:[%s1848_s6 + $0x8] sm:$0xff]  }
 0x37b   : > { %1557 = vrcp.f32 %v772_v33  ;;  %v1541_v33 = vld [vmem:[%s1850_s8] sm:$0xff]  }
 0x37c   : > { %v551_v35 = vpack.c.bf16 %v550_v32, %v550_v32  ;;  %v1539_v32 = vld [vmem:[%s1848_s6 + $0x10] sm:$0xff]  }
 0x37d   : > { %v1556_v36 = vpop.eup %1555 }
 0x37e   : > { %1421 = vmatmul.mubr.msk.bf16.vlgmr.msra.gmra.mrb[4].mxu1 %vm539_vm6, %v551_v35  ;;  %v665_v37 = vpop.permute.xlu0 %664  ;;  %v661_v39 = vmul.f32 %v1556_v36, %v1548_v14  ;;  %v1542_v35 = vld [vmem:[%s1850_s8 + $0x8] sm:$0xff]  }
 0x37f   : > { %v670_v38 = vsel %vm555_vm4, %v665_v37, 0  ;;  %1432 = vmatprep.mubr.msk.bf16.mxu1 %vm1573_vm2, %v1572_v18 }
 0x380   : > { %1431 = vmatpush3.bf16.msra.mxu1 %v670_v38  ;;  %v662_v40 = vpack.c.bf16 %v661_v39, %v661_v39 }
 0x381   : > { %1442 = vmatprep.subr.bf16.mxu1 %v1572_v18 }
 0x385   : > { %v1558_v41 = vpop.eup %1557 }
 0x386   : > { %1433 = vmatmul.mubr.msk.bf16.vlgmr.msra.gmra.mrb[8].mxu1 %vm539_vm6, %v662_v40  ;;  %v774_v43 = vmul.f32 %v1558_v41, %v1550_v22  ;;  %v1543_v41 = vld [vmem:[%s1850_s8 + $0x10] sm:$0xff]  }
 0x387   : > { %1443 = vmatpush3.bf16.msra.mxu1 %v782_v42  ;;  %1444 = vmatprep.mubr.msk.bf16.mxu1 %vm1573_vm2, %v1572_v18  ;;  %v1544_v42 = vld [vmem:[%s1850_s8 + $0x18] sm:$0xff]  }
 0x388   : > { %1454 = vmatprep.subr.bf16.mxu1 %v1572_v18  ;;  %v775_v44 = vpack.c.bf16 %v774_v43, %v774_v43  ;;  %v1133_v43 = vld [vmem:[%s1849_s7] sm:$0x1] }
 0x38e   : > { %1445 = vmatmul.mubr.msk.bf16.vlgmr.msra.gmra.mrb[12].mxu1 %vm539_vm6, %v775_v44 }
 0x38f   : > { %1456 = vmatprep.mubr.msk.bf16.mxu1 %vm1573_vm2, %v1572_v18 }
 0x3a7   : > { %v884_v45 = vpop.xlane.xlu1 %883 }
 0x3a8   : > { %1559 = vrcp.f32 %v884_v45 }
 0x3ab   : > { %v889_v46 = vpop.permute.xlu1 %888 }
 0x3ac   : > { %v894_v47 = vsel %vm555_vm4, %v889_v46, 0 }
 0x3ad   : > { %1455 = vmatpush3.bf16.msra.mxu1 %v894_v47 }
 0x3ae   : > { %1472 = vmatprep.subr.mxu1 %v1572_v18 }
 0x3b2   : > { %v1560_v48 = vpop.eup %1559 }
 0x3b3   : > { %v886_v49 = vmul.f32 %v1560_v48, %v1552_v27 }
 0x3b5   : > { %v887_v50 = vpack.c.bf16 %v886_v49, %v886_v49 }
 0x3b7   : > { %1457 = vmatmul.mubr.msk.bf16.vlgmr.msra.gmra.mrb[16].mxu1 %vm539_vm6, %v887_v50 }
 0x3b8   : > { %1474 = vmatprep.mubr.msk.f32.mxu1 %vm1573_vm2, %v1572_v18 }
 0x451   : > { %v593_v51 = vpop.f32.mrb[4].mxu1 }
 0x452   : > { %v1422_v52 = vpop.f32.mrb[5].mxu1 }
 0x453   : > { %v596_v53 = vpop.f32.mrb[6].mxu1 }
 0x454   : > { %v1423_v54 = vpop.f32.mrb[7].mxu1 }
 0x459   : > { %v706_v57 = vpop.f32.mrb[8].mxu1 }
 0x45a   : > { %937 = vrot.lane.b32.xlu0 %v706_v57, %s1578_s26  ;;  %v1434_v58 = vpop.f32.mrb[9].mxu1 }
 0x45b   : > { %v709_v59 = vpop.f32.mrb[10].mxu1 }
 0x45c   : > { %v1435_v61 = vpop.f32.mrb[11].mxu1 }
 0x461   : > { %v818_v62 = vpop.f32.mrb[12].mxu1 }
 0x462   : > { %941 = vrot.lane.b32.xlu1 %v818_v62, %s1576_s24  ;;  %v1446_v63 = vpop.f32.mrb[13].mxu1 }
 0x463   : > { %v821_v0 = vpop.f32.mrb[14].mxu1 }
 0x464   : > { %v1447_v1 = vpop.f32.mrb[15].mxu1 }
 0x486   : > { %1111 = vadd.xlane.f32.xlu1 %v1110_v3 }
 0x48a   : > { %v930_v4 = vpop.f32.mrb[16].mxu1 }
 0x48b   : > { %945 = vrot.lane.b32.xlu0 %v930_v4, %s1577_s25  ;;  %v1458_v5 = vpop.f32.mrb[17].mxu1 }
 0x48c   : > { %v933_v6 = vpop.f32.mrb[18].mxu1 }
 0x48d   : > { %v1459_v7 = vpop.f32.mrb[19].mxu1 }
 0x4cc   : > { %v938_v8 = vpop.permute.xlu0 %937 }
 0x4cd   : > { %v948_v11 = vsel %vm483_vm3, %v593_v51, %v938_v8  ;;  %v1211_v51 = vld [vmem:[#allocation2] sm:$0x1] }
 0x4d4   : > { %v942_v9 = vpop.permute.xlu1 %941 }
 0x4d5   : > { %v950_v12 = vsel %vm949_vm8, %v948_v11, %v942_v9 }
 0x4fd   : > { %v946_v13 = vpop.permute.xlu0 %945 }
 0x4fe   : > { %v952_v15 = vsel %vm951_vm9, %v950_v12, %v946_v13 }
 0x4ff   : > { %v953_v16 = vpack.c.bf16 %v952_v15, %v952_v15 }
 0x501   : > { %1469 = vmatmul.mubr.msk.bf16.vlgmr.msra.gmra.mrb[16].mxu0 %vm433_vm1, %v953_v16 }
 0x502   : > { %1497 = vmatprep.mubr.msk.bf16.mxu0 %vm1573_vm2, %v1572_v18  ;;  %1490 = vmatpush3.bf16.msra.mxu0 %v1541_v33 }
 0x503   : > { %1491 = vmatprep.subr.bf16.mxu0 %v1572_v18 }
 0x506   : > { %1492 = vmatpush3.bf16.msra.mxu0 %v1542_v35 }
 0x507   : > { %1493 = vmatprep.subr.bf16.mxu0 %v1572_v18 }
 0x50a   : > { %1494 = vmatpush3.bf16.msra.mxu0 %v1543_v41 }
 0x50b   : > { %1495 = vmatprep.subr.bf16.mxu0 %v1572_v18 }
 0x50e   : > { %1496 = vmatpush3.bf16.msra.mxu0 %v1544_v42 }
 0x513   : > { %v1112_v17 = vpop.xlane.xlu1 %1111 }
 0x514   : > { %v1113_v19 = vrot.slane %v1112_v17, 4 }
 0x516   : > { %v1114_v20 = vadd.f32 %v1113_v19, %v1112_v17 }
 0x518   : > { %v1115_v14 = vrot.slane %v1114_v20, 2 }
 0x51a   : > { %v1116_v21 = vadd.f32 %v1115_v14, %v1114_v20 }
 0x51c   : > { %v1117_v22 = vrot.slane %v1116_v21, 1 }
 0x51e   : > { %v1118_v23 = vadd.f32 %v1117_v22, %v1116_v21 }
 0x520   : > { %1501 = vpush %v1118_v23 }
 0x551   : > { %s1502_s12 = spop %1501 }
 0x552   : > { %s1120_s13 = sadd.f32 1e-08, %s1502_s12 }
 0x554   : > { %v1121_v36 = vstv %s1120_s13 }
 0x555   : > { %1561 = vrcp.f32 %v1121_v36 }
 0x55f   : > { %v1562_v37 = vpop.eup %1561 }
 0x5d4   : > { %v1030_v25 = vpop.f32.mrb[16].mxu0 }
 0x5d5   : > { %v1031_v26 = vadd.f32 %v1360_v24, %v1030_v25  ;;  %v1470_v27 = vpop.f32.mrb[17].mxu0 }
 0x5d6   : > { %v1033_v29 = vpop.f32.mrb[18].mxu0 }
 0x5d7   : > { %v1471_v30 = vpop.f32.mrb[19].mxu0  ;;  %1473 = vmatpush3.msra.mxu1 %v1031_v26 }
 0x5d8   : > { %1475 = vmatmul.mubr.msk.f32.vlgmr.msra.gmra.mrb[20].mxu1 %vm539_vm6, %v1672_v10  ;;  %1477 = vmatprep.subr.bf16.mxu1 %v1572_v18  ;;  %v1540_v10 = vld [vmem:[%s1848_s6 + $0x18] sm:$0xff]  }
 0x5d9   : > { %1478 = vmatpush3.bf16.msra.mxu1 %v1537_v28  ;;  %1485 = vmatprep.mubr.msk.bf16.mxu1 %vm1573_vm2, %v1572_v18 }
 0x5da   : > { %1479 = vmatprep.subr.bf16.mxu1 %v1572_v18 }
 0x5dd   : > { %1480 = vmatpush3.bf16.msra.mxu1 %v1538_v31 }
 0x5de   : > { %1481 = vmatprep.subr.bf16.mxu1 %v1572_v18 }
 0x5e1   : > { %1482 = vmatpush3.bf16.msra.mxu1 %v1539_v32 }
 0x5e2   : > { %1483 = vmatprep.subr.bf16.mxu1 %v1572_v18 }
 0x5e5   : > { %1484 = vmatpush3.bf16.msra.mxu1 %v1540_v10 }
 0x6ab   : > { %v1105_v38 = vpop.f32.mrb[20].mxu1 }
 0x6ac   : > { %v1123_v39 = vmul.f32 %v1562_v37, %v1105_v38  ;;  %v1476_v34 = vpop.f32.mrb[21].mxu1 }
 0x6ae   : > { %v1124_v40 = vpack.c.bf16 %v1123_v39, %v1123_v39 }
 0x6b0   : > { %1486 = vmatmul.mubr.msk.bf16.vlgmr.msra.gmra.mrb[24].mxu1 %vm433_vm1, %v1124_v40 }
 0x783   : > { %v1195_v44 = vpop.f32.mrb[24].mxu1 }
 0x784   : > { %v1196_v45 = vadd.f32 %v1195_v44, %v1133_v43  ;;  %v1487_v46 = vpop.f32.mrb[25].mxu1 }
 0x785   : > { %v1198_v47 = vpop.f32.mrb[26].mxu1 }
 0x786   : > { %v1201_v48 = vmax.f32 %v1196_v45, 0.0  ;;  %v1488_v49 = vpop.f32.mrb[27].mxu1 }
 0x788   : > { %v1202_v50 = vpack.c.bf16 %v1201_v48, %v1201_v48 }
 0x78a   : > { %1498 = vmatmul.mubr.msk.bf16.vlgmr.msra.gmra.mrb[20].mxu0 %vm433_vm1, %v1202_v50 }
 0x85d   : > { %v1273_v18 = vpop.f32.mrb[20].mxu0 }
 0x85e   : > { %v1274_v52 = vadd.f32 %v1273_v18, %v1211_v51  ;;  %v1499_v53 = vpop.f32.mrb[21].mxu0 }
 0x85f   : > { %v1276_v54 = vpop.f32.mrb[22].mxu0 }
 0x860   : > { %1280 = vst.msk [vmem:[%s368_s23] sm:$0x1] %vm1279_vm10, %v1274_v52  ;;  %v1500_v55 = vpop.f32.mrb[23].mxu0 }
 0x861 PF: > { %s22_s15 = sadd.s32 1, %s1569_s15  }
 0x862   : > { %p19_p4 = scmp.ge.s32.totalorder %s22_s15, 4  }
 0x864   :  { %21 = sbr.rel (!%p19_p4) target bundleno = 3 (0x3), region = 93 }

</bundles_post_ra>
